<compile_context>
chip_gen: v5e
topology: v5e:2x2
jax: 0.10.0
libtpu: 0.0.40
codegen_flags: <defaults>
</compile_context>

<pallas_src>
import functools

import jax
import jax.numpy as jnp
from jax import lax
from jax.experimental import pallas as pl
from jax.experimental.pallas import tpu as pltpu


def _cdiv(a, b):
    return -(-a // b)


def _leaky_relu(x, slope=0.2):
    return jnp.where(x > 0, x, slope * x)


# ----------------------------------------------------------------------------
# Kernel
# ----------------------------------------------------------------------------
def mlp_kernel(x_ref, wres_ref, bres_ref, w0_ref, b0_ref, w1_ref, b1_ref,
               out_ref, *, sub_rows, sub_chunks):
    # Biases: tiny, load once in f32 (epilogue math stays in f32).
    bres = bres_ref[...].astype(jnp.float32)
    b0 = b0_ref[...].astype(jnp.float32)
    b1 = b1_ref[...].astype(jnp.float32)

    def body(c, carry):
        r0 = pl.multiple_of(c * sub_rows, sub_rows)   # sub_rows % 8 == 0
        x = x_ref[pl.ds(r0, sub_rows), :].astype(jnp.float32)

        # residual branch: x + LeakyReLU(Linear(x))   (bf16 MXU, f32 acc)
        r = jnp.dot(x.astype(jnp.bfloat16), wres_ref[...],
                    preferred_element_type=jnp.float32)
        x = x + _leaky_relu(r + bres)

        # adaptor layer 0
        h = jnp.dot(x.astype(jnp.bfloat16), w0_ref[...],
                    preferred_element_type=jnp.float32)
        h = _leaky_relu(h + b0)

        # adaptor layer 1
        h = jnp.dot(h.astype(jnp.bfloat16), w1_ref[...],
                    preferred_element_type=jnp.float32)
        h = _leaky_relu(h + b1)

        # F.normalize(p=2, dim=1): h / max(||h||, 1e-12) == h * rsqrt(max(s, 1e-24))
        sumsq = jnp.sum(h * h, axis=-1, keepdims=True)
        h = h * lax.rsqrt(jnp.maximum(sumsq, 1e-24))

        out_ref[pl.ds(r0, sub_rows), :] = h.astype(out_ref.dtype)
        return carry

    # Unrolled so the LLO scheduler can overlap chunk k's epilogue with
    # chunk k+1's MXU pushes, and vreg live ranges stay per-chunk.
    lax.fori_loop(0, sub_chunks, body, 0, unroll=True)


# ----------------------------------------------------------------------------
# Per-generation configuration and tiling
# ----------------------------------------------------------------------------
def _tpu_config():
    kind = ""
    try:
        kind = jax.devices()[0].device_kind.lower()
    except Exception:
        pass
    if "v5 lite" in kind or "v5e" in kind or "v5lite" in kind:
        # 16 MiB scoped-VMEM default, 1 vst slot -> smaller M tiles, more sub-chunks.
        return dict(target=128, min_tiles=1, sub_chunks=4, vmem_cap=96 << 20)
    if "v7" in kind:
        # 2 TCs share the parallel axis; 64 MiB physical VMEM.
        return dict(target=256, min_tiles=2, sub_chunks=2, vmem_cap=48 << 20)
    # v6e (and default): 1 TC, 128 MiB VMEM -> big tiles are fine.
    return dict(target=512, min_tiles=1, sub_chunks=2, vmem_cap=96 << 20)


def _pick_tiling(n, target, min_tiles, sub_chunks):
    """Balanced row tiling: block_rows ~= round_up(cdiv(n, tiles)).

    Avoids the 'half-of-N capped at target' pathology (near-full dead tile of
    padding for unlucky N).  On v7x (min_tiles=2) the tile count is rounded up
    to a multiple of 2 so both TensorCores get equal work.
    """
    tiles = max(_cdiv(n, target), min_tiles)
    if min_tiles > 1:
        tiles = _cdiv(tiles, min_tiles) * min_tiles
    rows = _cdiv(n, tiles)
    sc = max(1, min(sub_chunks, rows // 8)) if rows >= 8 else 1
    quantum = sc * 8                      # sub-chunk rows must be a sublane multiple
    block = max(8, _cdiv(rows, quantum) * quantum)
    return block, sc


# ----------------------------------------------------------------------------
# Wrapper
# ----------------------------------------------------------------------------
@functools.partial(jax.jit, static_argnames=("block_rows", "sub_chunks"))
def mlp_forward(x, params, block_rows=None, sub_chunks=None):
    """x: (N, input_dim) float32. params: dict of pre-transposed weights/biases."""
    n, d_in = x.shape

    # Weights fed to the MXU in bf16 (cast once here if not already);
    # biases stay f32 for the f32 epilogue.
    wres = params["wres"].astype(jnp.bfloat16)   # (d_in, d_in)
    w0 = params["w0"].astype(jnp.bfloat16)       # (d_in, h0)
    w1 = params["w1"].astype(jnp.bfloat16)       # (h0, h1)
    bres = params["bres"].astype(jnp.float32)    # (1, d_in)
    b0 = params["b0"].astype(jnp.float32)        # (1, h0)
    b1 = params["b1"].astype(jnp.float32)        # (1, h1)
    h0 = w0.shape[1]
    h1 = w1.shape[1]

    cfg = _tpu_config()
    if block_rows is None or sub_chunks is None:
        br, sc = _pick_tiling(n, cfg["target"], cfg["min_tiles"], cfg["sub_chunks"])
        block_rows = br if block_rows is None else block_rows
        sub_chunks = sc if sub_chunks is None else sub_chunks
    sub_rows = block_rows // sub_chunks

    # Pad N up to a multiple of the row tile (no dropped rows; sliced off after).
    num_tiles = _cdiv(n, block_rows)
    n_pad = num_tiles * block_rows
    x_p = jnp.pad(x, ((0, n_pad - n), (0, 0))) if n_pad != n else x

    # Whole-array, single-copy VMEM residency for weights/biases (no per-step
    # DMA, no double-buffered second copy of the weight set).
    resident = lambda: pl.BlockSpec(memory_space=pltpu.MemorySpace.VMEM)

    # Explicit VMEM budget: bf16 weights + biases + double-buffered f32 in/out
    # tiles + headroom, clamped per-generation (v7x physical VMEM is 64 MiB).
    weight_bytes = 2 * (d_in * d_in + d_in * h0 + h0 * h1)
    bias_bytes = 4 * (d_in + h0 + h1)
    tile_bytes = 4 * block_rows * (d_in + h1) * 2          # 2x double-buffered
    vmem_limit = int(min(cfg["vmem_cap"],
                         max(2 * (weight_bytes + bias_bytes + tile_bytes) + (8 << 20),
                             32 << 20)))

    cost = pl.CostEstimate(
        flops=2 * n_pad * (d_in * d_in + d_in * h0 + h0 * h1),
        transcendentals=n_pad,  # one rsqrt per row
        bytes_accessed=(4 * n_pad * (d_in + h1)
                        + weight_bytes + bias_bytes),
    )

    kernel = functools.partial(mlp_kernel, sub_rows=sub_rows, sub_chunks=sub_chunks)

    embds = pl.pallas_call(
        kernel,
        out_shape=jax.ShapeDtypeStruct((n_pad, h1), x.dtype),
        grid=(num_tiles,),
        in_specs=[
            pl.BlockSpec((block_rows, d_in), lambda i: (i, 0)),   # x row tile
            resident(),                                           # Wres^T (bf16)
            resident(),                                           # bres
            resident(),                                           # W0^T  (bf16)
            resident(),                                           # b0
            resident(),                                           # W1^T  (bf16)
            resident(),                                           # b1
        ],
        out_specs=pl.BlockSpec((block_rows, h1), lambda i: (i, 0)),
        compiler_params=pltpu.CompilerParams(
            dimension_semantics=("parallel",),
            vmem_limit_bytes=vmem_limit),
        cost_estimate=cost,
    )(x_p, wres, bres, w0, b0, w1, b1)

    if n_pad != n:
        embds = embds[:n]
    return {"embds": embds}


# ----------------------------------------------------------------------------
# Init + pure-JAX reference
# ----------------------------------------------------------------------------
def init_params(key, input_dim, adaptation_dims, num_classes):
    """Deterministic init mimicking PyTorch Linear default (U[-1/sqrt(in), 1/sqrt(in)]).
    Weights are stored pre-transposed as (in, out); matmul weights in bf16."""
    def linear(k, fan_in, fan_out):
        kw, kb = jax.random.split(k)
        bound = 1.0 / jnp.sqrt(fan_in)
        w = jax.random.uniform(kw, (fan_in, fan_out), jnp.float32, -bound, bound)
        b = jax.random.uniform(kb, (1, fan_out), jnp.float32, -bound, bound)
        return w, b

    k_res, k0, k1, k_logits = jax.random.split(key, 4)
    wres, bres = linear(k_res, input_dim, input_dim)
    w0, b0 = linear(k0, input_dim, adaptation_dims[0])
    w1, b1 = linear(k1, adaptation_dims[0], adaptation_dims[1])
    # logits layer exists in the module but is unused (with_classification=False)
    wl, bl = linear(k_logits, adaptation_dims[-1], num_classes)
    return {"wres": wres.astype(jnp.bfloat16), "bres": bres,
            "w0": w0.astype(jnp.bfloat16), "b0": b0,
            "w1": w1.astype(jnp.bfloat16), "b1": b1,
            "w_logits": wl, "b_logits": bl}


def reference_forward(x, params):
    """Pure-JAX f32 reference mirroring the PyTorch forward (weights upcast)."""
    wres = params["wres"].astype(jnp.float32)
    w0 = params["w0"].astype(jnp.float32)
    w1 = params["w1"].astype(jnp.float32)
    r = _leaky_relu(x @ wres + params["bres"])
    x = x + r
    h = _leaky_relu(x @ w0 + params["b0"])
    h = _leaky_relu(h @ w1 + params["b1"])
    norm = jnp.sqrt(jnp.sum(h * h, axis=1, keepdims=True))
    return h / jnp.maximum(norm, 1e-12)


if __name__ == "__main__":
    # Small shapes consistent with the module (scaled-down input/adaptation dims).
    # N is deliberately NOT a multiple of the row tile to exercise the
    # cdiv + padding path.
    N = 200
    INPUT_DIM = 256
    ADAPT_DIMS = [256, 128]
    NUM_CLASSES = 128   # logits layer unused (with_classification=False)

    key = jax.random.PRNGKey(0)
    k_x, k_p = jax.random.split(key)
    x = jax.random.normal(k_x, (N, INPUT_DIM), jnp.float32)
    params = init_params(k_p, INPUT_DIM, ADAPT_DIMS, NUM_CLASSES)

    out = mlp_forward(x, params)
    embds = jax.block_until_ready(out["embds"])

    ref = reference_forward(x, params)
    assert embds.shape == (N, ADAPT_DIMS[-1])
    # bf16 MXU operands with f32 accumulation: loosened tolerance vs f32 reference.
    assert jnp.allclose(embds, ref, atol=3e-2, rtol=3e-2), (
        "mismatch vs reference: max abs diff = "
        f"{float(jnp.max(jnp.abs(embds - ref)))}")

    print("KERNEL_OK")
</pallas_src>

<mosaic_0001>
module attributes {stable_mosaic.version = 11 : i64} {
  func.func @mlp_kernel(%arg0: i32, %arg1: memref<208x256xf32, #tpu.memory_space<vmem>>, %arg2: memref<256x256xbf16, #tpu.memory_space<vmem>>, %arg3: memref<1x256xf32, #tpu.memory_space<vmem>>, %arg4: memref<256x256xbf16, #tpu.memory_space<vmem>>, %arg5: memref<1x256xf32, #tpu.memory_space<vmem>>, %arg6: memref<256x128xbf16, #tpu.memory_space<vmem>>, %arg7: memref<1x128xf32, #tpu.memory_space<vmem>>, %arg8: memref<208x128xf32, #tpu.memory_space<vmem>>) attributes {dimension_semantics = [#tpu.dimension_semantics<parallel>], iteration_bounds = array<i64: 1>, scalar_prefetch = 0 : i64, scratch_operands = 0 : i64, tpu.core_type = #tpu.core_type<tc>, window_params = [{transform_indices = @transform_0, window_bounds = array<i64: 208, 256>}, {pipeline_mode = #tpu.pipeline_mode<synchronous>, transform_indices = @transform_1, window_bounds = array<i64: 256, 256>}, {pipeline_mode = #tpu.pipeline_mode<synchronous>, transform_indices = @transform_2, window_bounds = array<i64: 1, 256>}, {pipeline_mode = #tpu.pipeline_mode<synchronous>, transform_indices = @transform_3, window_bounds = array<i64: 256, 256>}, {pipeline_mode = #tpu.pipeline_mode<synchronous>, transform_indices = @transform_4, window_bounds = array<i64: 1, 256>}, {pipeline_mode = #tpu.pipeline_mode<synchronous>, transform_indices = @transform_5, window_bounds = array<i64: 256, 128>}, {pipeline_mode = #tpu.pipeline_mode<synchronous>, transform_indices = @transform_6, window_bounds = array<i64: 1, 128>}, {transform_indices = @transform_7, window_bounds = array<i64: 208, 128>}]} {
    %c0 = arith.constant 0 : index
    %c0_0 = arith.constant 0 : index
    %0 = vector.load %arg3[%c0, %c0_0] : memref<1x256xf32, #tpu.memory_space<vmem>>, vector<1x256xf32>
    %c0_1 = arith.constant 0 : index
    %c0_2 = arith.constant 0 : index
    %1 = vector.load %arg5[%c0_1, %c0_2] : memref<1x256xf32, #tpu.memory_space<vmem>>, vector<1x256xf32>
    %c0_3 = arith.constant 0 : index
    %c0_4 = arith.constant 0 : index
    %2 = vector.load %arg7[%c0_3, %c0_4] : memref<1x128xf32, #tpu.memory_space<vmem>>, vector<1x128xf32>
    %c0_i32 = arith.constant 0 : i32
    %c104_i32 = arith.constant 104 : i32
    %3 = arith.muli %c0_i32, %c104_i32 : i32
    %4 = tpu.assume_multiple %3, 104 : i32
    %5 = arith.index_cast %4 : i32 to index
    %c0_5 = arith.constant 0 : index
    %6 = vector.load %arg1[%5, %c0_5] : memref<208x256xf32, #tpu.memory_space<vmem>>, vector<104x256xf32>
    %7 = arith.truncf %6 : vector<104x256xf32> to vector<104x256xbf16>
    %c0_6 = arith.constant 0 : index
    %c0_7 = arith.constant 0 : index
    %8 = vector.load %arg2[%c0_6, %c0_7] : memref<256x256xbf16, #tpu.memory_space<vmem>>, vector<256x256xbf16>
    %cst = arith.constant dense<0.000000e+00> : vector<104x256xf32>
    %9 = tpu.matmul %7, %8, %cst {dimension_numbers = #tpu.dot_dimension_numbers<[1], [0], [0], [1], [0, 0, 1, 1], [], []>} : vector<104x256xbf16>, vector<256x256xbf16>, vector<104x256xf32> -> vector<104x256xf32>
    %10 = vector.broadcast %0 : vector<1x256xf32> to vector<104x256xf32>
    %11 = arith.addf %9, %10 : vector<104x256xf32>
    %cst_8 = arith.constant 0.000000e+00 : f32
    %12 = vector.broadcast %cst_8 : f32 to vector<104x256xf32>
    %13 = arith.cmpf ogt, %11, %12 : vector<104x256xf32>
    %cst_9 = arith.constant 2.000000e-01 : f32
    %14 = vector.broadcast %cst_9 : f32 to vector<104x256xf32>
    %15 = arith.mulf %14, %11 : vector<104x256xf32>
    %16 = arith.select %13, %11, %15 : vector<104x256xi1>, vector<104x256xf32>
    %17 = arith.addf %6, %16 : vector<104x256xf32>
    %18 = arith.truncf %17 : vector<104x256xf32> to vector<104x256xbf16>
    %c0_10 = arith.constant 0 : index
    %c0_11 = arith.constant 0 : index
    %19 = vector.load %arg4[%c0_10, %c0_11] : memref<256x256xbf16, #tpu.memory_space<vmem>>, vector<256x256xbf16>
    %cst_12 = arith.constant dense<0.000000e+00> : vector<104x256xf32>
    %20 = tpu.matmul %18, %19, %cst_12 {dimension_numbers = #tpu.dot_dimension_numbers<[1], [0], [0], [1], [0, 0, 1, 1], [], []>} : vector<104x256xbf16>, vector<256x256xbf16>, vector<104x256xf32> -> vector<104x256xf32>
    %21 = vector.broadcast %1 : vector<1x256xf32> to vector<104x256xf32>
    %22 = arith.addf %20, %21 : vector<104x256xf32>
    %cst_13 = arith.constant 0.000000e+00 : f32
    %23 = vector.broadcast %cst_13 : f32 to vector<104x256xf32>
    %24 = arith.cmpf ogt, %22, %23 : vector<104x256xf32>
    %cst_14 = arith.constant 2.000000e-01 : f32
    %25 = vector.broadcast %cst_14 : f32 to vector<104x256xf32>
    %26 = arith.mulf %25, %22 : vector<104x256xf32>
    %27 = arith.select %24, %22, %26 : vector<104x256xi1>, vector<104x256xf32>
    %28 = arith.truncf %27 : vector<104x256xf32> to vector<104x256xbf16>
    %c0_15 = arith.constant 0 : index
    %c0_16 = arith.constant 0 : index
    %29 = vector.load %arg6[%c0_15, %c0_16] : memref<256x128xbf16, #tpu.memory_space<vmem>>, vector<256x128xbf16>
    %cst_17 = arith.constant dense<0.000000e+00> : vector<104x128xf32>
    %30 = tpu.matmul %28, %29, %cst_17 {dimension_numbers = #tpu.dot_dimension_numbers<[1], [0], [0], [1], [0, 0, 1, 1], [], []>} : vector<104x256xbf16>, vector<256x128xbf16>, vector<104x128xf32> -> vector<104x128xf32>
    %31 = vector.broadcast %2 : vector<1x128xf32> to vector<104x128xf32>
    %32 = arith.addf %30, %31 : vector<104x128xf32>
    %cst_18 = arith.constant 0.000000e+00 : f32
    %33 = vector.broadcast %cst_18 : f32 to vector<104x128xf32>
    %34 = arith.cmpf ogt, %32, %33 : vector<104x128xf32>
    %cst_19 = arith.constant 2.000000e-01 : f32
    %35 = vector.broadcast %cst_19 : f32 to vector<104x128xf32>
    %36 = arith.mulf %35, %32 : vector<104x128xf32>
    %37 = arith.select %34, %32, %36 : vector<104x128xi1>, vector<104x128xf32>
    %38 = arith.mulf %37, %37 : vector<104x128xf32>
    %cst_20 = arith.constant dense<0.000000e+00> : vector<104xf32>
    %39 = vector.multi_reduction <add>, %38, %cst_20 [1] : vector<104x128xf32> to vector<104xf32>
    %40 = vector.shape_cast %39 : vector<104xf32> to vector<104x1xf32>
    %cst_21 = arith.constant 1.000000e-24 : f32
    %41 = vector.broadcast %cst_21 : f32 to vector<104x1xf32>
    %42 = arith.maximumf %40, %41 : vector<104x1xf32>
    %43 = math.rsqrt %42 : vector<104x1xf32>
    %44 = vector.broadcast %43 : vector<104x1xf32> to vector<104x128xf32>
    %45 = arith.mulf %37, %44 : vector<104x128xf32>
    %46 = arith.index_cast %4 : i32 to index
    %c0_22 = arith.constant 0 : index
    %47 = vector.load %arg8[%46, %c0_22] : memref<208x128xf32, #tpu.memory_space<vmem>>, vector<104x128xf32>
    tpu.vector_store %arg8[%46, %c0_22], %45 {strides = array<i32>} : memref<208x128xf32, #tpu.memory_space<vmem>>, vector<104x128xf32>,
    %c1_i32 = arith.constant 1 : i32
    %c104_i32_23 = arith.constant 104 : i32
    %48 = arith.muli %c1_i32, %c104_i32_23 : i32
    %49 = tpu.assume_multiple %48, 104 : i32
    %50 = arith.index_cast %49 : i32 to index
    %c0_24 = arith.constant 0 : index
    %51 = vector.load %arg1[%50, %c0_24] : memref<208x256xf32, #tpu.memory_space<vmem>>, vector<104x256xf32>
    %52 = arith.truncf %51 : vector<104x256xf32> to vector<104x256xbf16>
    %c0_25 = arith.constant 0 : index
    %c0_26 = arith.constant 0 : index
    %53 = vector.load %arg2[%c0_25, %c0_26] : memref<256x256xbf16, #tpu.memory_space<vmem>>, vector<256x256xbf16>
    %cst_27 = arith.constant dense<0.000000e+00> : vector<104x256xf32>
    %54 = tpu.matmul %52, %53, %cst_27 {dimension_numbers = #tpu.dot_dimension_numbers<[1], [0], [0], [1], [0, 0, 1, 1], [], []>} : vector<104x256xbf16>, vector<256x256xbf16>, vector<104x256xf32> -> vector<104x256xf32>
    %55 = vector.broadcast %0 : vector<1x256xf32> to vector<104x256xf32>
    %56 = arith.addf %54, %55 : vector<104x256xf32>
    %cst_28 = arith.constant 0.000000e+00 : f32
    %57 = vector.broadcast %cst_28 : f32 to vector<104x256xf32>
    %58 = arith.cmpf ogt, %56, %57 : vector<104x256xf32>
    %cst_29 = arith.constant 2.000000e-01 : f32
    %59 = vector.broadcast %cst_29 : f32 to vector<104x256xf32>
    %60 = arith.mulf %59, %56 : vector<104x256xf32>
    %61 = arith.select %58, %56, %60 : vector<104x256xi1>, vector<104x256xf32>
    %62 = arith.addf %51, %61 : vector<104x256xf32>
    %63 = arith.truncf %62 : vector<104x256xf32> to vector<104x256xbf16>
    %c0_30 = arith.constant 0 : index
    %c0_31 = arith.constant 0 : index
    %64 = vector.load %arg4[%c0_30, %c0_31] : memref<256x256xbf16, #tpu.memory_space<vmem>>, vector<256x256xbf16>
    %cst_32 = arith.constant dense<0.000000e+00> : vector<104x256xf32>
    %65 = tpu.matmul %63, %64, %cst_32 {dimension_numbers = #tpu.dot_dimension_numbers<[1], [0], [0], [1], [0, 0, 1, 1], [], []>} : vector<104x256xbf16>, vector<256x256xbf16>, vector<104x256xf32> -> vector<104x256xf32>
    %66 = vector.broadcast %1 : vector<1x256xf32> to vector<104x256xf32>
    %67 = arith.addf %65, %66 : vector<104x256xf32>
    %cst_33 = arith.constant 0.000000e+00 : f32
    %68 = vector.broadcast %cst_33 : f32 to vector<104x256xf32>
    %69 = arith.cmpf ogt, %67, %68 : vector<104x256xf32>
    %cst_34 = arith.constant 2.000000e-01 : f32
    %70 = vector.broadcast %cst_34 : f32 to vector<104x256xf32>
    %71 = arith.mulf %70, %67 : vector<104x256xf32>
    %72 = arith.select %69, %67, %71 : vector<104x256xi1>, vector<104x256xf32>
    %73 = arith.truncf %72 : vector<104x256xf32> to vector<104x256xbf16>
    %c0_35 = arith.constant 0 : index
    %c0_36 = arith.constant 0 : index
    %74 = vector.load %arg6[%c0_35, %c0_36] : memref<256x128xbf16, #tpu.memory_space<vmem>>, vector<256x128xbf16>
    %cst_37 = arith.constant dense<0.000000e+00> : vector<104x128xf32>
    %75 = tpu.matmul %73, %74, %cst_37 {dimension_numbers = #tpu.dot_dimension_numbers<[1], [0], [0], [1], [0, 0, 1, 1], [], []>} : vector<104x256xbf16>, vector<256x128xbf16>, vector<104x128xf32> -> vector<104x128xf32>
    %76 = vector.broadcast %2 : vector<1x128xf32> to vector<104x128xf32>
    %77 = arith.addf %75, %76 : vector<104x128xf32>
    %cst_38 = arith.constant 0.000000e+00 : f32
    %78 = vector.broadcast %cst_38 : f32 to vector<104x128xf32>
    %79 = arith.cmpf ogt, %77, %78 : vector<104x128xf32>
    %cst_39 = arith.constant 2.000000e-01 : f32
    %80 = vector.broadcast %cst_39 : f32 to vector<104x128xf32>
    %81 = arith.mulf %80, %77 : vector<104x128xf32>
    %82 = arith.select %79, %77, %81 : vector<104x128xi1>, vector<104x128xf32>
    %83 = arith.mulf %82, %82 : vector<104x128xf32>
    %cst_40 = arith.constant dense<0.000000e+00> : vector<104xf32>
    %84 = vector.multi_reduction <add>, %83, %cst_40 [1] : vector<104x128xf32> to vector<104xf32>
    %85 = vector.shape_cast %84 : vector<104xf32> to vector<104x1xf32>
    %cst_41 = arith.constant 1.000000e-24 : f32
    %86 = vector.broadcast %cst_41 : f32 to vector<104x1xf32>
    %87 = arith.maximumf %85, %86 : vector<104x1xf32>
    %88 = math.rsqrt %87 : vector<104x1xf32>
    %89 = vector.broadcast %88 : vector<104x1xf32> to vector<104x128xf32>
    %90 = arith.mulf %82, %89 : vector<104x128xf32>
    %91 = arith.index_cast %49 : i32 to index
    %c0_42 = arith.constant 0 : index
    %92 = vector.load %arg8[%91, %c0_42] : memref<208x128xf32, #tpu.memory_space<vmem>>, vector<104x128xf32>
    tpu.vector_store %arg8[%91, %c0_42], %90 {strides = array<i32>} : memref<208x128xf32, #tpu.memory_space<vmem>>, vector<104x128xf32>,
    %c2_i32 = arith.constant 2 : i32
    return
  }
  func.func @transform_0(%arg0: i32) -> (i32, i32) {
    %c0_i32 = arith.constant 0 : i32
    %c0_i32_0 = arith.constant 0 : i32
    return %arg0, %c0_i32 : i32, i32
  }
  func.func @transform_1(%arg0: i32) -> (i32, i32) {
    %c0_i32 = arith.constant 0 : i32
    %c0_i32_0 = arith.constant 0 : i32
    %c0_i32_1 = arith.constant 0 : i32
    return %c0_i32, %c0_i32_0 : i32, i32
  }
  func.func @transform_2(%arg0: i32) -> (i32, i32) {
    %c0_i32 = arith.constant 0 : i32
    %c0_i32_0 = arith.constant 0 : i32
    %c0_i32_1 = arith.constant 0 : i32
    return %c0_i32, %c0_i32_0 : i32, i32
  }
  func.func @transform_3(%arg0: i32) -> (i32, i32) {
    %c0_i32 = arith.constant 0 : i32
    %c0_i32_0 = arith.constant 0 : i32
    %c0_i32_1 = arith.constant 0 : i32
    return %c0_i32, %c0_i32_0 : i32, i32
  }
  func.func @transform_4(%arg0: i32) -> (i32, i32) {
    %c0_i32 = arith.constant 0 : i32
    %c0_i32_0 = arith.constant 0 : i32
    %c0_i32_1 = arith.constant 0 : i32
    return %c0_i32, %c0_i32_0 : i32, i32
  }
  func.func @transform_5(%arg0: i32) -> (i32, i32) {
    %c0_i32 = arith.constant 0 : i32
    %c0_i32_0 = arith.constant 0 : i32
    %c0_i32_1 = arith.constant 0 : i32
    return %c0_i32, %c0_i32_0 : i32, i32
  }
  func.func @transform_6(%arg0: i32) -> (i32, i32) {
    %c0_i32 = arith.constant 0 : i32
    %c0_i32_0 = arith.constant 0 : i32
    %c0_i32_1 = arith.constant 0 : i32
    return %c0_i32, %c0_i32_0 : i32, i32
  }
  func.func @transform_7(%arg0: i32) -> (i32, i32) {
    %c0_i32 = arith.constant 0 : i32
    %c0_i32_0 = arith.constant 0 : i32
    return %arg0, %c0_i32 : i32, i32
  }
}

</mosaic_0001>

<bundles_post_ra>
// kernel: mlp_forward.1
= control target key start
LH: loop header
LB: loop body
LE: loop exit
PB: predicated region body
PF: predicated region fallthrough
CT: control target
= control target key end

     0   :  { %s5618_s1 = inlined_call_operand.vmem [shape: bf16[256,256], index: 1, kind: input, shape index: {}]   ;;  %s5619_s0 = inlined_call_operand.vmem [shape: f32[208,256], index: 0, kind: input, shape index: {}]   ;;  %s5620_s3 = inlined_call_operand.vmem [shape: bf16[256,256], index: 3, kind: input, shape index: {}]   ;;  %s5621_s2 = inlined_call_operand.vmem [shape: f32[1,256], index: 2, kind: input, shape index: {}]   ;;  %s5622_s5 = inlined_call_operand.vmem [shape: bf16[256,128], index: 5, kind: input, shape index: {}]   ;;  %s5623_s4 = inlined_call_operand.vmem [shape: f32[1,256], index: 4, kind: input, shape index: {}]   ;;  %s5624_s6 = inlined_call_operand.vmem [shape: f32[1,128], index: 6, kind: input, shape index: {}]   ;;  %s5625_s7 = inlined_call_operand.vmem [shape: f32[208,128], index: 7, kind: output, shape index: {}]  }
   0x1   :  { %v2990_v0 = vld [vmem:[%s5618_s1 + $0x70] sm:$0xf]  ;;  %v3626_v1 = vld [vmem:[%s5618_s1 + $0x74] sm:$0xf0]  ;;  %v3625_v5 = vld [vmem:[%s5618_s1 + $0x74] sm:$0xf] }
   0x2   :  { %v3054_v2 = vld [vmem:[%s5618_s1 + $0xf0] sm:$0xf]  ;;  %v2991_v3 = vor.u32 %v3626_v1, %v2990_v0  ;;  %v3642_v4 = vld [vmem:[%s5618_s1 + $0xf4] sm:$0xf0]  ;;  %v2992_v6 = vld [vmem:[%s5618_s1 + $0x78] sm:$0xf0] }
   0x3   :  { %v3055_v7 = vor.u32 %v3642_v4, %v3054_v2  ;;  %v2995_v8 = vor.u32 %v3625_v5, %v2992_v6  ;;  %v3641_v9 = vld [vmem:[%s5618_s1 + $0xf4] sm:$0xf]  ;;  %v3056_v10 = vld [vmem:[%s5618_s1 + $0xf8] sm:$0xf0]  ;;  %v2982_v11 = vld [vmem:[%s5618_s1 + $0x60] sm:$0xf] }
   0x4   :  { %269 = vmatpush.bf16.msra.mxu0 %v2991_v3  ;;  %v3059_v12 = vor.u32 %v3641_v9, %v3056_v10  ;;  %v3624_v13 = vld [vmem:[%s5618_s1 + $0x64] sm:$0xf0]  ;;  %v3046_v14 = vld [vmem:[%s5618_s1 + $0xe0] sm:$0xf]  ;;  %v3623_v18 = vld [vmem:[%s5618_s1 + $0x64] sm:$0xf] }
   0x5   :  { %v3640_v15 = vld [vmem:[%s5618_s1 + $0xe4] sm:$0xf0]  ;;  %312 = vmatpush.bf16.msra.mxu1 %v3055_v7  ;;  %355 = vmatpush.bf16.msra.mxu2 %v2995_v8  ;;  %v2983_v16 = vor.u32 %v3624_v13, %v2982_v11  ;;  %v2984_v19 = vld [vmem:[%s5618_s1 + $0x68] sm:$0xf0]  ;;  %v3639_v20 = vld [vmem:[%s5618_s1 + $0xe4] sm:$0xf] }
   0x6   :  { %v3047_v17 = vor.u32 %v3640_v15, %v3046_v14  ;;  %398 = vmatpush.bf16.msra.mxu3 %v3059_v12  ;;  %v2987_v21 = vor.u32 %v3623_v18, %v2984_v19  ;;  %v3048_v22 = vld [vmem:[%s5618_s1 + $0xe8] sm:$0xf0]  ;;  %v2974_v23 = vld [vmem:[%s5618_s1 + $0x50] sm:$0xf]  ;;  %v3622_v24 = vld [vmem:[%s5618_s1 + $0x54] sm:$0xf0] }
   0x7   :  { %v3051_v25 = vor.u32 %v3639_v20, %v3048_v22  ;;  %v3038_v26 = vld [vmem:[%s5618_s1 + $0xd0] sm:$0xf]  ;;  %v3638_v27 = vld [vmem:[%s5618_s1 + $0xd4] sm:$0xf0]  ;;  %v3621_v28 = vld [vmem:[%s5618_s1 + $0x54] sm:$0xf]  ;;  %v2975_v29 = vor.u32 %v3622_v24, %v2974_v23 }
   0x8   :  { %270 = vmatpush.bf16.msra.mxu0 %v2983_v16  ;;  %v2976_v30 = vld [vmem:[%s5618_s1 + $0x58] sm:$0xf0]  ;;  %v3637_v31 = vld [vmem:[%s5618_s1 + $0xd4] sm:$0xf]  ;;  %v3039_v33 = vor.u32 %v3638_v27, %v3038_v26  ;;  %v2966_v35 = vld [vmem:[%s5618_s1 + $0x40] sm:$0xf] }
   0x9   :  { %v3040_v32 = vld [vmem:[%s5618_s1 + $0xd8] sm:$0xf0]  ;;  %313 = vmatpush.bf16.msra.mxu1 %v3047_v17  ;;  %356 = vmatpush.bf16.msra.mxu2 %v2987_v21  ;;  %v2979_v34 = vor.u32 %v3621_v28, %v2976_v30  ;;  %v3620_v36 = vld [vmem:[%s5618_s1 + $0x44] sm:$0xf0]  ;;  %v3030_v37 = vld [vmem:[%s5618_s1 + $0xc0] sm:$0xf] }
   0xa   :  { %399 = vmatpush.bf16.msra.mxu3 %v3051_v25  ;;  %v3043_v38 = vor.u32 %v3637_v31, %v3040_v32  ;;  %v3636_v39 = vld [vmem:[%s5618_s1 + $0xc4] sm:$0xf0]  ;;  %v3619_v40 = vld [vmem:[%s5618_s1 + $0x44] sm:$0xf]  ;;  %v2968_v41 = vld [vmem:[%s5618_s1 + $0x48] sm:$0xf0]  ;;  %v2967_v44 = vor.u32 %v3620_v36, %v2966_v35 }
   0xb   :  { %v3635_v42 = vld [vmem:[%s5618_s1 + $0xc4] sm:$0xf]  ;;  %v3032_v43 = vld [vmem:[%s5618_s1 + $0xc8] sm:$0xf0]  ;;  %v3031_v45 = vor.u32 %v3636_v39, %v3030_v37  ;;  %v2971_v46 = vor.u32 %v3619_v40, %v2968_v41  ;;  %v2958_v47 = vld [vmem:[%s5618_s1 + $0x30] sm:$0xf] }
   0xc   :  { %271 = vmatpush.bf16.msra.mxu0 %v2975_v29  ;;  %v3618_v48 = vld [vmem:[%s5618_s1 + $0x34] sm:$0xf0]  ;;  %v3022_v49 = vld [vmem:[%s5618_s1 + $0xb0] sm:$0xf]  ;;  %v3035_v50 = vor.u32 %v3635_v42, %v3032_v43  ;;  %v3617_v52 = vld [vmem:[%s5618_s1 + $0x34] sm:$0xf] }
   0xd   :  { %314 = vmatpush.bf16.msra.mxu1 %v3039_v33  ;;  %357 = vmatpush.bf16.msra.mxu2 %v2979_v34  ;;  %v3634_v51 = vld [vmem:[%s5618_s1 + $0xb4] sm:$0xf0]  ;;  %v2960_v53 = vld [vmem:[%s5618_s1 + $0x38] sm:$0xf0]  ;;  %v3633_v54 = vld [vmem:[%s5618_s1 + $0xb4] sm:$0xf]  ;;  %v2959_v56 = vor.u32 %v3618_v48, %v2958_v47 }
   0xe   :  { %400 = vmatpush.bf16.msra.mxu3 %v3043_v38  ;;  %v3024_v55 = vld [vmem:[%s5618_s1 + $0xb8] sm:$0xf0]  ;;  %v3023_v57 = vor.u32 %v3634_v51, %v3022_v49  ;;  %v2963_v58 = vor.u32 %v3617_v52, %v2960_v53  ;;  %v2950_v59 = vld [vmem:[%s5618_s1 + $0x20] sm:$0xf]  ;;  %v3616_v60 = vld [vmem:[%s5618_s1 + $0x24] sm:$0xf0] }
   0xf   :  { %v3014_v61 = vld [vmem:[%s5618_s1 + $0xa0] sm:$0xf]  ;;  %v3027_v62 = vor.u32 %v3633_v54, %v3024_v55  ;;  %v3632_v63 = vld [vmem:[%s5618_s1 + $0xa4] sm:$0xf0]  ;;  %v3615_v0 = vld [vmem:[%s5618_s1 + $0x24] sm:$0xf]  ;;  %v2951_v4 = vor.u32 %v3616_v60, %v2950_v59 }
  0x10   :  { %272 = vmatpush.bf16.msra.mxu0 %v2967_v44  ;;  %v2952_v1 = vld [vmem:[%s5618_s1 + $0x28] sm:$0xf0]  ;;  %v3631_v2 = vld [vmem:[%s5618_s1 + $0xa4] sm:$0xf]  ;;  %v3015_v5 = vor.u32 %v3632_v63, %v3014_v61  ;;  %v2942_v7 = vld [vmem:[%s5618_s1 + $0x10] sm:$0xf] }
  0x11   :  { %315 = vmatpush.bf16.msra.mxu1 %v3031_v45  ;;  %358 = vmatpush.bf16.msra.mxu2 %v2971_v46  ;;  %v3016_v3 = vld [vmem:[%s5618_s1 + $0xa8] sm:$0xf0]  ;;  %v2955_v6 = vor.u32 %v3615_v0, %v2952_v1  ;;  %v3614_v8 = vld [vmem:[%s5618_s1 + $0x14] sm:$0xf0]  ;;  %v3006_v9 = vld [vmem:[%s5618_s1 + $0x90] sm:$0xf] }
  0x12   :  { %401 = vmatpush.bf16.msra.mxu3 %v3035_v50  ;;  %v3019_v10 = vor.u32 %v3631_v2, %v3016_v3  ;;  %v3630_v11 = vld [vmem:[%s5618_s1 + $0x94] sm:$0xf0]  ;;  %v3613_v12 = vld [vmem:[%s5618_s1 + $0x14] sm:$0xf]  ;;  %v2944_v13 = vld [vmem:[%s5618_s1 + $0x18] sm:$0xf0]  ;;  %v2943_v16 = vor.u32 %v3614_v8, %v2942_v7 }
  0x13   :  { %v3629_v14 = vld [vmem:[%s5618_s1 + $0x94] sm:$0xf]  ;;  %v3008_v15 = vld [vmem:[%s5618_s1 + $0x98] sm:$0xf0]  ;;  %v3007_v17 = vor.u32 %v3630_v11, %v3006_v9  ;;  %v2947_v18 = vor.u32 %v3613_v12, %v2944_v13  ;;  %v2934_v19 = vld [vmem:[%s5618_s1] sm:$0xf] }
  0x14   :  { %273 = vmatpush.bf16.msra.mxu0 %v2959_v56  ;;  %v3612_v20 = vld [vmem:[%s5618_s1 + $0x4] sm:$0xf0]  ;;  %v2998_v21 = vld [vmem:[%s5618_s1 + $0x80] sm:$0xf]  ;;  %v3011_v22 = vor.u32 %v3629_v14, %v3008_v15  ;;  %v3611_v24 = vld [vmem:[%s5618_s1 + $0x4] sm:$0xf] }
  0x15   :  { %316 = vmatpush.bf16.msra.mxu1 %v3023_v57  ;;  %359 = vmatpush.bf16.msra.mxu2 %v2963_v58  ;;  %v3628_v23 = vld [vmem:[%s5618_s1 + $0x84] sm:$0xf0]  ;;  %v2936_v25 = vld [vmem:[%s5618_s1 + $0x8] sm:$0xf0]  ;;  %v3627_v26 = vld [vmem:[%s5618_s1 + $0x84] sm:$0xf]  ;;  %v2935_v28 = vor.u32 %v3612_v20, %v2934_v19 }
  0x16   :  { %402 = vmatpush.bf16.msra.mxu3 %v3027_v62  ;;  %v3000_v27 = vld [vmem:[%s5618_s1 + $0x88] sm:$0xf0]  ;;  %v4069_v29 = vld [vmem:[%s5619_s0] sm:$0xff]  ;;  %v4074_v30 = vld [vmem:[%s5619_s0 + $0x10] sm:$0xff]  ;;  %v2999_v31 = vor.u32 %v3628_v23, %v2998_v21  ;;  %v2939_v32 = vor.u32 %v3611_v24, %v2936_v25 }
  0x17   :  { %v4079_v33 = vld [vmem:[%s5619_s0 + $0x8] sm:$0xff]  ;;  %v4084_v34 = vld [vmem:[%s5619_s0 + $0x18] sm:$0xff]  ;;  %v3003_v35 = vor.u32 %v3627_v26, %v3000_v27  ;;  %v58_v36 = vpack.c.bf16 %v4074_v30, %v4069_v29  ;;  %v3657_v38 = vld [vmem:[%s5620_s3 + $0x74] sm:$0xf] }
  0x18   :  { %274 = vmatpush.bf16.msra.mxu0 %v2951_v4  ;;  %v59_v37 = vpack.c.bf16 %v4084_v34, %v4079_v33  ;;  %v3120_v39 = vld [vmem:[%s5620_s3 + $0x78] sm:$0xf0]  ;;  %v3673_v40 = vld [vmem:[%s5620_s3 + $0xf4] sm:$0xf]  ;;  %v3118_v43 = vld [vmem:[%s5620_s3 + $0x70] sm:$0xf] }
  0x19   :  { %317 = vmatpush.bf16.msra.mxu1 %v3015_v5  ;;  %360 = vmatpush.bf16.msra.mxu2 %v2955_v6  ;;  %v3123_v41 = vor.u32 %v3657_v38, %v3120_v39  ;;  %v3184_v42 = vld [vmem:[%s5620_s3 + $0xf8] sm:$0xf0]  ;;  %v3658_v44 = vld [vmem:[%s5620_s3 + $0x74] sm:$0xf0]  ;;  %v3182_v47 = vld [vmem:[%s5620_s3 + $0xf0] sm:$0xf] }
  0x1a   :  { %403 = vmatpush.bf16.msra.mxu3 %v3019_v10  ;;  %v3187_v45 = vor.u32 %v3673_v40, %v3184_v42  ;;  %v3119_v46 = vor.u32 %v3658_v44, %v3118_v43  ;;  %v3674_v48 = vld [vmem:[%s5620_s3 + $0xf4] sm:$0xf0]  ;;  %v4117_v50 = vld [vmem:[%s5619_s0 + $0x20] sm:$0xff]  ;;  %v4122_v51 = vld [vmem:[%s5619_s0 + $0x30] sm:$0xff] }
  0x1b   :  { %v3183_v49 = vor.u32 %v3674_v48, %v3182_v47  ;;  %v4127_v52 = vld [vmem:[%s5619_s0 + $0x28] sm:$0xff]  ;;  %v4132_v53 = vld [vmem:[%s5619_s0 + $0x38] sm:$0xff]  ;;  %v60_v54 = vpack.c.bf16 %v4122_v51, %v4117_v50  ;;  %v3655_v56 = vld [vmem:[%s5620_s3 + $0x64] sm:$0xf] }
  0x1c   :  { %275 = vmatpush.bf16.msra.mxu0 %v2943_v16  ;;  %v61_v55 = vpack.c.bf16 %v4132_v53, %v4127_v52  ;;  %v3112_v57 = vld [vmem:[%s5620_s3 + $0x68] sm:$0xf0]  ;;  %v3671_v58 = vld [vmem:[%s5620_s3 + $0xe4] sm:$0xf]  ;;  %v3110_v61 = vld [vmem:[%s5620_s3 + $0x60] sm:$0xf] }
  0x1d   :  { %318 = vmatpush.bf16.msra.mxu1 %v3007_v17  ;;  %361 = vmatpush.bf16.msra.mxu2 %v2947_v18  ;;  %v3115_v59 = vor.u32 %v3655_v56, %v3112_v57  ;;  %v3176_v60 = vld [vmem:[%s5620_s3 + $0xe8] sm:$0xf0]  ;;  %v3656_v62 = vld [vmem:[%s5620_s3 + $0x64] sm:$0xf0]  ;;  %v3174_v1 = vld [vmem:[%s5620_s3 + $0xe0] sm:$0xf] }
  0x1e   :  { %404 = vmatpush.bf16.msra.mxu3 %v3011_v22  ;;  %v3179_v63 = vor.u32 %v3671_v58, %v3176_v60  ;;  %v3111_v0 = vor.u32 %v3656_v62, %v3110_v61  ;;  %v3672_v2 = vld [vmem:[%s5620_s3 + $0xe4] sm:$0xf0]  ;;  %v4165_v4 = vld [vmem:[%s5619_s0 + $0x40] sm:$0xff]  ;;  %v4170_v5 = vld [vmem:[%s5619_s0 + $0x50] sm:$0xff] }
  0x1f   :  { %v3175_v3 = vor.u32 %v3672_v2, %v3174_v1  ;;  %v4175_v6 = vld [vmem:[%s5619_s0 + $0x48] sm:$0xff]  ;;  %v4180_v7 = vld [vmem:[%s5619_s0 + $0x58] sm:$0xff]  ;;  %v62_v8 = vpack.c.bf16 %v4170_v5, %v4165_v4  ;;  %v3653_v10 = vld [vmem:[%s5620_s3 + $0x54] sm:$0xf] }
  0x20   :  { %276 = vmatpush.bf16.msra.mxu0 %v2935_v28  ;;  %v63_v9 = vpack.c.bf16 %v4180_v7, %v4175_v6  ;;  %v3104_v11 = vld [vmem:[%s5620_s3 + $0x58] sm:$0xf0]  ;;  %v3669_v12 = vld [vmem:[%s5620_s3 + $0xd4] sm:$0xf]  ;;  %v3102_v15 = vld [vmem:[%s5620_s3 + $0x50] sm:$0xf] }
  0x21   :  { %319 = vmatpush.bf16.msra.mxu1 %v2999_v31  ;;  %362 = vmatpush.bf16.msra.mxu2 %v2939_v32  ;;  %v3107_v13 = vor.u32 %v3653_v10, %v3104_v11  ;;  %v3168_v14 = vld [vmem:[%s5620_s3 + $0xd8] sm:$0xf0]  ;;  %v3654_v16 = vld [vmem:[%s5620_s3 + $0x54] sm:$0xf0]  ;;  %v3166_v19 = vld [vmem:[%s5620_s3 + $0xd0] sm:$0xf] }
  0x22   :  { %405 = vmatpush.bf16.msra.mxu3 %v3003_v35  ;;  %v3171_v17 = vor.u32 %v3669_v12, %v3168_v14  ;;  %v3103_v18 = vor.u32 %v3654_v16, %v3102_v15  ;;  %v3670_v20 = vld [vmem:[%s5620_s3 + $0xd4] sm:$0xf0]  ;;  %v3651_v21 = vld [vmem:[%s5620_s3 + $0x44] sm:$0xf]  ;;  %v3096_v23 = vld [vmem:[%s5620_s3 + $0x48] sm:$0xf0] }
  0x23   :  { %277 = vmatmul.bf16.vlgmr.msra.gmra.mxu0 %v58_v36  ;;  %v3167_v22 = vor.u32 %v3670_v20, %v3166_v19  ;;  %v3099_v24 = vor.u32 %v3651_v21, %v3096_v23  ;;  %v4219_v25 = vld [vmem:[%s5619_s0 + $0x60] sm:$0xff]  ;;  %v4224_v26 = vld [vmem:[%s5619_s0 + $0x70] sm:$0xff]  ;;  %v4229_v27 = vld [vmem:[%s5619_s0 + $0x68] sm:$0xff] }
  0x24   :  { %320 = vmatmul.bf16.vlgmr.msra.gmra.mxu1 %v59_v37  ;;  %363 = vmatmul.bf16.vlgmr.msra.gmra.mxu2 %v58_v36  ;;  %v4234_v28 = vld [vmem:[%s5619_s0 + $0x78] sm:$0xff]  ;;  %v64_v31 = vpack.c.bf16 %v4224_v26, %v4219_v25  ;;  %v3667_v35 = vld [vmem:[%s5620_s3 + $0xc4] sm:$0xf]  ;;  %v3160_v36 = vld [vmem:[%s5620_s3 + $0xc8] sm:$0xf0] }
  0x25   :  { %406 = vmatmul.bf16.vlgmr.msra.gmra.mxu3 %v59_v37  ;;  %842 = vmatpush.bf16.msrb.mxu2 %v3123_v41  ;;  %v65_v32 = vpack.c.bf16 %v4234_v28, %v4229_v27  ;;  %v3094_v37 = vld [vmem:[%s5620_s3 + $0x40] sm:$0xf]  ;;  %v3163_v38 = vor.u32 %v3667_v35, %v3160_v36  ;;  %v3652_v39 = vld [vmem:[%s5620_s3 + $0x44] sm:$0xf0]  ;;  %v3649_v44 = vld [vmem:[%s5620_s3 + $0x34] sm:$0xf] }
  0x26   :  { %885 = vmatpush.bf16.msrb.mxu3 %v3187_v45  ;;  %756 = vmatpush.bf16.msrb.mxu0 %v3119_v46  ;;  %v3158_v40 = vld [vmem:[%s5620_s3 + $0xc0] sm:$0xf]  ;;  %v3668_v41 = vld [vmem:[%s5620_s3 + $0xc4] sm:$0xf0]  ;;  %v3095_v42 = vor.u32 %v3652_v39, %v3094_v37  ;;  %v3088_v45 = vld [vmem:[%s5620_s3 + $0x38] sm:$0xf0] }
  0x27   :  { %799 = vmatpush.bf16.msrb.mxu1 %v3183_v49  ;;  %v3159_v43 = vor.u32 %v3668_v41, %v3158_v40  ;;  %v3665_v46 = vld [vmem:[%s5620_s3 + $0xb4] sm:$0xf]  ;;  %v3091_v47 = vor.u32 %v3649_v44, %v3088_v45  ;;  %v3152_v48 = vld [vmem:[%s5620_s3 + $0xb8] sm:$0xf0]  ;;  %v3086_v49 = vld [vmem:[%s5620_s3 + $0x30] sm:$0xf] }
  0x28   :  { %v3150_v57 = vld [vmem:[%s5620_s3 + $0xb0] sm:$0xf]  ;;  %v3666_v58 = vld [vmem:[%s5620_s3 + $0xb4] sm:$0xf0]  ;;  %v4285_v60 = vld [vmem:[%s5619_s0 + $0x80] sm:$0xff] }
  0x29   :  { %843 = vmatpush.bf16.msrb.mxu2 %v3115_v59  ;;  %v3151_v59 = vor.u32 %v3666_v58, %v3150_v57  ;;  %v4290_v61 = vld [vmem:[%s5619_s0 + $0x90] sm:$0xff]  ;;  %v4295_v62 = vld [vmem:[%s5619_s0 + $0x88] sm:$0xff]  ;;  %v3647_v2 = vld [vmem:[%s5620_s3 + $0x24] sm:$0xf] }
  0x2a   :  { %886 = vmatpush.bf16.msrb.mxu3 %v3179_v63  ;;  %757 = vmatpush.bf16.msrb.mxu0 %v3111_v0  ;;  %v4300_v63 = vld [vmem:[%s5619_s0 + $0x98] sm:$0xff]  ;;  %v66_v0 = vpack.c.bf16 %v4290_v61, %v4285_v60  ;;  %v3144_v10 = vld [vmem:[%s5620_s3 + $0xa8] sm:$0xf0]  ;;  %v3078_v11 = vld [vmem:[%s5620_s3 + $0x20] sm:$0xf] }
  0x2b   :  { %800 = vmatpush.bf16.msrb.mxu1 %v3175_v3  ;;  %v67_v1 = vpack.c.bf16 %v4300_v63, %v4295_v62  ;;  %v3080_v3 = vld [vmem:[%s5620_s3 + $0x28] sm:$0xf0]  ;;  %v3648_v12 = vld [vmem:[%s5620_s3 + $0x24] sm:$0xf0]  ;;  %v3142_v15 = vld [vmem:[%s5620_s3 + $0xa0] sm:$0xf] }
  0x2c   :  { %v3079_v14 = vor.u32 %v3648_v12, %v3078_v11  ;;  %v3664_v16 = vld [vmem:[%s5620_s3 + $0xa4] sm:$0xf0]  ;;  %v3072_v19 = vld [vmem:[%s5620_s3 + $0x18] sm:$0xf0]  ;;  %v3661_v20 = vld [vmem:[%s5620_s3 + $0x94] sm:$0xf] }
  0x2d   :  { %844 = vmatpush.bf16.msrb.mxu2 %v3107_v13  ;;  %v3136_v21 = vld [vmem:[%s5620_s3 + $0x98] sm:$0xf0]  ;;  %v4374_v39 = vld [vmem:[%s5619_s0 + $0xc8] sm:$0xff]  ;;  %v3134_v44 = vld [vmem:[%s5620_s3 + $0x90] sm:$0xf] }
  0x2e   :  { %887 = vmatpush.bf16.msrb.mxu3 %v3171_v17  ;;  %758 = vmatpush.bf16.msrb.mxu0 %v3103_v18  ;;  %v3645_v17 = vld [vmem:[%s5620_s3 + $0x14] sm:$0xf]  ;;  %v3143_v18 = vor.u32 %v3664_v16, %v3142_v15  ;;  %v3139_v23 = vor.u32 %v3661_v20, %v3136_v21  ;;  %v4360_v35 = vld [vmem:[%s5619_s0 + $0xb8] sm:$0xff]  ;;  %v71_v41 = vpack.c.bf16 %v4374_v39, %v4374_v39  ;;  %v3062_v57 = vld [vmem:[%s5620_s3] sm:$0xf] }
  0x2f   :  { %801 = vmatpush.bf16.msrb.mxu1 %v3167_v22  ;;  %v3075_v22 = vor.u32 %v3645_v17, %v3072_v19  ;;  %v3644_v58 = vld [vmem:[%s5620_s3 + $0x4] sm:$0xf0] }
  0x31   :  { %845 = vmatpush.bf16.msrb.mxu2 %v3099_v24  ;;  %v4345_v24 = vld [vmem:[%s5619_s0 + $0xa0] sm:$0xff] }
  0x32   :  { %888 = vmatpush.bf16.msrb.mxu3 %v3163_v38  ;;  %759 = vmatpush.bf16.msrb.mxu0 %v3095_v42  ;;  %v4369_v38 = vld [vmem:[%s5619_s0 + $0xc0] sm:$0xff]  ;;  %v3070_v42 = vld [vmem:[%s5620_s3 + $0x10] sm:$0xf] }
  0x33   :  { %282 = vmatmul.bf16.gmra.mxu0 %v60_v54  ;;  %802 = vmatpush.bf16.msrb.mxu1 %v3159_v43  ;;  %v70_v40 = vpack.c.bf16 %v4369_v38, %v4369_v38  ;;  %v3646_v43 = vld [vmem:[%s5620_s3 + $0x14] sm:$0xf0] }
  0x34   :  { %325 = vmatmul.bf16.gmra.mxu1 %v61_v55  ;;  %368 = vmatmul.bf16.gmra.mxu2 %v60_v54  ;;  %v3650_v54 = vld [vmem:[%s5620_s3 + $0x34] sm:$0xf0]  ;;  %v3071_v45 = vor.u32 %v3646_v43, %v3070_v42 }
  0x35   :  { %411 = vmatmul.bf16.gmra.mxu3 %v61_v55  ;;  %v3155_v55 = vor.u32 %v3665_v46, %v3152_v48  ;;  %v3087_v56 = vor.u32 %v3650_v54, %v3086_v49  ;;  %846 = vmatpush.bf16.msrb.mxu2 %v3091_v47  ;;  %v3662_v46 = vld [vmem:[%s5620_s3 + $0x94] sm:$0xf0]  ;;  %v3643_v48 = vld [vmem:[%s5620_s3 + $0x4] sm:$0xf]  ;;  %v3064_v49 = vld [vmem:[%s5620_s3 + $0x8] sm:$0xf0] }
  0x36   :  { %v3135_v47 = vor.u32 %v3662_v46, %v3134_v44  ;;  %v3659_v54 = vld [vmem:[%s5620_s3 + $0x84] sm:$0xf] }
  0x37   :  { %889 = vmatpush.bf16.msrb.mxu3 %v3155_v55  ;;  %760 = vmatpush.bf16.msrb.mxu0 %v3087_v56  ;;  %v3067_v55 = vor.u32 %v3643_v48, %v3064_v49  ;;  %v3128_v56 = vld [vmem:[%s5620_s3 + $0x88] sm:$0xf0] }
  0x38   :  { %803 = vmatpush.bf16.msrb.mxu1 %v3151_v59  ;;  %v3131_v59 = vor.u32 %v3659_v54, %v3128_v56 }
  0x3b   :  { %761 = vmatpush.bf16.msrb.mxu0 %v3079_v14 }
  0x3c   :  { %804 = vmatpush.bf16.msrb.mxu1 %v3143_v18 }
  0x3f   :  { %762 = vmatpush.bf16.msrb.mxu0 %v3071_v45 }
  0x40   :  { %805 = vmatpush.bf16.msrb.mxu1 %v3135_v47 }
  0x43   :  { %287 = vmatmul.bf16.gmra.mxu0 %v62_v8 }
  0x44   :  { %330 = vmatmul.bf16.gmra.mxu1 %v63_v9  ;;  %373 = vmatmul.bf16.gmra.mxu2 %v62_v8  ;;  %v3663_v8 = vld [vmem:[%s5620_s3 + $0xa4] sm:$0xf] }
  0x45   :  { %416 = vmatmul.bf16.gmra.mxu3 %v63_v9  ;;  %v3083_v9 = vor.u32 %v3647_v2, %v3080_v3  ;;  %v3147_v13 = vor.u32 %v3663_v8, %v3144_v10  ;;  %v3660_v2 = vld [vmem:[%s5620_s3 + $0x84] sm:$0xf0]  ;;  %v26_v8 = vld [vmem:[%s5621_s2] sm:$0x3] }
  0x47   :  { %847 = vmatpush.bf16.msrb.mxu2 %v3083_v9  ;;  %890 = vmatpush.bf16.msrb.mxu3 %v3147_v13  ;;  %v4419_v9 = vperm.slane %v26_v8, 0  ;;  %v4422_v13 = vperm.slane %v26_v8, 1 }
  0x4b   :  { %848 = vmatpush.bf16.msrb.mxu2 %v3075_v22  ;;  %891 = vmatpush.bf16.msrb.mxu3 %v3139_v23 }
  0x4f   :  { %849 = vmatpush.bf16.msrb.mxu2 %v3067_v55  ;;  %892 = vmatpush.bf16.msrb.mxu3 %v3131_v59 }
  0x53   :  { %292 = vmatmul.bf16.gmra.mxu0 %v64_v31 }
  0x54   :  { %335 = vmatmul.bf16.gmra.mxu1 %v65_v32  ;;  %378 = vmatmul.bf16.gmra.mxu2 %v64_v31  ;;  %v4350_v31 = vld [vmem:[%s5619_s0 + $0xb0] sm:$0xff] }
  0x55   :  { %421 = vmatmul.bf16.gmra.mxu3 %v65_v32  ;;  %v4355_v32 = vld [vmem:[%s5619_s0 + $0xa8] sm:$0xff]  ;;  %v68_v36 = vpack.c.bf16 %v4350_v31, %v4345_v24 }
  0x56   :  { %v69_v37 = vpack.c.bf16 %v4360_v35, %v4355_v32 }
  0x63   :  { %297 = vmatmul.bf16.gmra.mxu0 %v66_v0 }
  0x64   :  { %340 = vmatmul.bf16.gmra.mxu1 %v67_v1  ;;  %383 = vmatmul.bf16.gmra.mxu2 %v66_v0  ;;  %v3063_v0 = vor.u32 %v3644_v58, %v3062_v57 }
  0x65   :  { %426 = vmatmul.bf16.gmra.mxu3 %v67_v1  ;;  %v3126_v1 = vld [vmem:[%s5620_s3 + $0x80] sm:$0xf] }
  0x66   :  { %763 = vmatpush.bf16.msrb.mxu0 %v3063_v0  ;;  %v3127_v3 = vor.u32 %v3660_v2, %v3126_v1 }
  0x68   :  { %806 = vmatpush.bf16.msrb.mxu1 %v3127_v3 }
  0x73   :  { %302 = vmatmul.bf16.gmra.mxu0 %v68_v36 }
  0x74   :  { %345 = vmatmul.bf16.gmra.mxu1 %v69_v37  ;;  %388 = vmatmul.bf16.gmra.mxu2 %v68_v36 }
  0x75   :  { %431 = vmatmul.bf16.gmra.mxu3 %v69_v37 }
  0x83   :  { %307 = vmatmul.bf16.gmra.mxu0 %v70_v40 }
  0x84   :  { %393 = vmatmul.bf16.gmra.mxu2 %v70_v40  ;;  %350 = vmatmul.bf16.gmra.mxu1 %v71_v41 }
  0x85   :  { %436 = vmatmul.bf16.gmra.mxu3 %v71_v41 }
  0xa0   :  { %v278_v10 = vpop.f32.mrf.mxu0 }
  0xa1   :  { %v279_v11 = vadd.f32 %v278_v10, %v4419_v9  ;;  %v321_v12 = vpop.f32.mrf.mxu1 }
  0xa3   :  { %v322_v14 = vadd.f32 %v321_v12, %v279_v11 }
  0xa5   :  { %v467_v19 = vmul.f32 0.2, %v322_v14  ;;  %vm441_vm0 = vcmp.gt.f32.partialorder %v322_v14, 0.0 }
  0xa7   :  { %v364_v15 = vpop.f32.mrf.mxu2  ;;  %v493_v36 = vsel %vm441_vm0, %v322_v14, %v467_v19 }
  0xa8   :  { %v365_v16 = vadd.f32 %v364_v15, %v4422_v13  ;;  %v407_v17 = vpop.f32.mrf.mxu3  ;;  %v280_v18 = vpop.f32.mrf.mxu0  ;;  %v519_v46 = vadd.f32 %v493_v36, %v4069_v29 }
  0xa9   :  { %v281_v20 = vadd.f32 %v280_v18, %v4419_v9  ;;  %v323_v21 = vpop.f32.mrf.mxu1 }
  0xaa   :  { %v408_v23 = vadd.f32 %v407_v17, %v365_v16 }
  0xab   :  { %v324_v22 = vadd.f32 %v323_v21, %v281_v20 }
  0xac   :  { %v468_v42 = vmul.f32 0.2, %v408_v23  ;;  %vm442_vm2 = vcmp.gt.f32.partialorder %v408_v23, 0.0 }
  0xad   :  { %vm443_vm1 = vcmp.gt.f32.partialorder %v324_v22, 0.0  ;;  %v469_v37 = vmul.f32 0.2, %v324_v22 }
  0xae   :  { %v494_v56 = vsel %vm442_vm2, %v408_v23, %v468_v42 }
  0xaf   :  { %v495_v40 = vsel %vm443_vm1, %v324_v22, %v469_v37  ;;  %v366_v41 = vpop.f32.mrf.mxu2  ;;  %v520_v1 = vadd.f32 %v494_v56, %v4079_v33  ;;  %v3682_v33 = vld [vmem:[%s5622_s5 + $0x38] sm:$0xff] }
  0xb0   :  { %v367_v43 = vadd.f32 %v366_v41, %v4422_v13  ;;  %v409_v44 = vpop.f32.mrf.mxu3  ;;  %v283_v45 = vpop.f32.mrf.mxu0  ;;  %v521_v47 = vadd.f32 %v495_v40, %v4074_v30  ;;  %1151 = vmatpush.bf16.msra.mxu0 %v3682_v33 }
  0xb1   :  { %v284_v48 = vadd.f32 %v283_v45, %v4419_v9  ;;  %v326_v49 = vpop.f32.mrf.mxu1 }
  0xb2   :  { %v410_v54 = vadd.f32 %v409_v44, %v367_v43  ;;  %v545_v55 = vpack.c.bf16 %v521_v47, %v519_v46 }
  0xb3   :  { %v327_v58 = vadd.f32 %v326_v49, %v284_v48 }
  0xb4   :  { %vm444_vm3 = vcmp.gt.f32.partialorder %v410_v54, 0.0  ;;  %v470_v57 = vmul.f32 0.2, %v410_v54  ;;  %764 = vmatmul.bf16.vlgmr.msrb.gmra.mxu0 %v545_v55  ;;  %850 = vmatmul.bf16.vlgmr.msrb.gmra.mxu2 %v545_v55 }
  0xb5   :  { %v471_v8 = vmul.f32 0.2, %v327_v58  ;;  %vm445_vm4 = vcmp.gt.f32.partialorder %v327_v58, 0.0 }
  0xb6   :  { %v496_v59 = vsel %vm444_vm3, %v410_v54, %v470_v57 }
  0xb7   :  { %v369_v0 = vpop.f32.mrf.mxu2  ;;  %v522_v29 = vadd.f32 %v496_v59, %v4084_v34  ;;  %v497_v17 = vsel %vm445_vm4, %v327_v58, %v471_v8  ;;  %v3690_v34 = vld [vmem:[%s5622_s5 + $0x78] sm:$0xff] }
  0xb8   :  { %v370_v30 = vadd.f32 %v369_v0, %v4422_v13  ;;  %v412_v2 = vpop.f32.mrf.mxu3  ;;  %v285_v3 = vpop.f32.mrf.mxu0  ;;  %1194 = vmatpush.bf16.msra.mxu1 %v3690_v34  ;;  %v523_v36 = vadd.f32 %v497_v17, %v4117_v50 }
  0xb9   :  { %v286_v10 = vadd.f32 %v285_v3, %v4419_v9  ;;  %v328_v11 = vpop.f32.mrf.mxu1  ;;  %v546_v12 = vpack.c.bf16 %v522_v29, %v520_v1 }
  0xba   :  { %v413_v15 = vadd.f32 %v412_v2, %v370_v30 }
  0xbb   :  { %v329_v14 = vadd.f32 %v328_v11, %v286_v10  ;;  %807 = vmatmul.bf16.vlgmr.msrb.gmra.mxu1 %v546_v12  ;;  %893 = vmatmul.bf16.vlgmr.msrb.gmra.mxu3 %v546_v12 }
  0xbc   :  { %v472_v20 = vmul.f32 0.2, %v413_v15  ;;  %vm446_vm6 = vcmp.gt.f32.partialorder %v413_v15, 0.0 }
  0xbd   :  { %vm447_vm5 = vcmp.gt.f32.partialorder %v329_v14, 0.0  ;;  %v473_v16 = vmul.f32 0.2, %v329_v14 }
  0xbe   :  { %v498_v45 = vsel %vm446_vm6, %v413_v15, %v472_v20 }
  0xbf   :  { %v371_v18 = vpop.f32.mrf.mxu2  ;;  %v499_v19 = vsel %vm447_vm5, %v329_v14, %v473_v16  ;;  %v524_v49 = vadd.f32 %v498_v45, %v4127_v52  ;;  %v3681_v52 = vld [vmem:[%s5622_s5 + $0x30] sm:$0xff] }
  0xc0   :  { %v372_v21 = vadd.f32 %v371_v18, %v4422_v13  ;;  %v414_v22 = vpop.f32.mrf.mxu3  ;;  %v288_v23 = vpop.f32.mrf.mxu0  ;;  %v525_v37 = vadd.f32 %v499_v19, %v4122_v51  ;;  %1152 = vmatpush.bf16.msra.mxu0 %v3681_v52 }
  0xc1   :  { %v289_v40 = vadd.f32 %v288_v23, %v4419_v9  ;;  %v331_v41 = vpop.f32.mrf.mxu1 }
  0xc2   :  { %v415_v42 = vadd.f32 %v414_v22, %v372_v21  ;;  %v547_v43 = vpack.c.bf16 %v525_v37, %v523_v36 }
  0xc3   :  { %v332_v46 = vadd.f32 %v331_v41, %v289_v40 }
  0xc4   :  { %vm448_vm7 = vcmp.gt.f32.partialorder %v415_v42, 0.0  ;;  %v474_v44 = vmul.f32 0.2, %v415_v42  ;;  %769 = vmatmul.bf16.gmra.mxu0 %v547_v43  ;;  %855 = vmatmul.bf16.gmra.mxu2 %v547_v43 }
  0xc5   :  { %v475_v56 = vmul.f32 0.2, %v332_v46  ;;  %vm449_vm8 = vcmp.gt.f32.partialorder %v332_v46, 0.0 }
  0xc6   :  { %v500_v47 = vsel %vm448_vm7, %v415_v42, %v474_v44 }
  0xc7   :  { %v374_v48 = vpop.f32.mrf.mxu2  ;;  %v526_v50 = vadd.f32 %v500_v47, %v4132_v53  ;;  %v501_v30 = vsel %vm449_vm8, %v332_v46, %v475_v56  ;;  %v3689_v53 = vld [vmem:[%s5622_s5 + $0x70] sm:$0xff] }
  0xc8   :  { %v375_v51 = vadd.f32 %v374_v48, %v4422_v13  ;;  %v417_v54 = vpop.f32.mrf.mxu3  ;;  %v290_v55 = vpop.f32.mrf.mxu0  ;;  %1195 = vmatpush.bf16.msra.mxu1 %v3689_v53  ;;  %v527_v14 = vadd.f32 %v501_v30, %v4165_v4 }
  0xc9   :  { %v291_v57 = vadd.f32 %v290_v55, %v4419_v9  ;;  %v333_v58 = vpop.f32.mrf.mxu1  ;;  %v548_v59 = vpack.c.bf16 %v526_v50, %v524_v49  ;;  %v3688_v49 = vld [vmem:[%s5622_s5 + $0x68] sm:$0xff] }
  0xca   :  { %v418_v1 = vadd.f32 %v417_v54, %v375_v51 }
  0xcb   :  { %v334_v0 = vadd.f32 %v333_v58, %v291_v57  ;;  %812 = vmatmul.bf16.gmra.mxu1 %v548_v59  ;;  %898 = vmatmul.bf16.gmra.mxu3 %v548_v59 }
  0xcc   :  { %v476_v8 = vmul.f32 0.2, %v418_v1  ;;  %vm450_vm10 = vcmp.gt.f32.partialorder %v418_v1, 0.0  ;;  %1196 = vmatpush.bf16.msra.mxu1 %v3688_v49 }
  0xcd   :  { %vm451_vm9 = vcmp.gt.f32.partialorder %v334_v0, 0.0  ;;  %v477_v29 = vmul.f32 0.2, %v334_v0 }
  0xce   :  { %v502_v19 = vsel %vm450_vm10, %v418_v1, %v476_v8 }
  0xcf   :  { %v376_v2 = vpop.f32.mrf.mxu2  ;;  %v503_v3 = vsel %vm451_vm9, %v334_v0, %v477_v29  ;;  %v528_v23 = vadd.f32 %v502_v19, %v4175_v6  ;;  %v3680_v6 = vld [vmem:[%s5622_s5 + $0x28] sm:$0xff]  ;;  %v3686_v19 = vld [vmem:[%s5622_s5 + $0x58] sm:$0xff] }
  0xd0   :  { %v377_v10 = vadd.f32 %v376_v2, %v4422_v13  ;;  %v419_v11 = vpop.f32.mrf.mxu3  ;;  %v293_v12 = vpop.f32.mrf.mxu0  ;;  %v529_v15 = vadd.f32 %v503_v3, %v4170_v5  ;;  %1153 = vmatpush.bf16.msra.mxu0 %v3680_v6 }
  0xd1   :  { %v294_v16 = vadd.f32 %v293_v12, %v4419_v9  ;;  %v336_v17 = vpop.f32.mrf.mxu1 }
  0xd2   :  { %v420_v33 = vadd.f32 %v419_v11, %v377_v10  ;;  %v549_v34 = vpack.c.bf16 %v529_v15, %v527_v14 }
  0xd3   :  { %v337_v20 = vadd.f32 %v336_v17, %v294_v16 }
  0xd4   :  { %vm452_vm11 = vcmp.gt.f32.partialorder %v420_v33, 0.0  ;;  %v478_v18 = vmul.f32 0.2, %v420_v33  ;;  %774 = vmatmul.bf16.gmra.mxu0 %v549_v34  ;;  %860 = vmatmul.bf16.gmra.mxu2 %v549_v34 }
  0xd5   :  { %v479_v40 = vmul.f32 0.2, %v337_v20  ;;  %vm453_vm12 = vcmp.gt.f32.partialorder %v337_v20, 0.0 }
  0xd6   :  { %v504_v21 = vsel %vm452_vm11, %v420_v33, %v478_v18 }
  0xd7   :  { %v379_v22 = vpop.f32.mrf.mxu2  ;;  %v530_v4 = vadd.f32 %v504_v21, %v4180_v7  ;;  %v505_v47 = vsel %vm453_vm12, %v337_v20, %v479_v40 }
  0xd8   :  { %v380_v5 = vadd.f32 %v379_v22, %v4422_v13  ;;  %v422_v36 = vpop.f32.mrf.mxu3  ;;  %v295_v37 = vpop.f32.mrf.mxu0  ;;  %v531_v56 = vadd.f32 %v505_v47, %v4219_v25  ;;  %v3679_v25 = vld [vmem:[%s5622_s5 + $0x20] sm:$0xff] }
  0xd9   :  { %v296_v41 = vadd.f32 %v295_v37, %v4419_v9  ;;  %v338_v42 = vpop.f32.mrf.mxu1  ;;  %v550_v43 = vpack.c.bf16 %v530_v4, %v528_v23  ;;  %1154 = vmatpush.bf16.msra.mxu0 %v3679_v25 }
  0xda   :  { %v423_v45 = vadd.f32 %v422_v36, %v380_v5 }
  0xdb   :  { %v339_v44 = vadd.f32 %v338_v42, %v296_v41  ;;  %817 = vmatmul.bf16.gmra.mxu1 %v550_v43  ;;  %903 = vmatmul.bf16.gmra.mxu3 %v550_v43 }
  0xdc   :  { %v480_v50 = vmul.f32 0.2, %v423_v45  ;;  %vm454_vm14 = vcmp.gt.f32.partialorder %v423_v45, 0.0 }
  0xdd   :  { %vm455_vm13 = vcmp.gt.f32.partialorder %v339_v44, 0.0  ;;  %v481_v46 = vmul.f32 0.2, %v339_v44 }
  0xde   :  { %v506_v30 = vsel %vm454_vm14, %v423_v45, %v480_v50 }
  0xdf   :  { %v381_v7 = vpop.f32.mrf.mxu2  ;;  %v507_v48 = vsel %vm455_vm13, %v339_v44, %v481_v46  ;;  %v532_v3 = vadd.f32 %v506_v30, %v4229_v27 }
  0xe0   :  { %v382_v51 = vadd.f32 %v381_v7, %v4422_v13  ;;  %v424_v54 = vpop.f32.mrf.mxu3  ;;  %v298_v55 = vpop.f32.mrf.mxu0  ;;  %v533_v57 = vadd.f32 %v507_v48, %v4224_v26  ;;  %v3687_v26 = vld [vmem:[%s5622_s5 + $0x60] sm:$0xff] }
  0xe1   :  { %v299_v58 = vadd.f32 %v298_v55, %v4419_v9  ;;  %v341_v59 = vpop.f32.mrf.mxu1  ;;  %1197 = vmatpush.bf16.msra.mxu1 %v3687_v26 }
  0xe2   :  { %v425_v0 = vadd.f32 %v424_v54, %v382_v51  ;;  %v551_v1 = vpack.c.bf16 %v533_v57, %v531_v56  ;;  %v3677_v57 = vld [vmem:[%s5622_s5 + $0x10] sm:$0xff] }
  0xe3   :  { %v342_v52 = vadd.f32 %v341_v59, %v299_v58 }
  0xe4   :  { %vm456_vm15 = vcmp.gt.f32.partialorder %v425_v0, 0.0  ;;  %v482_v29 = vmul.f32 0.2, %v425_v0  ;;  %779 = vmatmul.bf16.gmra.mxu0 %v551_v1  ;;  %865 = vmatmul.bf16.gmra.mxu2 %v551_v1 }
  0xe5   :  { %v483_v14 = vmul.f32 0.2, %v342_v52  ;;  %vm457_vm0 = vcmp.gt.f32.partialorder %v342_v52, 0.0  ;;  %1198 = vmatpush.bf16.msra.mxu1 %v3686_v19 }
  0xe6   :  { %v508_v53 = vsel %vm456_vm15, %v425_v0, %v482_v29  ;;  %v3676_v0 = vld [vmem:[%s5622_s5 + $0x8] sm:$0xff] }
  0xe7   :  { %v384_v2 = vpop.f32.mrf.mxu2  ;;  %v534_v8 = vadd.f32 %v508_v53, %v4234_v28  ;;  %v509_v18 = vsel %vm457_vm0, %v342_v52, %v483_v14  ;;  %v3678_v28 = vld [vmem:[%s5622_s5 + $0x18] sm:$0xff] }
  0xe8   :  { %v385_v10 = vadd.f32 %v384_v2, %v4422_v13  ;;  %v427_v11 = vpop.f32.mrf.mxu3  ;;  %v300_v12 = vpop.f32.mrf.mxu0  ;;  %v535_v36 = vadd.f32 %v509_v18, %v4285_v60  ;;  %1155 = vmatpush.bf16.msra.mxu0 %v3678_v28 }
  0xe9   :  { %v301_v15 = vadd.f32 %v300_v12, %v4419_v9  ;;  %v343_v16 = vpop.f32.mrf.mxu1  ;;  %v552_v17 = vpack.c.bf16 %v534_v8, %v532_v3 }
  0xea   :  { %v428_v34 = vadd.f32 %v427_v11, %v385_v10 }
  0xeb   :  { %v344_v33 = vadd.f32 %v343_v16, %v301_v15  ;;  %822 = vmatmul.bf16.gmra.mxu1 %v552_v17  ;;  %908 = vmatmul.bf16.gmra.mxu3 %v552_v17 }
  0xec   :  { %v484_v22 = vmul.f32 0.2, %v428_v34  ;;  %vm458_vm2 = vcmp.gt.f32.partialorder %v428_v34, 0.0  ;;  %1156 = vmatpush.bf16.msra.mxu0 %v3677_v57  ;;  %v3720_v57 = vld [vmem:[%s5618_s1 + $0xe4] sm:$0xf0] }
  0xed   :  { %vm459_vm1 = vcmp.gt.f32.partialorder %v344_v33, 0.0  ;;  %v485_v27 = vmul.f32 0.2, %v344_v33 }
  0xee   :  { %v510_v45 = vsel %vm458_vm2, %v428_v34, %v484_v22 }
  0xef   :  { %v386_v20 = vpop.f32.mrf.mxu2  ;;  %v511_v21 = vsel %vm459_vm1, %v344_v33, %v485_v27  ;;  %v536_v60 = vadd.f32 %v510_v45, %v4295_v62  ;;  %v3685_v62 = vld [vmem:[%s5622_s5 + $0x50] sm:$0xff]  ;;  %v3722_v45 = vld [vmem:[%s5618_s1 + $0xf4] sm:$0xf0] }
  0xf0   :  { %v387_v23 = vadd.f32 %v386_v20, %v4422_v13  ;;  %v429_v4 = vpop.f32.mrf.mxu3  ;;  %v303_v5 = vpop.f32.mrf.mxu0  ;;  %v537_v37 = vadd.f32 %v511_v21, %v4290_v61  ;;  %1199 = vmatpush.bf16.msra.mxu1 %v3685_v62  ;;  %1157 = vmatpush.bf16.msra.mxu0 %v3676_v0 }
  0xf1   :  { %v304_v40 = vadd.f32 %v303_v5, %v4419_v9  ;;  %v346_v41 = vpop.f32.mrf.mxu1 }
  0xf2   :  { %v430_v42 = vadd.f32 %v429_v4, %v387_v23  ;;  %v553_v43 = vpack.c.bf16 %v537_v37, %v535_v36 }
  0xf3   :  { %v347_v46 = vadd.f32 %v346_v41, %v304_v40  ;;  %v3683_v41 = vld [vmem:[%s5622_s5 + $0x40] sm:$0xff] }
  0xf4   :  { %vm460_vm3 = vcmp.gt.f32.partialorder %v430_v42, 0.0  ;;  %v486_v44 = vmul.f32 0.2, %v430_v42  ;;  %784 = vmatmul.bf16.gmra.mxu0 %v553_v43  ;;  %870 = vmatmul.bf16.gmra.mxu2 %v553_v43 }
  0xf5   :  { %v487_v50 = vmul.f32 0.2, %v347_v46  ;;  %vm461_vm4 = vcmp.gt.f32.partialorder %v347_v46, 0.0 }
  0xf6   :  { %v512_v47 = vsel %vm460_vm3, %v430_v42, %v486_v44  ;;  %v3336_v42 = vld [vmem:[%s5618_s1 + $0x70] sm:$0xf] }
  0xf7   :  { %v389_v6 = vpop.f32.mrf.mxu2  ;;  %v538_v61 = vadd.f32 %v512_v47, %v4300_v63  ;;  %v513_v58 = vsel %vm461_vm4, %v347_v46, %v487_v50  ;;  %v3400_v44 = vld [vmem:[%s5618_s1 + $0xf0] sm:$0xf]  ;;  %v3705_v46 = vld [vmem:[%s5618_s1 + $0x74] sm:$0xf] }
  0xf8   :  { %v390_v7 = vadd.f32 %v389_v6, %v4422_v13  ;;  %v432_v48 = vpop.f32.mrf.mxu3  ;;  %v305_v49 = vpop.f32.mrf.mxu0  ;;  %v539_v25 = vadd.f32 %v513_v58, %v4345_v24  ;;  %v3401_v47 = vor.u32 %v3722_v45, %v3400_v44  ;;  %v3338_v6 = vld [vmem:[%s5618_s1 + $0x78] sm:$0xf0]  ;;  %v3717_v45 = vld [vmem:[%s5618_s1 + $0xd4] sm:$0xf] }
  0xf9   :  { %v306_v51 = vadd.f32 %v305_v49, %v4419_v9  ;;  %v348_v54 = vpop.f32.mrf.mxu1  ;;  %v554_v55 = vpack.c.bf16 %v538_v61, %v536_v60  ;;  %v3341_v60 = vor.u32 %v3705_v46, %v3338_v6  ;;  %v27_v49 = vld [vmem:[%s5623_s4] sm:$0x3]  ;;  %v3322_v44 = vld [vmem:[%s5618_s1 + $0x58] sm:$0xf0] }
  0xfa   :  { %v433_v63 = vadd.f32 %v432_v48, %v390_v7  ;;  %1762 = vmatpush.bf16.msra.mxu3 %v3401_v47  ;;  %v3721_v7 = vld [vmem:[%s5618_s1 + $0xf4] sm:$0xf]  ;;  %v3402_v48 = vld [vmem:[%s5618_s1 + $0xf8] sm:$0xf0] }
  0xfb   :  { %v349_v56 = vadd.f32 %v348_v54, %v306_v51  ;;  %827 = vmatmul.bf16.gmra.mxu1 %v554_v55  ;;  %913 = vmatmul.bf16.gmra.mxu3 %v554_v55  ;;  %v3405_v50 = vor.u32 %v3721_v7, %v3402_v48  ;;  %v3328_v51 = vld [vmem:[%s5618_s1 + $0x60] sm:$0xf]  ;;  %v3704_v54 = vld [vmem:[%s5618_s1 + $0x64] sm:$0xf0]  ;;  %v3386_v46 = vld [vmem:[%s5618_s1 + $0xd8] sm:$0xf0] }
  0xfc   :  { %v488_v30 = vmul.f32 0.2, %v433_v63  ;;  %vm462_vm6 = vcmp.gt.f32.partialorder %v433_v63, 0.0  ;;  %v3392_v55 = vld [vmem:[%s5618_s1 + $0xe0] sm:$0xf] }
  0xfd   :  { %vm463_vm5 = vcmp.gt.f32.partialorder %v349_v56, 0.0  ;;  %v489_v59 = vmul.f32 0.2, %v349_v56  ;;  %v3393_v62 = vor.u32 %v3720_v57, %v3392_v55  ;;  %v3700_v57 = vld [vmem:[%s5618_s1 + $0x44] sm:$0xf0] }
  0xfe   :  { %v514_v14 = vsel %vm462_vm6, %v433_v63, %v488_v30  ;;  %v4562_v63 = vperm.slane %v27_v49, 0 }
  0xff   :  { %v515_v1 = vsel %vm463_vm5, %v349_v56, %v489_v59  ;;  %v391_v29 = vpop.f32.mrf.mxu2  ;;  %v540_v24 = vadd.f32 %v514_v14, %v4355_v32  ;;  %v3329_v56 = vor.u32 %v3704_v54, %v3328_v51  ;;  %1763 = vmatpush.bf16.msra.mxu3 %v3393_v62 }
 0x100   :  { %v392_v52 = vadd.f32 %v391_v29, %v4422_v13  ;;  %v434_v53 = vpop.f32.mrf.mxu3  ;;  %v541_v26 = vadd.f32 %v515_v1, %v4350_v31  ;;  %v308_v2 = vpop.f32.mrf.mxu0  ;;  %v3703_v29 = vld [vmem:[%s5618_s1 + $0x64] sm:$0xf] }
 0x101   :  { %v309_v3 = vadd.f32 %v308_v2, %v4419_v9  ;;  %v351_v8 = vpop.f32.mrf.mxu1 }
 0x102   :  { %v435_v10 = vadd.f32 %v434_v53, %v392_v52  ;;  %v555_v11 = vpack.c.bf16 %v541_v26, %v539_v25  ;;  %v3330_v52 = vld [vmem:[%s5618_s1 + $0x68] sm:$0xf0]  ;;  %v3719_v53 = vld [vmem:[%s5618_s1 + $0xe4] sm:$0xf]  ;;  %v4577_v26 = vperm.slane %v27_v49, 1 }
 0x103   :  { %v352_v12 = vadd.f32 %v351_v8, %v309_v3  ;;  %v3394_v25 = vld [vmem:[%s5618_s1 + $0xe8] sm:$0xf0]  ;;  %v3333_v2 = vor.u32 %v3703_v29, %v3330_v52 }
 0x104   :  { %vm464_vm7 = vcmp.gt.f32.partialorder %v435_v10, 0.0  ;;  %v490_v15 = vmul.f32 0.2, %v435_v10  ;;  %789 = vmatmul.bf16.gmra.mxu0 %v555_v11  ;;  %875 = vmatmul.bf16.gmra.mxu2 %v555_v11  ;;  %v3397_v3 = vor.u32 %v3719_v53, %v3394_v25 }
 0x105   :  { %v491_v16 = vmul.f32 0.2, %v352_v12  ;;  %vm465_vm8 = vcmp.gt.f32.partialorder %v352_v12, 0.0 }
 0x106   :  { %v516_v17 = vsel %vm464_vm7, %v435_v10, %v490_v15 }
 0x107   :  { %v542_v31 = vadd.f32 %v516_v17, %v4360_v35  ;;  %v394_v33 = vpop.f32.mrf.mxu2  ;;  %v517_v19 = vsel %vm465_vm8, %v352_v12, %v491_v16  ;;  %v3684_v35 = vld [vmem:[%s5622_s5 + $0x48] sm:$0xff] }
 0x108   :  { %v395_v34 = vadd.f32 %v394_v33, %v4422_v13  ;;  %v437_v27 = vpop.f32.mrf.mxu3  ;;  %v310_v18 = vpop.f32.mrf.mxu0  ;;  %v543_v23 = vadd.f32 %v517_v19, %v4369_v38  ;;  %1200 = vmatpush.bf16.msra.mxu1 %v3684_v35  ;;  %v3675_v38 = vld [vmem:[%s5622_s5] sm:$0xff]  ;;  %v3320_v33 = vld [vmem:[%s5618_s1 + $0x50] sm:$0xf] }
 0x109   :  { %v556_v28 = vpack.c.bf16 %v542_v31, %v540_v24  ;;  %v353_v20 = vpop.f32.mrf.mxu1  ;;  %1158 = vmatpush.bf16.msra.mxu0 %v3675_v38  ;;  %v3384_v18 = vld [vmem:[%s5618_s1 + $0xd0] sm:$0xf] }
 0x10a   :  { %v438_v21 = vadd.f32 %v437_v27, %v395_v34  ;;  %v557_v32 = vpack.c.bf16 %v543_v23, %v543_v23  ;;  %v3702_v27 = vld [vmem:[%s5618_s1 + $0x54] sm:$0xf0] }
 0x10b   :  { %832 = vmatmul.bf16.gmra.mxu1 %v556_v28  ;;  %918 = vmatmul.bf16.gmra.mxu3 %v556_v28  ;;  %v3718_v28 = vld [vmem:[%s5618_s1 + $0xd4] sm:$0xf0] }
 0x10c   :  { %v492_v22 = vmul.f32 0.2, %v438_v21  ;;  %vm466_vm9 = vcmp.gt.f32.partialorder %v438_v21, 0.0  ;;  %1201 = vmatpush.bf16.msra.mxu1 %v3683_v41 }
 0x10d   :  { %1805 = vmatpush.bf16.msrb.mxu0 %v3341_v60  ;;  %v3389_v60 = vor.u32 %v3717_v45, %v3386_v46  ;;  %v3306_v45 = vld [vmem:[%s5618_s1 + $0x38] sm:$0xf0] }
 0x10e   :  { %v518_v5 = vsel %vm466_vm9, %v438_v21, %v492_v22  ;;  %v3321_v21 = vor.u32 %v3702_v27, %v3320_v33  ;;  %v3385_v22 = vor.u32 %v3718_v28, %v3384_v18  ;;  %v3378_v18 = vld [vmem:[%s5618_s1 + $0xc8] sm:$0xf0]  ;;  %v3304_v28 = vld [vmem:[%s5618_s1 + $0x30] sm:$0xf] }
 0x10f   :  { %v396_v4 = vpop.f32.mrf.mxu2  ;;  %v544_v37 = vadd.f32 %v518_v5, %v4374_v39  ;;  %v3706_v39 = vld [vmem:[%s5618_s1 + $0x74] sm:$0xf0] }
 0x110   :  { %v439_v36 = vpop.f32.mrf.mxu3  ;;  %v3337_v43 = vor.u32 %v3706_v39, %v3336_v42  ;;  %1848 = vmatpush.bf16.msrb.mxu1 %v3405_v50  ;;  %1764 = vmatpush.bf16.msra.mxu3 %v3385_v22  ;;  %v3701_v39 = vld [vmem:[%s5618_s1 + $0x54] sm:$0xf] }
 0x111   :  { %v558_v40 = vpack.c.bf16 %v544_v37, %v544_v37  ;;  %1806 = vmatpush.bf16.msrb.mxu0 %v3333_v2  ;;  %v3325_v6 = vor.u32 %v3701_v39, %v3322_v44  ;;  %v3697_v44 = vld [vmem:[%s5618_s1 + $0x34] sm:$0xf] }
 0x112   :  { %1719 = vmatpush.bf16.msra.mxu2 %v3337_v43 }
 0x114   :  { %794 = vmatmul.bf16.gmra.mxu0 %v557_v32  ;;  %880 = vmatmul.bf16.gmra.mxu2 %v557_v32 }
 0x115   :  { %1849 = vmatpush.bf16.msrb.mxu1 %v3397_v3  ;;  %1807 = vmatpush.bf16.msrb.mxu0 %v3325_v6 }
 0x116   :  { %1720 = vmatpush.bf16.msra.mxu2 %v3329_v56  ;;  %v3312_v56 = vld [vmem:[%s5618_s1 + $0x40] sm:$0xf] }
 0x119   :  { %1850 = vmatpush.bf16.msrb.mxu1 %v3389_v60  ;;  %v3309_v60 = vor.u32 %v3697_v44, %v3306_v45  ;;  %v3352_v45 = vld [vmem:[%s5618_s1 + $0x90] sm:$0xf] }
 0x11a   :  { %1721 = vmatpush.bf16.msra.mxu2 %v3321_v21 }
 0x11b   :  { %837 = vmatmul.bf16.gmra.mxu1 %v558_v40  ;;  %923 = vmatmul.bf16.gmra.mxu3 %v558_v40 }
 0x131   :  { %v765_v61 = vpop.f32.mrf.mxu0 }
 0x132   :  { %v766_v1 = vadd.f32 %v765_v61, %v4562_v63 }
 0x137   :  { %v851_v58 = vpop.f32.mrf.mxu2 }
 0x138   :  { %v808_v59 = vpop.f32.mrf.mxu1  ;;  %v852_v15 = vadd.f32 %v851_v58, %v4577_v26 }
 0x139   :  { %v767_v0 = vpop.f32.mrf.mxu0  ;;  %v809_v30 = vadd.f32 %v808_v59, %v766_v1  ;;  %v3313_v59 = vor.u32 %v3700_v57, %v3312_v56  ;;  %v3716_v1 = vld [vmem:[%s5618_s1 + $0xc4] sm:$0xf0]  ;;  %v3713_v56 = vld [vmem:[%s5618_s1 + $0xb4] sm:$0xf] }
 0x13a   :  { %v768_v10 = vadd.f32 %v767_v0, %v4562_v63  ;;  %v3376_v0 = vld [vmem:[%s5618_s1 + $0xc0] sm:$0xf] }
 0x13b   :  { %v954_v12 = vmul.f32 0.2, %v809_v30  ;;  %vm928_vm10 = vcmp.gt.f32.partialorder %v809_v30, 0.0  ;;  %1722 = vmatpush.bf16.msra.mxu2 %v3313_v59  ;;  %v3377_v53 = vor.u32 %v3716_v1, %v3376_v0  ;;  %v3296_v1 = vld [vmem:[%s5618_s1 + $0x20] sm:$0xf] }
 0x13d   :  { %v980_v34 = vsel %vm928_vm10, %v809_v30, %v954_v12  ;;  %1765 = vmatpush.bf16.msra.mxu3 %v3377_v53  ;;  %v3360_v53 = vld [vmem:[%s5618_s1 + $0xa0] sm:$0xf] }
 0x13e   :  { %v894_v8 = vpop.f32.mrf.mxu3 }
 0x13f   :  { %v853_v11 = vpop.f32.mrf.mxu2  ;;  %v895_v24 = vadd.f32 %v894_v8, %v852_v15  ;;  %v3699_v15 = vld [vmem:[%s5618_s1 + $0x44] sm:$0xf] }
 0x140   :  { %v810_v14 = vpop.f32.mrf.mxu1  ;;  %v854_v20 = vadd.f32 %v853_v11, %v4577_v26 }
 0x141   :  { %v811_v16 = vadd.f32 %v810_v14, %v768_v10  ;;  %v770_v17 = vpop.f32.mrf.mxu0  ;;  %v955_v5 = vmul.f32 0.2, %v895_v24  ;;  %vm929_vm12 = vcmp.gt.f32.partialorder %v895_v24, 0.0 }
 0x142   :  { %v771_v41 = vadd.f32 %v770_v17, %v4562_v63 }
 0x143   :  { %vm930_vm11 = vcmp.gt.f32.partialorder %v811_v16, 0.0  ;;  %v956_v31 = vmul.f32 0.2, %v811_v16  ;;  %v981_v38 = vsel %vm929_vm12, %v895_v24, %v955_v5 }
 0x145   :  { %v982_v19 = vsel %vm930_vm11, %v811_v16, %v956_v31  ;;  %v3314_v16 = vld [vmem:[%s5618_s1 + $0x48] sm:$0xf0] }
 0x146   :  { %v1006_v23 = vpack.c.bf16 %v982_v19, %v980_v34  ;;  %v896_v4 = vpop.f32.mrf.mxu3  ;;  %v3317_v33 = vor.u32 %v3699_v15, %v3314_v16  ;;  %v3715_v34 = vld [vmem:[%s5618_s1 + $0xc4] sm:$0xf]  ;;  %v3698_v19 = vld [vmem:[%s5618_s1 + $0x34] sm:$0xf0] }
 0x147   :  { %v897_v32 = vadd.f32 %v896_v4, %v854_v20  ;;  %v856_v36 = vpop.f32.mrf.mxu2  ;;  %v3381_v21 = vor.u32 %v3715_v34, %v3378_v18  ;;  %v3305_v22 = vor.u32 %v3698_v19, %v3304_v28  ;;  %v3711_v18 = vld [vmem:[%s5618_s1 + $0xa4] sm:$0xf]  ;;  %v3362_v28 = vld [vmem:[%s5618_s1 + $0xa8] sm:$0xf0] }
 0x148   :  { %v813_v35 = vpop.f32.mrf.mxu1  ;;  %1159 = vmatmul.bf16.vlgmr.msra.gmra.mxu0 %v1006_v23  ;;  %v857_v51 = vadd.f32 %v856_v36, %v4577_v26 }
 0x149   :  { %vm931_vm13 = vcmp.gt.f32.partialorder %v897_v32, 0.0  ;;  %v957_v37 = vmul.f32 0.2, %v897_v32  ;;  %v772_v40 = vpop.f32.mrf.mxu0  ;;  %v814_v47 = vadd.f32 %v813_v35, %v771_v41  ;;  %1808 = vmatpush.bf16.msrb.mxu0 %v3317_v33  ;;  %1851 = vmatpush.bf16.msrb.mxu1 %v3381_v21  ;;  %v3714_v41 = vld [vmem:[%s5618_s1 + $0xb4] sm:$0xf0] }
 0x14a   :  { %v773_v7 = vadd.f32 %v772_v40, %v4562_v63  ;;  %1723 = vmatpush.bf16.msra.mxu2 %v3305_v22  ;;  %v3695_v33 = vld [vmem:[%s5618_s1 + $0x24] sm:$0xf]  ;;  %v3365_v22 = vor.u32 %v3711_v18, %v3362_v28 }
 0x14b   :  { %v983_v42 = vsel %vm931_vm13, %v897_v32, %v957_v37  ;;  %v958_v50 = vmul.f32 0.2, %v814_v47  ;;  %vm932_vm14 = vcmp.gt.f32.partialorder %v814_v47, 0.0 }
 0x14c   :  { %v1007_v43 = vpack.c.bf16 %v983_v42, %v981_v38  ;;  %v3368_v38 = vld [vmem:[%s5618_s1 + $0xb0] sm:$0xf] }
 0x14d   :  { %v984_v30 = vsel %vm932_vm14, %v814_v47, %v958_v50  ;;  %1809 = vmatpush.bf16.msrb.mxu0 %v3309_v60 }
 0x14e   :  { %v899_v61 = vpop.f32.mrf.mxu3  ;;  %1202 = vmatmul.bf16.vlgmr.msra.gmra.mxu1 %v1007_v43  ;;  %v3369_v43 = vor.u32 %v3714_v41, %v3368_v38  ;;  %v3288_v38 = vld [vmem:[%s5618_s1 + $0x10] sm:$0xf]  ;;  %v3694_v41 = vld [vmem:[%s5618_s1 + $0x14] sm:$0xf0] }
 0x14f   :  { %v858_v48 = vpop.f32.mrf.mxu2  ;;  %v900_v62 = vadd.f32 %v899_v61, %v857_v51  ;;  %v3289_v44 = vor.u32 %v3694_v41, %v3288_v38 }
 0x150   :  { %v815_v49 = vpop.f32.mrf.mxu1  ;;  %v859_v29 = vadd.f32 %v858_v48, %v4577_v26  ;;  %1766 = vmatpush.bf16.msra.mxu3 %v3369_v43 }
 0x151   :  { %v816_v54 = vadd.f32 %v815_v49, %v773_v7  ;;  %v775_v55 = vpop.f32.mrf.mxu0  ;;  %v959_v3 = vmul.f32 0.2, %v900_v62  ;;  %vm933_vm0 = vcmp.gt.f32.partialorder %v900_v62, 0.0 }
 0x152   :  { %v776_v17 = vadd.f32 %v775_v55, %v4562_v63 }
 0x153   :  { %vm934_vm15 = vcmp.gt.f32.partialorder %v816_v54, 0.0  ;;  %v960_v58 = vmul.f32 0.2, %v816_v54  ;;  %v985_v24 = vsel %vm933_vm0, %v900_v62, %v959_v3  ;;  %v3370_v62 = vld [vmem:[%s5618_s1 + $0xb8] sm:$0xf0] }
 0x154   :  { %v3373_v0 = vor.u32 %v3713_v56, %v3370_v62 }
 0x155   :  { %v986_v52 = vsel %vm934_vm15, %v816_v54, %v960_v58 }
 0x156   :  { %v901_v25 = vpop.f32.mrf.mxu3  ;;  %v1008_v2 = vpack.c.bf16 %v986_v52, %v984_v30  ;;  %v3696_v52 = vld [vmem:[%s5618_s1 + $0x24] sm:$0xf0]  ;;  %1852 = vmatpush.bf16.msrb.mxu1 %v3373_v0 }
 0x157   :  { %v902_v8 = vadd.f32 %v901_v25, %v859_v29  ;;  %v861_v10 = vpop.f32.mrf.mxu2  ;;  %v3712_v25 = vld [vmem:[%s5618_s1 + $0xa4] sm:$0xf0] }
 0x158   :  { %v818_v11 = vpop.f32.mrf.mxu1  ;;  %1164 = vmatmul.bf16.gmra.mxu0 %v1008_v2  ;;  %v862_v35 = vadd.f32 %v861_v10, %v4577_v26  ;;  %v3297_v2 = vor.u32 %v3696_v52, %v3296_v1  ;;  %v3361_v3 = vor.u32 %v3712_v25, %v3360_v53  ;;  %v4737_v53 = vld [vmem:[%s5619_s0 + $0xd8] sm:$0xff] }
 0x159   :  { %vm935_vm1 = vcmp.gt.f32.partialorder %v902_v8, 0.0  ;;  %v961_v12 = vmul.f32 0.2, %v902_v8  ;;  %v777_v14 = vpop.f32.mrf.mxu0  ;;  %v819_v20 = vadd.f32 %v818_v11, %v776_v17  ;;  %v3290_v25 = vld [vmem:[%s5618_s1 + $0x18] sm:$0xf0] }
 0x15a   :  { %v778_v4 = vadd.f32 %v777_v14, %v4562_v63  ;;  %1724 = vmatpush.bf16.msra.mxu2 %v3297_v2  ;;  %1767 = vmatpush.bf16.msra.mxu3 %v3361_v3  ;;  %v3709_v2 = vld [vmem:[%s5618_s1 + $0x94] sm:$0xf]  ;;  %v3354_v3 = vld [vmem:[%s5618_s1 + $0x98] sm:$0xf0] }
 0x15b   :  { %v987_v31 = vsel %vm935_vm1, %v902_v8, %v961_v12  ;;  %v962_v36 = vmul.f32 0.2, %v819_v20  ;;  %vm936_vm2 = vcmp.gt.f32.partialorder %v819_v20, 0.0  ;;  %1853 = vmatpush.bf16.msrb.mxu1 %v3365_v22 }
 0x15c   :  { %v1009_v27 = vpack.c.bf16 %v987_v31, %v985_v24 }
 0x15d   :  { %v988_v47 = vsel %vm936_vm2, %v819_v20, %v962_v36 }
 0x15e   :  { %v904_v23 = vpop.f32.mrf.mxu3  ;;  %1207 = vmatmul.bf16.gmra.mxu1 %v1009_v27  ;;  %v3298_v27 = vld [vmem:[%s5618_s1 + $0x28] sm:$0xf0]  ;;  %1725 = vmatpush.bf16.msra.mxu2 %v3289_v44 }
 0x15f   :  { %v863_v5 = vpop.f32.mrf.mxu2  ;;  %v905_v42 = vadd.f32 %v904_v23, %v862_v35  ;;  %v3301_v21 = vor.u32 %v3695_v33, %v3298_v27 }
 0x160   :  { %v820_v32 = vpop.f32.mrf.mxu1  ;;  %v864_v46 = vadd.f32 %v863_v5, %v4577_v26 }
 0x161   :  { %v821_v37 = vadd.f32 %v820_v32, %v778_v4  ;;  %v780_v40 = vpop.f32.mrf.mxu0  ;;  %v963_v48 = vmul.f32 0.2, %v905_v42  ;;  %vm937_vm4 = vcmp.gt.f32.partialorder %v905_v42, 0.0  ;;  %1810 = vmatpush.bf16.msrb.mxu0 %v3301_v21 }
 0x162   :  { %v781_v57 = vadd.f32 %v780_v40, %v4562_v63 }
 0x163   :  { %vm938_vm3 = vcmp.gt.f32.partialorder %v821_v37, 0.0  ;;  %v964_v39 = vmul.f32 0.2, %v821_v37  ;;  %v989_v58 = vsel %vm937_vm4, %v905_v42, %v963_v48 }
 0x165   :  { %v990_v6 = vsel %vm938_vm3, %v821_v37, %v964_v39 }
 0x166   :  { %v906_v61 = vpop.f32.mrf.mxu3  ;;  %v1010_v7 = vpack.c.bf16 %v990_v6, %v988_v47  ;;  %v3710_v47 = vld [vmem:[%s5618_s1 + $0x94] sm:$0xf0] }
 0x167   :  { %v907_v49 = vadd.f32 %v906_v61, %v864_v46  ;;  %v866_v50 = vpop.f32.mrf.mxu2  ;;  %v3353_v60 = vor.u32 %v3710_v47, %v3352_v45  ;;  %v3280_v61 = vld [vmem:[%s5618_s1] sm:$0xf]  ;;  %v4792_v47 = vld [vmem:[%s5619_s0 + $0xf8] sm:$0xff] }
 0x168   :  { %v823_v51 = vpop.f32.mrf.mxu1  ;;  %1169 = vmatmul.bf16.gmra.mxu0 %v1010_v7  ;;  %v867_v15 = vadd.f32 %v866_v50, %v4577_v26  ;;  %v3692_v7 = vld [vmem:[%s5618_s1 + $0x4] sm:$0xf0] }
 0x169   :  { %vm939_vm5 = vcmp.gt.f32.partialorder %v907_v49, 0.0  ;;  %v965_v54 = vmul.f32 0.2, %v907_v49  ;;  %v782_v55 = vpop.f32.mrf.mxu0  ;;  %v824_v29 = vadd.f32 %v823_v51, %v781_v57  ;;  %1768 = vmatpush.bf16.msra.mxu3 %v3353_v60 }
 0x16a   :  { %v783_v10 = vadd.f32 %v782_v55, %v4562_v63  ;;  %v3708_v55 = vld [vmem:[%s5618_s1 + $0x84] sm:$0xf0] }
 0x16b   :  { %v991_v59 = vsel %vm939_vm5, %v907_v49, %v965_v54  ;;  %v966_v12 = vmul.f32 0.2, %v824_v29  ;;  %vm940_vm6 = vcmp.gt.f32.partialorder %v824_v29, 0.0  ;;  %v3281_v49 = vor.u32 %v3692_v7, %v3280_v61  ;;  %v3344_v54 = vld [vmem:[%s5618_s1 + $0x80] sm:$0xf] }
 0x16c   :  { %v1011_v30 = vpack.c.bf16 %v991_v59, %v989_v58  ;;  %v3345_v62 = vor.u32 %v3708_v55, %v3344_v54  ;;  %v4720_v58 = vld [vmem:[%s5619_s0 + $0xd0] sm:$0xff]  ;;  %v4725_v59 = vld [vmem:[%s5619_s0 + $0xe0] sm:$0xff] }
 0x16d   :  { %v992_v34 = vsel %vm940_vm6, %v824_v29, %v966_v12  ;;  %1726 = vmatpush.bf16.msra.mxu2 %v3281_v49  ;;  %v4732_v52 = vpack.c.bf16 %v4725_v59, %v4720_v58  ;;  %v4751_v12 = vld [vmem:[%s5619_s0 + $0xe8] sm:$0xff] }
 0x16e   :  { %v909_v8 = vpop.f32.mrf.mxu3  ;;  %1212 = vmatmul.bf16.gmra.mxu1 %v1011_v30  ;;  %v3693_v30 = vld [vmem:[%s5618_s1 + $0x14] sm:$0xf]  ;;  %1769 = vmatpush.bf16.msra.mxu3 %v3345_v62 }
 0x16f   :  { %v868_v11 = vpop.f32.mrf.mxu2  ;;  %v910_v24 = vadd.f32 %v909_v8, %v867_v15  ;;  %v4756_v15 = vpack.c.bf16 %v4751_v12, %v4737_v53 }
 0x170   :  { %v825_v14 = vpop.f32.mrf.mxu1  ;;  %v869_v19 = vadd.f32 %v868_v11, %v4577_v26  ;;  %v3293_v11 = vor.u32 %v3693_v30, %v3290_v25  ;;  %1727 = vmatmul.bf16.vlgmr.msra.gmra.mxu2 %v4732_v52 }
 0x171   :  { %v826_v16 = vadd.f32 %v825_v14, %v783_v10  ;;  %v785_v17 = vpop.f32.mrf.mxu0  ;;  %v967_v5 = vmul.f32 0.2, %v910_v24  ;;  %vm941_vm8 = vcmp.gt.f32.partialorder %v910_v24, 0.0  ;;  %v3357_v14 = vor.u32 %v3709_v2, %v3354_v3  ;;  %1770 = vmatmul.bf16.vlgmr.msra.gmra.mxu3 %v4756_v15 }
 0x172   :  { %v786_v42 = vadd.f32 %v785_v17, %v4562_v63  ;;  %1811 = vmatpush.bf16.msrb.mxu0 %v3293_v11 }
 0x173   :  { %vm942_vm7 = vcmp.gt.f32.partialorder %v826_v16, 0.0  ;;  %v968_v31 = vmul.f32 0.2, %v826_v16  ;;  %v993_v39 = vsel %vm941_vm8, %v910_v24, %v967_v5  ;;  %1854 = vmatpush.bf16.msrb.mxu1 %v3357_v14 }
 0x175   :  { %v994_v20 = vsel %vm942_vm7, %v826_v16, %v968_v31 }
 0x176   :  { %v911_v23 = vpop.f32.mrf.mxu3  ;;  %v1012_v4 = vpack.c.bf16 %v994_v20, %v992_v34 }
 0x177   :  { %v912_v32 = vadd.f32 %v911_v23, %v869_v19  ;;  %v871_v36 = vpop.f32.mrf.mxu2 }
 0x178   :  { %v828_v35 = vpop.f32.mrf.mxu1  ;;  %1174 = vmatmul.bf16.gmra.mxu0 %v1012_v4  ;;  %v872_v56 = vadd.f32 %v871_v36, %v4577_v26  ;;  %v3691_v36 = vld [vmem:[%s5618_s1 + $0x4] sm:$0xf] }
 0x179   :  { %vm943_vm9 = vcmp.gt.f32.partialorder %v912_v32, 0.0  ;;  %v969_v37 = vmul.f32 0.2, %v912_v32  ;;  %v787_v40 = vpop.f32.mrf.mxu0  ;;  %v829_v6 = vadd.f32 %v828_v35, %v786_v42  ;;  %v3282_v35 = vld [vmem:[%s5618_s1 + $0x8] sm:$0xf0] }
 0x17a   :  { %v788_v50 = vadd.f32 %v787_v40, %v4562_v63  ;;  %v3285_v41 = vor.u32 %v3691_v36, %v3282_v35  ;;  %v3346_v42 = vld [vmem:[%s5618_s1 + $0x88] sm:$0xf0]  ;;  %v4836_v35 = vld [vmem:[%s5619_s0 + $0x130] sm:$0xff] }
 0x17b   :  { %v995_v43 = vsel %vm943_vm9, %v912_v32, %v969_v37  ;;  %vm944_vm10 = vcmp.gt.f32.partialorder %v829_v6, 0.0  ;;  %v970_v0 = vmul.f32 0.2, %v829_v6  ;;  %v3707_v37 = vld [vmem:[%s5618_s1 + $0x84] sm:$0xf] }
 0x17c   :  { %v1013_v46 = vpack.c.bf16 %v995_v43, %v993_v39  ;;  %v4778_v39 = vld [vmem:[%s5619_s0 + $0xf0] sm:$0xff]  ;;  %v4783_v43 = vld [vmem:[%s5619_s0 + $0x100] sm:$0xff]  ;;  %v3349_v45 = vor.u32 %v3707_v37, %v3346_v42  ;;  %1812 = vmatpush.bf16.msrb.mxu0 %v3285_v41  ;;  %v3267_v41 = vld [vmem:[%s5619_s0 + $0x148] sm:$0xff] }
 0x17d   :  { %v996_v17 = vsel %vm944_vm10, %v829_v6, %v970_v0  ;;  %v4797_v6 = vld [vmem:[%s5619_s0 + $0x108] sm:$0xff]  ;;  %v4841_v37 = vld [vmem:[%s5619_s0 + $0x140] sm:$0xff] }
 0x17e   :  { %v914_v48 = vpop.f32.mrf.mxu3  ;;  %1217 = vmatmul.bf16.gmra.mxu1 %v1013_v46  ;;  %v4787_v46 = vpack.c.bf16 %v4783_v43, %v4778_v39  ;;  %v4802_v49 = vpack.c.bf16 %v4797_v6, %v4792_v47 }
 0x17f   :  { %v873_v51 = vpop.f32.mrf.mxu2  ;;  %v915_v8 = vadd.f32 %v914_v48, %v872_v56  ;;  %1855 = vmatpush.bf16.msrb.mxu1 %v3349_v45  ;;  %v3738_v45 = vld [vmem:[%s5620_s3 + $0x74] sm:$0xf0] }
 0x180   :  { %v830_v57 = vpop.f32.mrf.mxu1  ;;  %v874_v16 = vadd.f32 %v873_v51, %v4577_v26  ;;  %1732 = vmatmul.bf16.gmra.mxu2 %v4787_v46 }
 0x181   :  { %v831_v1 = vadd.f32 %v830_v57, %v788_v50  ;;  %v790_v29 = vpop.f32.mrf.mxu0  ;;  %v971_v34 = vmul.f32 0.2, %v915_v8  ;;  %vm945_vm12 = vcmp.gt.f32.partialorder %v915_v8, 0.0  ;;  %1775 = vmatmul.bf16.gmra.mxu3 %v4802_v49 }
 0x182   :  { %v791_v21 = vadd.f32 %v790_v29, %v4562_v63 }
 0x183   :  { %vm946_vm11 = vcmp.gt.f32.partialorder %v831_v1, 0.0  ;;  %v972_v10 = vmul.f32 0.2, %v831_v1  ;;  %v997_v22 = vsel %vm945_vm12, %v915_v8, %v971_v34 }
 0x185   :  { %v998_v24 = vsel %vm946_vm11, %v831_v1, %v972_v10 }
 0x186   :  { %v916_v31 = vpop.f32.mrf.mxu3  ;;  %v1014_v33 = vpack.c.bf16 %v998_v24, %v996_v17  ;;  %v4812_v24 = vld [vmem:[%s5619_s0 + $0x110] sm:$0xff] }
 0x187   :  { %v917_v27 = vadd.f32 %v916_v31, %v874_v16  ;;  %v876_v18 = vpop.f32.mrf.mxu2  ;;  %v4817_v31 = vld [vmem:[%s5619_s0 + $0x120] sm:$0xff] }
 0x188   :  { %v833_v28 = vpop.f32.mrf.mxu1  ;;  %1179 = vmatmul.bf16.gmra.mxu0 %v1014_v33  ;;  %v877_v61 = vadd.f32 %v876_v18, %v4577_v26  ;;  %v3263_v18 = vld [vmem:[%s5619_s0 + $0x128] sm:$0xff] }
 0x189   :  { %vm947_vm13 = vcmp.gt.f32.partialorder %v917_v27, 0.0  ;;  %v973_v19 = vmul.f32 0.2, %v917_v27  ;;  %v792_v20 = vpop.f32.mrf.mxu0  ;;  %v834_v5 = vadd.f32 %v833_v28, %v791_v21 }
 0x18a   :  { %v793_v40 = vadd.f32 %v792_v20, %v4562_v63 }
 0x18b   :  { %v999_v23 = vsel %vm947_vm13, %v917_v27, %v973_v19  ;;  %v974_v60 = vmul.f32 0.2, %v834_v5  ;;  %vm948_vm14 = vcmp.gt.f32.partialorder %v834_v5, 0.0  ;;  %v3261_v27 = vld [vmem:[%s5619_s0 + $0x118] sm:$0xff]  ;;  %v4827_v19 = vpack.c.bf16 %v4817_v31, %v4812_v24 }
 0x18c   :  { %v1015_v4 = vpack.c.bf16 %v999_v23, %v997_v22  ;;  %v4829_v21 = vpack.c.bf16 %v3263_v18, %v3261_v27  ;;  %v3735_v27 = vld [vmem:[%s5620_s3 + $0x64] sm:$0xf] }
 0x18d   :  { %v1000_v55 = vsel %vm948_vm14, %v834_v5, %v974_v60  ;;  %v3528_v60 = vld [vmem:[%s5620_s3 + $0xf0] sm:$0xf] }
 0x18e   :  { %v919_v32 = vpop.f32.mrf.mxu3  ;;  %1222 = vmatmul.bf16.gmra.mxu1 %v1015_v4 }
 0x18f   :  { %v878_v38 = vpop.f32.mrf.mxu2  ;;  %v920_v50 = vadd.f32 %v919_v32, %v877_v61 }
 0x190   :  { %v835_v44 = vpop.f32.mrf.mxu1  ;;  %v879_v54 = vadd.f32 %v878_v38, %v4577_v26  ;;  %1737 = vmatmul.bf16.gmra.mxu2 %v4827_v19  ;;  %v3265_v38 = vld [vmem:[%s5619_s0 + $0x138] sm:$0xff] }
 0x191   :  { %v836_v7 = vadd.f32 %v835_v44, %v793_v40  ;;  %v795_v48 = vpop.f32.mrf.mxu0  ;;  %v975_v0 = vmul.f32 0.2, %v920_v50  ;;  %vm949_vm0 = vcmp.gt.f32.partialorder %v920_v50, 0.0  ;;  %1780 = vmatmul.bf16.gmra.mxu3 %v4829_v21  ;;  %v4845_v40 = vpack.c.bf16 %v4841_v37, %v4836_v35  ;;  %v3464_v44 = vld [vmem:[%s5620_s3 + $0x70] sm:$0xf] }
 0x192   :  { %v796_v1 = vadd.f32 %v795_v48, %v4562_v63  ;;  %v4853_v42 = vpack.c.bf16 %v3267_v41, %v3265_v38  ;;  %v3465_v61 = vor.u32 %v3738_v45, %v3464_v44 }
 0x193   :  { %vm950_vm15 = vcmp.gt.f32.partialorder %v836_v7, 0.0  ;;  %v976_v51 = vmul.f32 0.2, %v836_v7  ;;  %v1001_v10 = vsel %vm949_vm0, %v920_v50, %v975_v0  ;;  %v3466_v0 = vld [vmem:[%s5620_s3 + $0x78] sm:$0xf0] }
 0x194   :  { %2201 = vmatpush.bf16.msrb.mxu2 %v3465_v61  ;;  %v3751_v61 = vld [vmem:[%s5620_s3 + $0xe4] sm:$0xf] }
 0x195   :  { %v1002_v56 = vsel %vm950_vm15, %v836_v7, %v976_v51  ;;  %v3754_v7 = vld [vmem:[%s5620_s3 + $0xf4] sm:$0xf0] }
 0x196   :  { %v921_v57 = vpop.f32.mrf.mxu3  ;;  %v1016_v62 = vpack.c.bf16 %v1002_v56, %v1000_v55  ;;  %v3529_v48 = vor.u32 %v3754_v7, %v3528_v60  ;;  %v3269_v51 = vld [vmem:[%s5619_s0 + $0x158] sm:$0xff]  ;;  %v4897_v56 = vld [vmem:[%s5624_s6] ss:$0 sm:$0xff]  ;;  %v3522_v7 = vld [vmem:[%s5620_s3 + $0xe8] sm:$0xf0] }
 0x197   :  { %v922_v29 = vadd.f32 %v921_v57, %v879_v54  ;;  %v881_v30 = vpop.f32.mrf.mxu2  ;;  %v3271_v54 = vld [vmem:[%s5619_s0 + $0x168] sm:$0xff] }
 0x198   :  { %v838_v25 = vpop.f32.mrf.mxu1  ;;  %1184 = vmatmul.bf16.gmra.mxu0 %v1016_v62  ;;  %v882_v16 = vadd.f32 %v881_v30, %v4577_v26  ;;  %2244 = vmatpush.bf16.msrb.mxu3 %v3529_v48  ;;  %v4891_v55 = vpack.c.bf16 %v3271_v54, %v3269_v51  ;;  %v3737_v62 = vld [vmem:[%s5620_s3 + $0x74] sm:$0xf]  ;;  %v3530_v30 = vld [vmem:[%s5620_s3 + $0xf8] sm:$0xf0]  ;;  %v3448_v48 = vld [vmem:[%s5620_s3 + $0x50] sm:$0xf] }
 0x199   :  { %vm951_vm1 = vcmp.gt.f32.partialorder %v922_v29, 0.0  ;;  %v977_v2 = vmul.f32 0.2, %v922_v29  ;;  %v797_v3 = vpop.f32.mrf.mxu0  ;;  %v839_v8 = vadd.f32 %v838_v25, %v796_v1  ;;  %v3753_v1 = vld [vmem:[%s5620_s3 + $0xf4] sm:$0xf] }
 0x19a   :  { %v3533_v25 = vor.u32 %v3753_v1, %v3530_v30  ;;  %v3736_v3 = vld [vmem:[%s5620_s3 + $0x64] sm:$0xf0]  ;;  %v3734_v51 = vld [vmem:[%s5620_s3 + $0x54] sm:$0xf0] }
 0x19b   :  { %v1003_v11 = vsel %vm951_vm1, %v922_v29, %v977_v2  ;;  %v978_v33 = vmul.f32 0.2, %v839_v8  ;;  %vm952_vm2 = vcmp.gt.f32.partialorder %v839_v8, 0.0  ;;  %v3469_v29 = vor.u32 %v3737_v62, %v3466_v0  ;;  %v3456_v2 = vld [vmem:[%s5620_s3 + $0x60] sm:$0xf] }
 0x19c   :  { %v1017_v14 = vpack.c.bf16 %v1003_v11, %v1001_v10  ;;  %2330 = vmatpush.bf16.msra.mxu1 %v3533_v25  ;;  %v3449_v62 = vor.u32 %v3734_v51, %v3448_v48  ;;  %v3512_v0 = vld [vmem:[%s5620_s3 + $0xd0] sm:$0xf]  ;;  %v3750_v1 = vld [vmem:[%s5620_s3 + $0xd4] sm:$0xf0] }
 0x19d   :  { %v1004_v22 = vsel %vm952_vm2, %v839_v8, %v978_v33  ;;  %2287 = vmatpush.bf16.msra.mxu0 %v3469_v29  ;;  %v3457_v8 = vor.u32 %v3736_v3, %v3456_v2  ;;  %v4927_v33 = vld [vmem:[%s5619_s0 + $0x170] sm:$0xff]  ;;  %v3513_v30 = vor.u32 %v3750_v1, %v3512_v0  ;;  %v3442_v0 = vld [vmem:[%s5620_s3 + $0x48] sm:$0xf0]  ;;  %v3747_v1 = vld [vmem:[%s5620_s3 + $0xc4] sm:$0xf] }
 0x19e   :  { %v924_v17 = vpop.f32.mrf.mxu3  ;;  %1227 = vmatmul.bf16.gmra.mxu1 %v1017_v14  ;;  %v1018_v5 = vpack.c.bf16 %v1004_v22, %v1004_v22  ;;  %v4943_v22 = vld [vmem:[%s5619_s0 + $0x180] sm:$0xff] }
 0x19f   :  { %v883_v34 = vpop.f32.mrf.mxu2  ;;  %v925_v20 = vadd.f32 %v924_v17, %v882_v16  ;;  %2202 = vmatpush.bf16.msrb.mxu2 %v3457_v8 }
 0x1a0   :  { %v840_v28 = vpop.f32.mrf.mxu1  ;;  %1742 = vmatmul.bf16.gmra.mxu2 %v4845_v40  ;;  %v3752_v34 = vld [vmem:[%s5620_s3 + $0xe4] sm:$0xf0] }
 0x1a1   :  { %v979_v23 = vmul.f32 0.2, %v925_v20  ;;  %vm953_vm3 = vcmp.gt.f32.partialorder %v925_v20, 0.0  ;;  %1785 = vmatmul.bf16.gmra.mxu3 %v4853_v42 }
 0x1a3   :  { %v1005_v32 = vsel %vm953_vm3, %v925_v20, %v979_v23  ;;  %2203 = vmatpush.bf16.msrb.mxu2 %v3449_v62 }
 0x1a4   :  { %v1019_v36 = vpack.c.bf16 %v1005_v32, %v1005_v32  ;;  %v3273_v32 = vld [vmem:[%s5619_s0 + $0x178] sm:$0xff] }
 0x1a6   :  { %v926_v4 = vpop.f32.mrf.mxu3 }
 0x1a7   :  { %v4949_v4 = vpack.c.bf16 %v4943_v22, %v4927_v33 }
 0x1a8   :  { %1189 = vmatmul.bf16.gmra.mxu0 %v1018_v5 }
 0x1ae   :  { %1232 = vmatmul.bf16.gmra.mxu1 %v1019_v36  ;;  %v3275_v36 = vld [vmem:[%s5619_s0 + $0x188] sm:$0xff] }
 0x1af   :  { %v4958_v41 = vpack.c.bf16 %v3275_v36, %v3273_v32  ;;  %v3732_v32 = vld [vmem:[%s5620_s3 + $0x44] sm:$0xf0]  ;;  %v3504_v36 = vld [vmem:[%s5620_s3 + $0xc0] sm:$0xf] }
 0x1b1   :  { %1790 = vmatmul.bf16.gmra.mxu3 %v4891_v55 }
 0x1b8   :  { %1813 = vmatmul.bf16.vlgmr.msrb.gmra.mxu0 %v4732_v52  ;;  %v4874_v52 = vld [vmem:[%s5619_s0 + $0x150] sm:$0xff] }
 0x1be   :  { %1856 = vmatmul.bf16.vlgmr.msrb.gmra.mxu1 %v4756_v15  ;;  %v4879_v15 = vld [vmem:[%s5619_s0 + $0x160] sm:$0xff] }
 0x1bf   :  { %v4883_v50 = vpack.c.bf16 %v4879_v15, %v4874_v52 }
 0x1c1   :  { %1747 = vmatmul.bf16.gmra.mxu2 %v4883_v50  ;;  %1795 = vmatmul.bf16.gmra.mxu3 %v4958_v41 }
 0x1c5   :  { %v1160_v57 = vpop.f32.mrf.mxu0 }
 0x1c6   :  { %v1161_v10 = vadd.f32 %v4897_v56, %v1160_v57  ;;  %v3525_v57 = vor.u32 %v3751_v61, %v3522_v7 }
 0x1c8   :  { %1818 = vmatmul.bf16.gmra.mxu0 %v4787_v46  ;;  %v3520_v46 = vld [vmem:[%s5620_s3 + $0xe0] sm:$0xf]  ;;  %2331 = vmatpush.bf16.msra.mxu1 %v3525_v57 }
 0x1c9   :  { %v3521_v28 = vor.u32 %v3752_v34, %v3520_v46 }
 0x1cb   :  { %v1203_v11 = vpop.f32.mrf.mxu1  ;;  %2245 = vmatpush.bf16.msrb.mxu3 %v3521_v28 }
 0x1cc   :  { %v1204_v14 = vadd.f32 %v1203_v11, %v1161_v10  ;;  %v3733_v10 = vld [vmem:[%s5620_s3 + $0x54] sm:$0xf]  ;;  %v3450_v11 = vld [vmem:[%s5620_s3 + $0x58] sm:$0xf0] }
 0x1cd   :  { %v1162_v16 = vpop.f32.mrf.mxu0 }
 0x1ce   :  { %v1250_v17 = vmul.f32 0.2, %v1204_v14  ;;  %1861 = vmatmul.bf16.gmra.mxu1 %v4802_v49  ;;  %vm1237_vm4 = vcmp.gt.f32.partialorder %v1204_v14, 0.0  ;;  %v3458_v49 = vld [vmem:[%s5620_s3 + $0x68] sm:$0xf0]  ;;  %v1163_v5 = vadd.f32 %v4897_v56, %v1162_v16 }
 0x1cf   :  { %v3461_v20 = vor.u32 %v3735_v27, %v3458_v49  ;;  %2246 = vmatpush.bf16.msrb.mxu3 %v3513_v30  ;;  %v3514_v16 = vld [vmem:[%s5620_s3 + $0xd8] sm:$0xf0] }
 0x1d0   :  { %v4938_v18 = vsel %vm1237_vm4, %v1204_v14, %v1250_v17  ;;  %v3749_v14 = vld [vmem:[%s5620_s3 + $0xd4] sm:$0xf] }
 0x1d1   :  { %v1276_v23 = vmul.f32 %v4938_v18, %v4938_v18  ;;  %2288 = vmatpush.bf16.msra.mxu0 %v3461_v20  ;;  %1752 = vmatmul.bf16.gmra.mxu2 %v4949_v4  ;;  %v3517_v46 = vor.u32 %v3749_v14, %v3514_v16  ;;  %v3432_v14 = vld [vmem:[%s5620_s3 + $0x30] sm:$0xf] }
 0x1d2   :  { %v5046_v16 = vld [vmem:[%s5619_s0 + $0x190] sm:$0xff] }
 0x1d3   :  { %v1205_v38 = vpop.f32.mrf.mxu1  ;;  %1289 = vadd.xlane.f32.xlu0 %v1276_v23  ;;  %2332 = vmatpush.bf16.msra.mxu1 %v3517_v46  ;;  %v3496_v46 = vld [vmem:[%s5620_s3 + $0xb0] sm:$0xf] }
 0x1d4   :  { %v1206_v44 = vadd.f32 %v1205_v38, %v1163_v5  ;;  %v3440_v5 = vld [vmem:[%s5620_s3 + $0x40] sm:$0xf]  ;;  %v3748_v38 = vld [vmem:[%s5620_s3 + $0xc4] sm:$0xf0] }
 0x1d5   :  { %v1165_v45 = vpop.f32.mrf.mxu0 }
 0x1d6   :  { %v1251_v60 = vmul.f32 0.2, %v1206_v44  ;;  %vm1238_vm5 = vcmp.gt.f32.partialorder %v1206_v44, 0.0  ;;  %v1166_v25 = vadd.f32 %v4897_v56, %v1165_v45  ;;  %v3441_v45 = vor.u32 %v3732_v32, %v3440_v5  ;;  %v3277_v32 = vld [vmem:[%s5619_s0 + $0x198] sm:$0xff] }
 0x1d8   :  { %1823 = vmatmul.bf16.gmra.mxu0 %v4827_v19  ;;  %v4975_v54 = vsel %vm1238_vm5, %v1206_v44, %v1251_v60  ;;  %v3505_v60 = vor.u32 %v3748_v38, %v3504_v36  ;;  %2204 = vmatpush.bf16.msrb.mxu2 %v3441_v45 }
 0x1d9   :  { %v1277_v29 = vmul.f32 %v4975_v54, %v4975_v54 }
 0x1da   :  { %2247 = vmatpush.bf16.msrb.mxu3 %v3505_v60 }
 0x1db   :  { %v1208_v19 = vpop.f32.mrf.mxu1  ;;  %1291 = vadd.xlane.f32.xlu0 %v1277_v29  ;;  %v3506_v29 = vld [vmem:[%s5620_s3 + $0xc8] sm:$0xf0] }
 0x1dc   :  { %v1209_v2 = vadd.f32 %v1208_v19, %v1166_v25  ;;  %v3509_v25 = vor.u32 %v3747_v1, %v3506_v29 }
 0x1dd   :  { %v1167_v3 = vpop.f32.mrf.mxu0 }
 0x1de   :  { %v1252_v8 = vmul.f32 0.2, %v1209_v2  ;;  %1866 = vmatmul.bf16.gmra.mxu1 %v4829_v21  ;;  %vm1239_vm6 = vcmp.gt.f32.partialorder %v1209_v2, 0.0  ;;  %v3453_v21 = vor.u32 %v3733_v10, %v3450_v11  ;;  %v1168_v27 = vadd.f32 %v4897_v56, %v1167_v3 }
 0x1df   :  { %2333 = vmatpush.bf16.msra.mxu1 %v3509_v25 }
 0x1e0   :  { %v4999_v17 = vsel %vm1239_vm6, %v1209_v2, %v1252_v8  ;;  %2289 = vmatpush.bf16.msra.mxu0 %v3453_v21  ;;  %v3730_v21 = vld [vmem:[%s5620_s3 + $0x34] sm:$0xf0] }
 0x1e1   :  { %v1278_v34 = vmul.f32 %v4999_v17, %v4999_v17 }
 0x1e3   :  { %v1210_v49 = vpop.f32.mrf.mxu1  ;;  %1293 = vadd.xlane.f32.xlu1 %v1278_v34  ;;  %v3746_v34 = vld [vmem:[%s5620_s3 + $0xb4] sm:$0xf0] }
 0x1e4   :  { %v1211_v28 = vadd.f32 %v1210_v49, %v1168_v27  ;;  %v5059_v27 = vpack.c.bf16 %v5046_v16, %v5046_v16 }
 0x1e5   :  { %v1170_v20 = vpop.f32.mrf.mxu0 }
 0x1e6   :  { %v1253_v23 = vmul.f32 0.2, %v1211_v28  ;;  %vm1240_vm7 = vcmp.gt.f32.partialorder %v1211_v28, 0.0  ;;  %v1171_v7 = vadd.f32 %v4897_v56, %v1170_v20  ;;  %v3497_v20 = vor.u32 %v3746_v34, %v3496_v46  ;;  %1757 = vmatmul.bf16.gmra.mxu2 %v5059_v27 }
 0x1e8   :  { %1828 = vmatmul.bf16.gmra.mxu0 %v4845_v40  ;;  %v5017_v44 = vsel %vm1240_vm7, %v1211_v28, %v1253_v23  ;;  %v3731_v40 = vld [vmem:[%s5620_s3 + $0x44] sm:$0xf]  ;;  %v3433_v28 = vor.u32 %v3730_v21, %v3432_v14  ;;  %2248 = vmatpush.bf16.msrb.mxu3 %v3497_v20  ;;  %v3426_v21 = vld [vmem:[%s5620_s3 + $0x28] sm:$0xf0] }
 0x1e9   :  { %v1279_v61 = vmul.f32 %v5017_v44, %v5017_v44  ;;  %v3727_v14 = vld [vmem:[%s5620_s3 + $0x24] sm:$0xf] }
 0x1ea   :  { %2205 = vmatpush.bf16.msrb.mxu2 %v3433_v28  ;;  %v3429_v20 = vor.u32 %v3727_v14, %v3426_v21 }
 0x1eb   :  { %v1213_v48 = vpop.f32.mrf.mxu1  ;;  %1295 = vadd.xlane.f32.xlu1 %v1279_v61  ;;  %v3729_v61 = vld [vmem:[%s5620_s3 + $0x34] sm:$0xf] }
 0x1ec   :  { %v1214_v51 = vadd.f32 %v1213_v48, %v1171_v7  ;;  %v3434_v7 = vld [vmem:[%s5620_s3 + $0x38] sm:$0xf0]  ;;  %v3745_v48 = vld [vmem:[%s5620_s3 + $0xb4] sm:$0xf] }
 0x1ed   :  { %v1172_v57 = vpop.f32.mrf.mxu0 }
 0x1ee   :  { %v1254_v62 = vmul.f32 0.2, %v1214_v51  ;;  %1871 = vmatmul.bf16.gmra.mxu1 %v4853_v42  ;;  %vm1241_vm8 = vcmp.gt.f32.partialorder %v1214_v51, 0.0  ;;  %v3445_v42 = vor.u32 %v3731_v40, %v3442_v0  ;;  %v1173_v2 = vadd.f32 %v4897_v56, %v1172_v57  ;;  %v3424_v40 = vld [vmem:[%s5620_s3 + $0x20] sm:$0xf] }
 0x1ef   :  { %v3728_v0 = vld [vmem:[%s5620_s3 + $0x24] sm:$0xf0] }
 0x1f0   :  { %v5035_v30 = vsel %vm1241_vm8, %v1214_v51, %v1254_v62  ;;  %2290 = vmatpush.bf16.msra.mxu0 %v3445_v42  ;;  %v3498_v51 = vld [vmem:[%s5620_s3 + $0xb8] sm:$0xf0]  ;;  %v3425_v29 = vor.u32 %v3728_v0, %v3424_v40 }
 0x1f1   :  { %v1280_v19 = vmul.f32 %v5035_v30, %v5035_v30  ;;  %v3501_v62 = vor.u32 %v3745_v48, %v3498_v51  ;;  %v3490_v48 = vld [vmem:[%s5620_s3 + $0xa8] sm:$0xf0] }
 0x1f2   :  { %2206 = vmatpush.bf16.msrb.mxu2 %v3425_v29  ;;  %v3480_v29 = vld [vmem:[%s5620_s3 + $0x90] sm:$0xf] }
 0x1f3   :  { %v1215_v3 = vpop.f32.mrf.mxu1  ;;  %1297 = vadd.xlane.f32.xlu2 %v1280_v19  ;;  %2334 = vmatpush.bf16.msra.mxu1 %v3501_v62  ;;  %v3726_v62 = vld [vmem:[%s5620_s3 + $0x14] sm:$0xf0] }
 0x1f4   :  { %v1216_v8 = vadd.f32 %v1215_v3, %v1173_v2 }
 0x1f5   :  { %v1175_v10 = vpop.f32.mrf.mxu0 }
 0x1f6   :  { %v1255_v11 = vmul.f32 0.2, %v1216_v8  ;;  %vm1242_vm9 = vcmp.gt.f32.partialorder %v1216_v8, 0.0  ;;  %v1176_v5 = vadd.f32 %v4897_v56, %v1175_v10  ;;  %v3744_v10 = vld [vmem:[%s5620_s3 + $0xa4] sm:$0xf0] }
 0x1f8   :  { %1833 = vmatmul.bf16.gmra.mxu0 %v4883_v50  ;;  %v5062_v49 = vsel %vm1242_vm9, %v1216_v8, %v1255_v11  ;;  %v5071_v50 = vpack.c.bf16 %v3277_v32, %v3277_v32  ;;  %v3488_v8 = vld [vmem:[%s5620_s3 + $0xa0] sm:$0xf]  ;;  %v1728_v11 = vpop.f32.mrf.mxu2 }
 0x1f9   :  { %v1281_v23 = vmul.f32 %v5062_v49, %v5062_v49  ;;  %v3489_v34 = vor.u32 %v3744_v10, %v3488_v8  ;;  %v1729_v28 = vadd.f32 %v1728_v11, %v4419_v9  ;;  %v3418_v10 = vld [vmem:[%s5620_s3 + $0x18] sm:$0xf0] }
 0x1fa   :  { %1800 = vmatmul.bf16.gmra.mxu3 %v5071_v50 }
 0x1fb   :  { %v1218_v36 = vpop.f32.mrf.mxu1  ;;  %1299 = vadd.xlane.f32.xlu2 %v1281_v23  ;;  %2249 = vmatpush.bf16.msrb.mxu3 %v3489_v34 }
 0x1fc   :  { %v1219_v38 = vadd.f32 %v1218_v36, %v1176_v5  ;;  %v1771_v5 = vpop.f32.mrf.mxu3 }
 0x1fd   :  { %v1177_v45 = vpop.f32.mrf.mxu0  ;;  %v1772_v36 = vadd.f32 %v1771_v5, %v1729_v28 }
 0x1fe   :  { %v1256_v60 = vmul.f32 0.2, %v1219_v38  ;;  %1876 = vmatmul.bf16.gmra.mxu1 %v4891_v55  ;;  %vm1243_vm10 = vcmp.gt.f32.partialorder %v1219_v38, 0.0  ;;  %v3437_v55 = vor.u32 %v3729_v61, %v3434_v7  ;;  %v1178_v42 = vadd.f32 %v4897_v56, %v1177_v45  ;;  %v3743_v7 = vld [vmem:[%s5620_s3 + $0xa4] sm:$0xf] }
 0x1ff   :  { %vm1891_vm13 = vcmp.gt.f32.partialorder %v1772_v36, 0.0  ;;  %v3493_v40 = vor.u32 %v3743_v7, %v3490_v48 }
 0x200   :  { %v5087_v57 = vsel %vm1243_vm10, %v1219_v38, %v1256_v60  ;;  %2291 = vmatpush.bf16.msra.mxu0 %v3437_v55  ;;  %v1730_v51 = vpop.f32.mrf.mxu2  ;;  %v3416_v55 = vld [vmem:[%s5620_s3 + $0x10] sm:$0xf] }
 0x201   :  { %v1282_v1 = vmul.f32 %v5087_v57, %v5087_v57  ;;  %v1731_v0 = vadd.f32 %v1730_v51, %v4419_v9  ;;  %2335 = vmatpush.bf16.msra.mxu1 %v3493_v40 }
 0x203   :  { %v1220_v25 = vpop.f32.mrf.mxu1  ;;  %1301 = vadd.xlane.f32.xlu0 %v1282_v1  ;;  %v3417_v1 = vor.u32 %v3726_v62, %v3416_v55  ;;  %v3482_v55 = vld [vmem:[%s5620_s3 + $0x98] sm:$0xf0] }
 0x204   :  { %v1221_v19 = vadd.f32 %v1220_v25, %v1178_v42  ;;  %2292 = vmatpush.bf16.msra.mxu0 %v3429_v20  ;;  %v3742_v42 = vld [vmem:[%s5620_s3 + $0x94] sm:$0xf0]  ;;  %v3725_v25 = vld [vmem:[%s5620_s3 + $0x14] sm:$0xf] }
 0x205   :  { %v1180_v2 = vpop.f32.mrf.mxu0  ;;  %v3481_v8 = vor.u32 %v3742_v42, %v3480_v29  ;;  %2207 = vmatpush.bf16.msrb.mxu2 %v3417_v1  ;;  %v3421_v21 = vor.u32 %v3725_v25, %v3418_v10 }
 0x206   :  { %v1257_v3 = vmul.f32 0.2, %v1221_v19  ;;  %vm1244_vm11 = vcmp.gt.f32.partialorder %v1221_v19, 0.0  ;;  %v1181_v32 = vadd.f32 %v4897_v56, %v1180_v2 }
 0x207   :  { %2250 = vmatpush.bf16.msrb.mxu3 %v3481_v8 }
 0x208   :  { %1838 = vmatmul.bf16.gmra.mxu0 %v4949_v4  ;;  %v5111_v46 = vsel %vm1244_vm11, %v1221_v19, %v1257_v3  ;;  %v1917_v4 = vmul.f32 0.2, %v1772_v36  ;;  %v1773_v3 = vpop.f32.mrf.mxu3  ;;  %v1733_v7 = vpop.f32.mrf.mxu2 }
 0x209   :  { %v1283_v23 = vmul.f32 %v5111_v46, %v5111_v46  ;;  %v1774_v14 = vadd.f32 %v1773_v3, %v1731_v0  ;;  %2293 = vmatpush.bf16.msra.mxu0 %v3421_v21  ;;  %v1734_v40 = vadd.f32 %v1733_v7, %v4419_v9 }
 0x20a   :  { %v1943_v11 = vsel %vm1891_vm13, %v1772_v36, %v1917_v4  ;;  %v3724_v36 = vld [vmem:[%s5620_s3 + $0x4] sm:$0xf0] }
 0x20b   :  { %v1223_v38 = vpop.f32.mrf.mxu1  ;;  %1303 = vadd.xlane.f32.xlu1 %v1283_v23  ;;  %vm1893_vm14 = vcmp.gt.f32.partialorder %v1774_v14, 0.0  ;;  %v1919_v20 = vmul.f32 0.2, %v1774_v14  ;;  %v3408_v23 = vld [vmem:[%s5620_s3] sm:$0xf] }
 0x20c   :  { %v1224_v45 = vadd.f32 %v1223_v38, %v1181_v32  ;;  %v1969_v32 = vadd.f32 %v4720_v58, %v1943_v11  ;;  %v3723_v38 = vld [vmem:[%s5620_s3 + $0x4] sm:$0xf]  ;;  %v3409_v48 = vor.u32 %v3724_v36, %v3408_v23 }
 0x20d   :  { %v1182_v60 = vpop.f32.mrf.mxu0  ;;  %v1945_v4 = vsel %vm1893_vm14, %v1774_v14, %v1919_v20  ;;  %v3740_v20 = vld [vmem:[%s5620_s3 + $0x84] sm:$0xf0] }
 0x20e   :  { %v1258_v61 = vmul.f32 0.2, %v1224_v45  ;;  %1881 = vmatmul.bf16.gmra.mxu1 %v4958_v41  ;;  %vm1245_vm12 = vcmp.gt.f32.partialorder %v1224_v45, 0.0  ;;  %v1183_v19 = vadd.f32 %v4897_v56, %v1182_v60  ;;  %v1971_v58 = vadd.f32 %v4725_v59, %v1945_v4  ;;  %2208 = vmatpush.bf16.msrb.mxu2 %v3409_v48 }
 0x210   :  { %v5130_v41 = vsel %vm1245_vm12, %v1224_v45, %v1258_v61  ;;  %v3410_v45 = vld [vmem:[%s5620_s3 + $0x8] sm:$0xf0]  ;;  %v3741_v61 = vld [vmem:[%s5620_s3 + $0x94] sm:$0xf]  ;;  %v1995_v29 = vpack.c.bf16 %v1971_v58, %v1969_v32  ;;  %v1776_v59 = vpop.f32.mrf.mxu3  ;;  %v1735_v8 = vpop.f32.mrf.mxu2 }
 0x211   :  { %v1284_v2 = vmul.f32 %v5130_v41, %v5130_v41  ;;  %v3413_v51 = vor.u32 %v3723_v38, %v3410_v45  ;;  %v3485_v0 = vor.u32 %v3741_v61, %v3482_v55  ;;  %v1736_v14 = vadd.f32 %v1735_v8, %v4419_v9  ;;  %v3739_v55 = vld [vmem:[%s5620_s3 + $0x84] sm:$0xf] }
 0x212   :  { %2209 = vmatmul.bf16.vlgmr.msrb.gmra.mxu2 %v1995_v29 }
 0x213   :  { %v1225_v34 = vpop.f32.mrf.mxu1  ;;  %1305 = vadd.xlane.f32.xlu2 %v1284_v2  ;;  %2294 = vmatpush.bf16.msra.mxu0 %v3413_v51  ;;  %v1777_v2 = vadd.f32 %v1776_v59, %v1734_v40  ;;  %v3474_v40 = vld [vmem:[%s5620_s3 + $0x88] sm:$0xf0] }
 0x214   :  { %v1226_v28 = vadd.f32 %v1225_v34, %v1183_v19  ;;  %2336 = vmatpush.bf16.msra.mxu1 %v3485_v0  ;;  %v3477_v59 = vor.u32 %v3739_v55, %v3474_v40 }
 0x215   :  { %v1185_v5 = vpop.f32.mrf.mxu0  ;;  %v1921_v11 = vmul.f32 0.2, %v1777_v2  ;;  %vm1895_vm1 = vcmp.gt.f32.partialorder %v1777_v2, 0.0 }
 0x216   :  { %v1259_v60 = vmul.f32 0.2, %v1226_v28  ;;  %vm1246_vm15 = vcmp.gt.f32.partialorder %v1226_v28, 0.0  ;;  %v1186_v42 = vadd.f32 %v4897_v56, %v1185_v5 }
 0x217   :  { %v1947_v38 = vsel %vm1895_vm1, %v1777_v2, %v1921_v11 }
 0x218   :  { %v5169_v62 = vsel %vm1246_vm15, %v1226_v28, %v1259_v60  ;;  %1843 = vmatmul.bf16.gmra.mxu0 %v5059_v27  ;;  %v1778_v34 = vpop.f32.mrf.mxu3  ;;  %v3472_v28 = vld [vmem:[%s5620_s3 + $0x80] sm:$0xf]  ;;  %v1738_v58 = vpop.f32.mrf.mxu2  ;;  %v1973_v7 = vadd.f32 %v4778_v39, %v1947_v38  ;;  %2337 = vmatpush.bf16.msra.mxu1 %v3477_v59 }
 0x219   :  { %v1285_v1 = vmul.f32 %v5169_v62, %v5169_v62  ;;  %v1779_v23 = vadd.f32 %v1778_v34, %v1736_v14  ;;  %v3473_v5 = vor.u32 %v3740_v20, %v3472_v28 }
 0x21b   :  { %v1228_v25 = vpop.f32.mrf.mxu1  ;;  %1307 = vadd.xlane.f32.xlu0 %v1285_v1  ;;  %vm1897_vm2 = vcmp.gt.f32.partialorder %v1779_v23, 0.0  ;;  %v1923_v45 = vmul.f32 0.2, %v1779_v23  ;;  %2251 = vmatpush.bf16.msrb.mxu3 %v3473_v5 }
 0x21c   :  { %v1229_v19 = vadd.f32 %v1228_v25, %v1186_v42 }
 0x21d   :  { %v1187_v3 = vpop.f32.mrf.mxu0  ;;  %v1949_v61 = vsel %vm1897_vm2, %v1779_v23, %v1923_v45 }
 0x21e   :  { %v1260_v27 = vmul.f32 0.2, %v1229_v19  ;;  %vm1247_vm0 = vcmp.gt.f32.partialorder %v1229_v19, 0.0  ;;  %1886 = vmatmul.bf16.gmra.mxu1 %v5071_v50  ;;  %v1188_v50 = vadd.f32 %v4897_v56, %v1187_v3  ;;  %v1975_v48 = vadd.f32 %v4783_v43, %v1949_v61 }
 0x220   :  { %v5177_v10 = vsel %vm1247_vm0, %v1229_v19, %v1260_v27  ;;  %v1781_v1 = vpop.f32.mrf.mxu3  ;;  %v1997_v42 = vpack.c.bf16 %v1975_v48, %v1973_v7  ;;  %v1739_v19 = vadd.f32 %v1738_v58, %v4419_v9  ;;  %v1740_v3 = vpop.f32.mrf.mxu2 }
 0x221   :  { %v1286_v21 = vmul.f32 %v5177_v10, %v5177_v10  ;;  %v1741_v8 = vadd.f32 %v1740_v3, %v4419_v9 }
 0x222   :  { %2214 = vmatmul.bf16.gmra.mxu2 %v1997_v42  ;;  %v1782_v14 = vadd.f32 %v1781_v1, %v1739_v19 }
 0x223   :  { %v1230_v32 = vpop.f32.mrf.mxu1  ;;  %1309 = vadd.xlane.f32.xlu1 %v1286_v21 }
 0x224   :  { %v1231_v36 = vadd.f32 %v1230_v32, %v1188_v50  ;;  %v1925_v28 = vmul.f32 0.2, %v1782_v14  ;;  %vm1899_vm5 = vcmp.gt.f32.partialorder %v1782_v14, 0.0 }
 0x225   :  { %v1190_v60 = vpop.f32.mrf.mxu0 }
 0x226   :  { %v1261_v4 = vmul.f32 0.2, %v1231_v36  ;;  %vm1248_vm3 = vcmp.gt.f32.partialorder %v1231_v36, 0.0  ;;  %v1191_v39 = vadd.f32 %v4897_v56, %v1190_v60  ;;  %v1951_v23 = vsel %vm1899_vm5, %v1782_v14, %v1925_v28 }
 0x227   :  { %v1977_v32 = vadd.f32 %v4812_v24, %v1951_v23 }
 0x228   :  { %v5191_v51 = vsel %vm1248_vm3, %v1231_v36, %v1261_v4  ;;  %2295 = vmatmul.bf16.vlgmr.msra.gmra.mxu0 %v1995_v29  ;;  %v1783_v56 = vpop.f32.mrf.mxu3  ;;  %v1743_v36 = vpop.f32.mrf.mxu2 }
 0x229   :  { %v1287_v0 = vmul.f32 %v5191_v51, %v5191_v51  ;;  %v1784_v21 = vadd.f32 %v1783_v56, %v1741_v8  ;;  %v1744_v48 = vadd.f32 %v1743_v36, %v4419_v9 }
 0x22b   :  { %v1233_v43 = vpop.f32.mrf.mxu1  ;;  %1311 = vadd.xlane.f32.xlu2 %v1287_v0  ;;  %vm1901_vm6 = vcmp.gt.f32.partialorder %v1784_v21, 0.0  ;;  %v1927_v20 = vmul.f32 0.2, %v1784_v21 }
 0x22c   :  { %v1234_v29 = vadd.f32 %v1233_v43, %v1191_v39 }
 0x22d   :  { %v1192_v25 = vpop.f32.mrf.mxu0  ;;  %v1953_v5 = vsel %vm1901_vm6, %v1784_v21, %v1927_v20 }
 0x22e   :  { %v1262_v2 = vmul.f32 0.2, %v1234_v29  ;;  %vm1249_vm4 = vcmp.gt.f32.partialorder %v1234_v29, 0.0  ;;  %v1979_v38 = vadd.f32 %v4817_v31, %v1953_v5 }
 0x230   :  { %v5203_v27 = vsel %vm1249_vm4, %v1234_v29, %v1262_v2  ;;  %v1786_v60 = vpop.f32.mrf.mxu3  ;;  %v1999_v4 = vpack.c.bf16 %v1979_v38, %v1977_v32  ;;  %v1745_v55 = vpop.f32.mrf.mxu2 }
 0x231   :  { %v1288_v11 = vmul.f32 %v5203_v27, %v5203_v27  ;;  %v1746_v40 = vadd.f32 %v1745_v55, %v4419_v9  ;;  %v1787_v1 = vadd.f32 %v1786_v60, %v1744_v48 }
 0x232   :  { %2219 = vmatmul.bf16.gmra.mxu2 %v1999_v4 }
 0x233   :  { %v1235_v34 = vpop.f32.mrf.mxu1  ;;  %1313 = vadd.xlane.f32.xlu0 %v1288_v11  ;;  %v1929_v39 = vmul.f32 0.2, %v1787_v1  ;;  %vm1903_vm8 = vcmp.gt.f32.partialorder %v1787_v1, 0.0 }
 0x235   :  { %v1814_v50 = vpop.f32.mrf.mxu0  ;;  %v1955_v2 = vsel %vm1903_vm8, %v1787_v1, %v1929_v39 }
 0x236   :  { %v1815_v45 = vadd.f32 %v1814_v50, %v4422_v13  ;;  %v1981_v21 = vadd.f32 %v4836_v35, %v1955_v2 }
 0x238   :  { %2300 = vmatmul.bf16.gmra.mxu0 %v1997_v42  ;;  %v1788_v24 = vpop.f32.mrf.mxu3 }
 0x239   :  { %v1789_v59 = vadd.f32 %v1788_v24, %v1746_v40 }
 0x23b   :  { %v1857_v61 = vpop.f32.mrf.mxu1  ;;  %vm1905_vm9 = vcmp.gt.f32.partialorder %v1789_v59, 0.0  ;;  %v1931_v29 = vmul.f32 0.2, %v1789_v59 }
 0x23c   :  { %v1858_v58 = vadd.f32 %v1857_v61, %v1815_v45 }
 0x23d   :  { %v1816_v7 = vpop.f32.mrf.mxu0  ;;  %v1957_v11 = vsel %vm1905_vm9, %v1789_v59, %v1931_v29 }
 0x23e   :  { %v1918_v0 = vmul.f32 0.2, %v1858_v58  ;;  %vm1892_vm7 = vcmp.gt.f32.partialorder %v1858_v58, 0.0  ;;  %v1817_v31 = vadd.f32 %v1816_v7, %v4422_v13  ;;  %v1983_v34 = vadd.f32 %v4841_v37, %v1957_v11 }
 0x240   :  { %v1944_v25 = vsel %vm1892_vm7, %v1858_v58, %v1918_v0  ;;  %v1791_v5 = vpop.f32.mrf.mxu3  ;;  %v2001_v32 = vpack.c.bf16 %v1983_v34, %v1981_v21 }
 0x241   :  { %v1970_v28 = vadd.f32 %v4737_v53, %v1944_v25 }
 0x242   :  { %2224 = vmatmul.bf16.gmra.mxu2 %v2001_v32 }
 0x243   :  { %v1859_v42 = vpop.f32.mrf.mxu1 }
 0x244   :  { %v1860_v43 = vadd.f32 %v1859_v42, %v1817_v31  ;;  %v1748_v56 = vpop.f32.mrf.mxu2 }
 0x245   :  { %v1819_v19 = vpop.f32.mrf.mxu0  ;;  %v1749_v53 = vadd.f32 %v1748_v56, %v4419_v9 }
 0x246   :  { %vm1894_vm10 = vcmp.gt.f32.partialorder %v1860_v43, 0.0  ;;  %v1920_v3 = vmul.f32 0.2, %v1860_v43  ;;  %v1290_v8 = vpop.xlane.xlu0 %1289  ;;  %v1820_v23 = vadd.f32 %v1819_v19, %v4422_v13 }
 0x247   :  { %v1315_v14 = vmax.f32 %v1290_v8, 1e-24  ;;  %v1792_v48 = vadd.f32 %v1791_v5, %v1749_v53 }
 0x248   :  { %v1946_v20 = vsel %vm1894_vm10, %v1860_v43, %v1920_v3  ;;  %2305 = vmatmul.bf16.gmra.mxu0 %v1999_v4  ;;  %v1793_v55 = vpop.f32.mrf.mxu3 }
 0x249   :  { %v1972_v50 = vadd.f32 %v4751_v12, %v1946_v20  ;;  %3772 = vrsqrt.f32 %v1315_v14  ;;  %v1933_v31 = vmul.f32 0.2, %v1792_v48  ;;  %vm1907_vm12 = vcmp.gt.f32.partialorder %v1792_v48, 0.0 }
 0x24a   :  { %vm1334_vm0 = vweird.f32 %v1315_v14 }
 0x24b   :  { %v1996_v36 = vpack.c.bf16 %v1972_v50, %v1970_v28  ;;  %v1862_v38 = vpop.f32.mrf.mxu1  ;;  %v1959_v29 = vsel %vm1907_vm12, %v1792_v48, %v1933_v31 }
 0x24c   :  { %v1863_v45 = vadd.f32 %v1862_v38, %v1820_v23  ;;  %v1750_v4 = vpop.f32.mrf.mxu2  ;;  %v1985_v34 = vadd.f32 %v4874_v52, %v1959_v29 }
 0x24d   :  { %v1821_v60 = vpop.f32.mrf.mxu0  ;;  %2252 = vmatmul.bf16.vlgmr.msrb.gmra.mxu3 %v1996_v36  ;;  %2338 = vmatmul.bf16.vlgmr.msra.gmra.mxu1 %v1996_v36  ;;  %v1751_v58 = vadd.f32 %v1750_v4, %v4419_v9 }
 0x24e   :  { %v1292_v35 = vpop.xlane.xlu0 %1291  ;;  %v1922_v7 = vmul.f32 0.2, %v1863_v45  ;;  %vm1896_vm11 = vcmp.gt.f32.partialorder %v1863_v45, 0.0  ;;  %v1822_v0 = vadd.f32 %v1821_v60, %v4422_v13 }
 0x24f   :  { %v3773_v37 = vpop.eup %3772  ;;  %v5219_v61 = vmax.f32 %v1292_v35, 1e-24  ;;  %v1794_v1 = vadd.f32 %v1793_v55, %v1751_v58 }
 0x250   :  { %v1329_v12 = vmul.f32 %v3773_v37, %v1315_v14  ;;  %v1948_v39 = vsel %vm1896_vm11, %v1863_v45, %v1922_v7  ;;  %vm1335_vm14 = vweird.f32 %v3773_v37  ;;  %v1796_v36 = vpop.f32.mrf.mxu3 }
 0x251   :  { %3774 = vrsqrt.f32 %v5219_v61  ;;  %vm1909_vm13 = vcmp.gt.f32.partialorder %v1794_v1, 0.0  ;;  %v1935_v25 = vmul.f32 0.2, %v1794_v1  ;;  %v1974_v23 = vadd.f32 %v4792_v47, %v1948_v39  ;;  %vm1336_vm1 = vmor %vm1334_vm0, %vm1335_vm14 }
 0x252   :  { %v1330_v40 = vmul.f32 %v3773_v37, %v1329_v12  ;;  %vm1344_vm3 = vweird.f32 %v5219_v61 }
 0x253   :  { %v1864_v24 = vpop.f32.mrf.mxu1  ;;  %v1961_v56 = vsel %vm1909_vm13, %v1794_v1, %v1935_v25 }
 0x254   :  { %v1331_v59 = vmul.f32 0.5, %v1330_v40  ;;  %v1865_v42 = vadd.f32 %v1864_v24, %v1822_v0  ;;  %v1753_v21 = vpop.f32.mrf.mxu2  ;;  %v1987_v38 = vadd.f32 %v4879_v15, %v1961_v56 }
 0x255   :  { %v1824_v43 = vpop.f32.mrf.mxu0 }
 0x256   :  { %v1332_v19 = vsub.f32 1.5, %v1331_v59  ;;  %vm1898_vm15 = vcmp.gt.f32.partialorder %v1865_v42, 0.0  ;;  %v1924_v2 = vmul.f32 0.2, %v1865_v42  ;;  %v1294_v3 = vpop.xlane.xlu1 %1293  ;;  %v1825_v5 = vadd.f32 %v1824_v43, %v4422_v13 }
 0x257   :  { %v3775_v8 = vpop.eup %3774  ;;  %v5225_v11 = vmax.f32 %v1294_v3, 1e-24  ;;  %v2003_v4 = vpack.c.bf16 %v1987_v38, %v1985_v34  ;;  %v3762_v3 = vld [vmem:[%s5622_s5 + $0x38] sm:$0xff] }
 0x258   :  { %v1333_v28 = vmul.f32 %v3773_v37, %v1332_v19  ;;  %v1339_v20 = vmul.f32 %v3775_v8, %v5219_v61  ;;  %v1950_v50 = vsel %vm1898_vm15, %v1865_v42, %v1924_v2  ;;  %2310 = vmatmul.bf16.gmra.mxu0 %v2001_v32  ;;  %vm1345_vm2 = vweird.f32 %v3775_v8  ;;  %v1798_v1 = vpop.f32.mrf.mxu3  ;;  %2593 = vmatpush.bf16.msra.mxu2 %v3762_v3 }
 0x259   :  { %3776 = vrsqrt.f32 %v5225_v11  ;;  %v1976_v14 = vadd.f32 %v4797_v6, %v1950_v50  ;;  %2229 = vmatmul.bf16.gmra.mxu2 %v2003_v4  ;;  %vm1346_vm4 = vmor %vm1344_vm3, %vm1345_vm2  ;;  %vm1354_vm9 = vweird.f32 %v5225_v11 }
 0x25a   :  { %v1337_v45 = vsel %vm1336_vm1, %v3773_v37, %v1333_v28  ;;  %v1340_v52 = vmul.f32 %v3775_v8, %v1339_v20 }
 0x25b   :  { %v1458_v60 = vmul.f32 %v1337_v45, %v4938_v18  ;;  %v1867_v35 = vpop.f32.mrf.mxu1  ;;  %v1998_v53 = vpack.c.bf16 %v1976_v14, %v1974_v23  ;;  %v1754_v18 = vadd.f32 %v1753_v21, %v4419_v9 }
 0x25c   :  { %v1341_v47 = vmul.f32 0.5, %v1340_v52  ;;  %v1868_v32 = vadd.f32 %v1867_v35, %v1825_v5  ;;  %v1755_v7 = vpop.f32.mrf.mxu2  ;;  %v3825_v52 = vld [vmem:[%s5619_s0 + $0x128] sm:$0xff] }
 0x25d   :  { %1471 = vst [vmem:[%s5625_s7] sm:$0xff] %v1458_v60  ;;  %v1826_v12 = vpop.f32.mrf.mxu0  ;;  %2257 = vmatmul.bf16.gmra.mxu3 %v1998_v53  ;;  %2343 = vmatmul.bf16.gmra.mxu1 %v1998_v53  ;;  %v1797_v0 = vadd.f32 %v1796_v36, %v1754_v18  ;;  %v1756_v42 = vadd.f32 %v1755_v7, %v4419_v9 }
 0x25e   :  { %v1342_v6 = vsub.f32 1.5, %v1341_v47  ;;  %v1296_v58 = vpop.xlane.xlu1 %1295  ;;  %v1926_v40 = vmul.f32 0.2, %v1868_v32  ;;  %v1827_v59 = vadd.f32 %v1826_v12, %v4422_v13  ;;  %vm1900_vm5 = vcmp.gt.f32.partialorder %v1868_v32, 0.0 }
 0x25f   :  { %v3777_v15 = vpop.eup %3776  ;;  %v5239_v37 = vmax.f32 %v1296_v58, 1e-24  ;;  %v1937_v29 = vmul.f32 0.2, %v1797_v0  ;;  %vm1911_vm6 = vcmp.gt.f32.partialorder %v1797_v0, 0.0  ;;  %v1799_v19 = vadd.f32 %v1798_v1, %v1756_v42 }
 0x260   :  { %v1343_v48 = vmul.f32 %v3775_v8, %v1342_v6  ;;  %v1349_v55 = vmul.f32 %v3777_v15, %v5225_v11  ;;  %vm1355_vm7 = vweird.f32 %v3777_v15  ;;  %v1952_v21 = vsel %vm1900_vm5, %v1868_v32, %v1926_v40  ;;  %v3824_v11 = vld [vmem:[%s5619_s0 + $0x118] sm:$0xff] }
 0x261   :  { %3778 = vrsqrt.f32 %v5239_v37  ;;  %vm1913_vm10 = vcmp.gt.f32.partialorder %v1799_v19, 0.0  ;;  %v1939_v23 = vmul.f32 0.2, %v1799_v19  ;;  %vm1356_vm11 = vmor %vm1354_vm9, %vm1355_vm7  ;;  %v1978_v45 = vadd.f32 %v3824_v11, %v1952_v21 }
 0x262   :  { %v1347_v24 = vsel %vm1346_vm4, %v3775_v8, %v1343_v48  ;;  %v1350_v31 = vmul.f32 %v3777_v15, %v1349_v55  ;;  %v1963_v8 = vsel %vm1911_vm6, %v1797_v0, %v1937_v29  ;;  %vm1364_vm13 = vweird.f32 %v5239_v37 }
 0x263   :  { %v1459_v39 = vmul.f32 %v1347_v24, %v4975_v54  ;;  %v1869_v43 = vpop.f32.mrf.mxu1  ;;  %v3770_v54 = vld [vmem:[%s5622_s5 + $0x78] sm:$0xff]  ;;  %v1989_v38 = vadd.f32 %v4927_v33, %v1963_v8  ;;  %v1965_v35 = vsel %vm1913_vm10, %v1799_v19, %v1939_v23  ;;  %v3827_v23 = vld [vmem:[%s5619_s0 + $0x148] sm:$0xff] }
 0x264   :  { %v1351_v61 = vmul.f32 0.5, %v1350_v31  ;;  %v1870_v25 = vadd.f32 %v1869_v43, %v1827_v59  ;;  %2636 = vmatpush.bf16.msra.mxu3 %v3770_v54  ;;  %v1991_v33 = vadd.f32 %v4943_v22, %v1965_v35  ;;  %v3760_v35 = vld [vmem:[%s5622_s5 + $0x28] sm:$0xff] }
 0x265   :  { %1472 = vst [vmem:[%s5625_s7 + $0x8] sm:$0xff] %v1459_v39  ;;  %v1829_v2 = vpop.f32.mrf.mxu0 }
 0x266   :  { %v1352_v56 = vsub.f32 1.5, %v1351_v61  ;;  %vm1902_vm8 = vcmp.gt.f32.partialorder %v1870_v25, 0.0  ;;  %v1928_v34 = vmul.f32 0.2, %v1870_v25  ;;  %v1298_v28 = vpop.xlane.xlu2 %1297  ;;  %v2005_v18 = vpack.c.bf16 %v1991_v33, %v1989_v38 }
 0x267   :  { %v3779_v20 = vpop.eup %3778  ;;  %v5258_v50 = vmax.f32 %v1298_v28, 1e-24  ;;  %v3826_v28 = vld [vmem:[%s5619_s0 + $0x138] sm:$0xff] }
 0x268   :  { %v1353_v5 = vmul.f32 %v3777_v15, %v1352_v56  ;;  %v1359_v14 = vmul.f32 %v3779_v20, %v5239_v37  ;;  %v1954_v36 = vsel %vm1902_vm8, %v1870_v25, %v1928_v34  ;;  %2315 = vmatmul.bf16.gmra.mxu0 %v2003_v4  ;;  %v1830_v4 = vadd.f32 %v1829_v2, %v4422_v13  ;;  %v3769_v25 = vld [vmem:[%s5622_s5 + $0x70] sm:$0xff] }
 0x269   :  { %3780 = vrsqrt.f32 %v5258_v50  ;;  %v1980_v60 = vadd.f32 %v3825_v52, %v1954_v36  ;;  %vm1365_vm12 = vweird.f32 %v3779_v20  ;;  %2234 = vmatmul.bf16.gmra.mxu2 %v2005_v18  ;;  %2637 = vmatpush.bf16.msra.mxu3 %v3769_v25  ;;  %vm1374_vm2 = vweird.f32 %v5258_v50  ;;  %v1758_v33 = vpop.f32.mrf.mxu2 }
 0x26a   :  { %v1357_v53 = vsel %vm1356_vm11, %v3777_v15, %v1353_v5  ;;  %v1360_v47 = vmul.f32 %v3779_v20, %v1359_v14  ;;  %v3761_v15 = vld [vmem:[%s5622_s5 + $0x30] sm:$0xff]  ;;  %vm1366_vm14 = vmor %vm1364_vm13, %vm1365_vm12 }
 0x26b   :  { %v1460_v32 = vmul.f32 %v1357_v53, %v4999_v17  ;;  %v1872_v12 = vpop.f32.mrf.mxu1  ;;  %v2000_v6 = vpack.c.bf16 %v1980_v60, %v1978_v45  ;;  %2594 = vmatpush.bf16.msra.mxu2 %v3761_v15  ;;  %v3768_v53 = vld [vmem:[%s5622_s5 + $0x68] sm:$0xff] }
 0x26c   :  { %v1361_v58 = vmul.f32 0.5, %v1360_v47  ;;  %v1873_v22 = vadd.f32 %v1872_v12, %v1830_v4 }
 0x26d   :  { %1473 = vst [vmem:[%s5625_s7 + $0x10] sm:$0xff] %v1460_v32  ;;  %v1831_v7 = vpop.f32.mrf.mxu0  ;;  %2262 = vmatmul.bf16.gmra.mxu3 %v2000_v6  ;;  %2348 = vmatmul.bf16.gmra.mxu1 %v2000_v6  ;;  %v1759_v6 = vadd.f32 %v1758_v33, %v4419_v9 }
 0x26e   :  { %v1362_v48 = vsub.f32 1.5, %v1361_v58  ;;  %v1300_v55 = vpop.xlane.xlu2 %1299  ;;  %v1930_v59 = vmul.f32 0.2, %v1873_v22  ;;  %v1832_v42 = vadd.f32 %v1831_v7, %v4422_v13  ;;  %vm1904_vm15 = vcmp.gt.f32.partialorder %v1873_v22, 0.0  ;;  %2638 = vmatpush.bf16.msra.mxu3 %v3768_v53 }
 0x26f   :  { %v3781_v17 = vpop.eup %3780  ;;  %v5279_v40 = vmax.f32 %v1300_v55, 1e-24  ;;  %2595 = vmatpush.bf16.msra.mxu2 %v3760_v35 }
 0x270   :  { %v1363_v0 = vmul.f32 %v3779_v20, %v1362_v48  ;;  %v1369_v1 = vmul.f32 %v3781_v17, %v5258_v50  ;;  %vm1375_vm0 = vweird.f32 %v3781_v17  ;;  %v1956_v2 = vsel %vm1904_vm15, %v1873_v22, %v1930_v59 }
 0x271   :  { %3782 = vrsqrt.f32 %v5279_v40  ;;  %vm1376_vm3 = vmor %vm1374_vm2, %vm1375_vm0  ;;  %vm1384_vm5 = vweird.f32 %v5279_v40 }
 0x272   :  { %v1367_v24 = vsel %vm1366_vm14, %v3779_v20, %v1363_v0  ;;  %v1370_v31 = vmul.f32 %v3781_v17, %v1369_v1  ;;  %v1982_v20 = vadd.f32 %v3826_v28, %v1956_v2 }
 0x273   :  { %v1461_v39 = vmul.f32 %v1367_v24, %v5017_v44  ;;  %v1874_v43 = vpop.f32.mrf.mxu1 }
 0x274   :  { %v1371_v29 = vmul.f32 0.5, %v1370_v31  ;;  %v1875_v61 = vadd.f32 %v1874_v43, %v1832_v42 }
 0x275   :  { %1474 = vst [vmem:[%s5625_s7 + $0x18] sm:$0xff] %v1461_v39  ;;  %v1834_v37 = vpop.f32.mrf.mxu0 }
 0x276   :  { %v1372_v19 = vsub.f32 1.5, %v1371_v29  ;;  %vm1906_vm1 = vcmp.gt.f32.partialorder %v1875_v61, 0.0  ;;  %v1932_v3 = vmul.f32 0.2, %v1875_v61  ;;  %v1302_v54 = vpop.xlane.xlu0 %1301  ;;  %v1835_v36 = vadd.f32 %v1834_v37, %v4422_v13 }
 0x277   :  { %v3783_v44 = vpop.eup %3782  ;;  %v5292_v8 = vmax.f32 %v1302_v54, 1e-24 }
 0x278   :  { %v1373_v56 = vmul.f32 %v3781_v17, %v1372_v19  ;;  %v1379_v21 = vmul.f32 %v3783_v44, %v5279_v40  ;;  %v1958_v34 = vsel %vm1906_vm1, %v1875_v61, %v1932_v3  ;;  %2320 = vmatmul.bf16.gmra.mxu0 %v2005_v18  ;;  %vm1385_vm4 = vweird.f32 %v3783_v44  ;;  %v1760_v61 = vpop.f32.mrf.mxu2 }
 0x279   :  { %3784 = vrsqrt.f32 %v5292_v8  ;;  %v1984_v5 = vadd.f32 %v3827_v23, %v1958_v34  ;;  %vm1386_vm6 = vmor %vm1384_vm5, %vm1385_vm4  ;;  %vm1394_vm11 = vweird.f32 %v5292_v8 }
 0x27a   :  { %v1377_v14 = vsel %vm1376_vm3, %v3781_v17, %v1373_v56  ;;  %v1380_v50 = vmul.f32 %v3783_v44, %v1379_v21 }
 0x27b   :  { %v1462_v38 = vmul.f32 %v1377_v14, %v5035_v30  ;;  %v1877_v11 = vpop.f32.mrf.mxu1  ;;  %v2002_v45 = vpack.c.bf16 %v1984_v5, %v1982_v20 }
 0x27c   :  { %v1381_v52 = vmul.f32 0.5, %v1380_v50  ;;  %v1878_v30 = vadd.f32 %v1877_v11, %v1835_v36 }
 0x27d   :  { %1475 = vst [vmem:[%s5625_s7 + $0x20] sm:$0xff] %v1462_v38  ;;  %v1836_v60 = vpop.f32.mrf.mxu0  ;;  %2267 = vmatmul.bf16.gmra.mxu3 %v2002_v45  ;;  %2353 = vmatmul.bf16.gmra.mxu1 %v2002_v45  ;;  %v1801_v7 = vpop.f32.mrf.mxu3  ;;  %v3759_v38 = vld [vmem:[%s5622_s5 + $0x20] sm:$0xff] }
 0x27e   :  { %v1382_v47 = vsub.f32 1.5, %v1381_v52  ;;  %v1304_v4 = vpop.xlane.xlu1 %1303  ;;  %v1802_v15 = vadd.f32 %v1801_v7, %v1759_v6  ;;  %v1934_v55 = vmul.f32 0.2, %v1878_v30  ;;  %v1837_v17 = vadd.f32 %v1836_v60, %v4422_v13  ;;  %2596 = vmatpush.bf16.msra.mxu2 %v3759_v38  ;;  %v3764_v38 = vld [vmem:[%s5622_s5 + $0x48] sm:$0xff] }
 0x27f   :  { %v3785_v32 = vpop.eup %3784  ;;  %v5315_v12 = vmax.f32 %v1304_v4, 1e-24  ;;  %vm1908_vm7 = vcmp.gt.f32.partialorder %v1878_v30, 0.0 }
 0x280   :  { %v1383_v58 = vmul.f32 %v3783_v44, %v1382_v47  ;;  %v1389_v18 = vmul.f32 %v3785_v32, %v5292_v8  ;;  %v1941_v9 = vmul.f32 0.2, %v1802_v15  ;;  %vm1915_vm8 = vcmp.gt.f32.partialorder %v1802_v15, 0.0 }
 0x281   :  { %3786 = vrsqrt.f32 %v5315_v12  ;;  %vm1395_vm9 = vweird.f32 %v3785_v32  ;;  %v1960_v39 = vsel %vm1908_vm7, %v1878_v30, %v1934_v55  ;;  %vm1404_vm14 = vweird.f32 %v5315_v12 }
 0x282   :  { %v1387_v48 = vsel %vm1386_vm6, %v3783_v44, %v1383_v58  ;;  %v1390_v22 = vmul.f32 %v3785_v32, %v1389_v18  ;;  %v1967_v59 = vsel %vm1915_vm8, %v1802_v15, %v1941_v9  ;;  %vm1396_vm12 = vmor %vm1394_vm11, %vm1395_vm9  ;;  %v3828_v44 = vld [vmem:[%s5619_s0 + $0x158] sm:$0xff] }
 0x283   :  { %v1463_v0 = vmul.f32 %v1387_v48, %v5062_v49  ;;  %v1879_v1 = vpop.f32.mrf.mxu1  ;;  %v1993_v25 = vadd.f32 %v5046_v16, %v1967_v59  ;;  %v1986_v56 = vadd.f32 %v3828_v44, %v1960_v39  ;;  %v3829_v16 = vld [vmem:[%s5619_s0 + $0x168] sm:$0xff] }
 0x284   :  { %v1391_v24 = vmul.f32 0.5, %v1390_v22  ;;  %v1880_v31 = vadd.f32 %v1879_v1, %v1837_v17  ;;  %v3831_v59 = vld [vmem:[%s5619_s0 + $0x188] sm:$0xff] }
 0x285   :  { %1476 = vst [vmem:[%s5625_s7 + $0x28] sm:$0xff] %v1463_v0  ;;  %v1839_v40 = vpop.f32.mrf.mxu0  ;;  %v1803_v54 = vpop.f32.mrf.mxu3  ;;  %v2007_v34 = vpack.c.bf16 %v1993_v25, %v1993_v25  ;;  %v3758_v25 = vld [vmem:[%s5622_s5 + $0x18] sm:$0xff] }
 0x286   :  { %v1392_v42 = vsub.f32 1.5, %v1391_v24  ;;  %vm1910_vm10 = vcmp.gt.f32.partialorder %v1880_v31, 0.0  ;;  %v1936_v43 = vmul.f32 0.2, %v1880_v31  ;;  %v1306_v29 = vpop.xlane.xlu2 %1305  ;;  %v1840_v20 = vadd.f32 %v1839_v40, %v4422_v13  ;;  %2597 = vmatpush.bf16.msra.mxu2 %v3758_v25 }
 0x287   :  { %v3787_v49 = vpop.eup %3786  ;;  %v5326_v37 = vmax.f32 %v1306_v29, 1e-24  ;;  %2239 = vmatmul.bf16.gmra.mxu2 %v2007_v34 }
 0x288   :  { %v1393_v19 = vmul.f32 %v3785_v32, %v1392_v42  ;;  %v1399_v2 = vmul.f32 %v3787_v49, %v5315_v12  ;;  %v1962_v3 = vsel %vm1910_vm10, %v1880_v31, %v1936_v43  ;;  %2325 = vmatmul.bf16.gmra.mxu0 %v2007_v34  ;;  %vm1405_vm13 = vweird.f32 %v3787_v49  ;;  %v3830_v31 = vld [vmem:[%s5619_s0 + $0x178] sm:$0xff] }
 0x289   :  { %3788 = vrsqrt.f32 %v5326_v37  ;;  %v1988_v21 = vadd.f32 %v3829_v16, %v1962_v3  ;;  %vm1406_vm15 = vmor %vm1404_vm14, %vm1405_vm13  ;;  %vm1414_vm3 = vweird.f32 %v5326_v37  ;;  %v3757_v16 = vld [vmem:[%s5622_s5 + $0x10] sm:$0xff] }
 0x28a   :  { %v1397_v8 = vsel %vm1396_vm12, %v3785_v32, %v1393_v19  ;;  %v1400_v28 = vmul.f32 %v3787_v49, %v1399_v2  ;;  %v3766_v2 = vld [vmem:[%s5622_s5 + $0x58] sm:$0xff]  ;;  %2598 = vmatpush.bf16.msra.mxu2 %v3757_v16 }
 0x28b   :  { %v1464_v23 = vmul.f32 %v1397_v8, %v5087_v57  ;;  %v1882_v5 = vpop.f32.mrf.mxu1  ;;  %v2004_v14 = vpack.c.bf16 %v1988_v21, %v1986_v56  ;;  %v3767_v57 = vld [vmem:[%s5622_s5 + $0x60] sm:$0xff]  ;;  %v3765_v21 = vld [vmem:[%s5622_s5 + $0x50] sm:$0xff] }
 0x28c   :  { %v1401_v50 = vmul.f32 0.5, %v1400_v28  ;;  %v1883_v45 = vadd.f32 %v1882_v5, %v1840_v20  ;;  %2639 = vmatpush.bf16.msra.mxu3 %v3767_v57 }
 0x28d   :  { %1477 = vst [vmem:[%s5625_s7 + $0x30] sm:$0xff] %v1464_v23  ;;  %v1841_v36 = vpop.f32.mrf.mxu0  ;;  %2272 = vmatmul.bf16.gmra.mxu3 %v2004_v14  ;;  %2358 = vmatmul.bf16.gmra.mxu1 %v2004_v14 }
 0x28e   :  { %v1402_v11 = vsub.f32 1.5, %v1401_v50  ;;  %v1308_v52 = vpop.xlane.xlu0 %1307  ;;  %v1938_v33 = vmul.f32 0.2, %v1883_v45  ;;  %v1842_v32 = vadd.f32 %v1841_v36, %v4422_v13  ;;  %vm1912_vm0 = vcmp.gt.f32.partialorder %v1883_v45, 0.0  ;;  %v3756_v36 = vld [vmem:[%s5622_s5 + $0x8] sm:$0xff] }
 0x28f   :  { %v3789_v60 = vpop.eup %3788  ;;  %v5350_v35 = vmax.f32 %v1308_v52, 1e-24  ;;  %2599 = vmatpush.bf16.msra.mxu2 %v3756_v36 }
 0x290   :  { %v1403_v53 = vmul.f32 %v3787_v49, %v1402_v11  ;;  %v1409_v47 = vmul.f32 %v3789_v60, %v5326_v37  ;;  %vm1415_vm1 = vweird.f32 %v3789_v60  ;;  %v1964_v48 = vsel %vm1912_vm0, %v1883_v45, %v1938_v33  ;;  %2640 = vmatpush.bf16.msra.mxu3 %v3766_v2 }
 0x291   :  { %3790 = vrsqrt.f32 %v5350_v35  ;;  %vm1416_vm4 = vmor %vm1414_vm3, %vm1415_vm1  ;;  %v1990_v40 = vadd.f32 %v3830_v31, %v1964_v48  ;;  %vm1424_vm7 = vweird.f32 %v5350_v35 }
 0x292   :  { %v1407_v30 = vsel %vm1406_vm15, %v3787_v49, %v1403_v53  ;;  %v1410_v4 = vmul.f32 %v3789_v60, %v1409_v47 }
 0x293   :  { %v1465_v6 = vmul.f32 %v1407_v30, %v5111_v46  ;;  %v1884_v58 = vpop.f32.mrf.mxu1 }
 0x294   :  { %v1411_v18 = vmul.f32 0.5, %v1410_v4  ;;  %v1885_v7 = vadd.f32 %v1884_v58, %v1842_v32  ;;  %2641 = vmatpush.bf16.msra.mxu3 %v3765_v21 }
 0x295   :  { %1478 = vst [vmem:[%s5625_s7 + $0x38] sm:$0xff] %v1465_v6  ;;  %v1844_v12 = vpop.f32.mrf.mxu0  ;;  %v5388_v34 = vpop.f32.mrf.mxu2 }
 0x296   :  { %v1412_v15 = vsub.f32 1.5, %v1411_v18  ;;  %vm1914_vm2 = vcmp.gt.f32.partialorder %v1885_v7, 0.0  ;;  %v1940_v22 = vmul.f32 0.2, %v1885_v7  ;;  %v1310_v55 = vpop.xlane.xlu1 %1309  ;;  %v1845_v24 = vadd.f32 %v1844_v12, %v4422_v13 }
 0x297   :  { %v3791_v17 = vpop.eup %3790  ;;  %v5361_v0 = vmax.f32 %v1310_v55, 1e-24 }
 0x298   :  { %v1413_v46 = vmul.f32 %v3789_v60, %v1412_v15  ;;  %v1419_v1 = vmul.f32 %v3791_v17, %v5350_v35  ;;  %v1966_v9 = vsel %vm1914_vm2, %v1885_v7, %v1940_v22  ;;  %vm1425_vm5 = vweird.f32 %v3791_v17  ;;  %2642 = vmatpush.bf16.msra.mxu3 %v3764_v38 }
 0x299   :  { %3792 = vrsqrt.f32 %v5361_v0  ;;  %v1992_v42 = vadd.f32 %v3831_v59, %v1966_v9  ;;  %vm1426_vm8 = vmor %vm1424_vm7, %vm1425_vm5  ;;  %vm1434_vm10 = vweird.f32 %v5361_v0  ;;  %v3755_v59 = vld [vmem:[%s5622_s5] sm:$0xff] }
 0x29a   :  { %v1417_v39 = vsel %vm1416_vm4, %v3789_v60, %v1413_v46  ;;  %v1420_v43 = vmul.f32 %v3791_v17, %v1419_v1  ;;  %2600 = vmatpush.bf16.msra.mxu2 %v3755_v59 }
 0x29b   :  { %v1466_v29 = vmul.f32 %v1417_v39, %v5130_v41  ;;  %v2006_v61 = vpack.c.bf16 %v1992_v42, %v1990_v40  ;;  %v1887_v49 = vpop.f32.mrf.mxu1 }
 0x29c   :  { %v1421_v13 = vmul.f32 0.5, %v1420_v43  ;;  %v1888_v37 = vadd.f32 %v1887_v49, %v1845_v24  ;;  %v3763_v24 = vld [vmem:[%s5622_s5 + $0x40] sm:$0xff] }
 0x29d   :  { %1479 = vst [vmem:[%s5625_s7 + $0x40] sm:$0xff] %v1466_v29  ;;  %2277 = vmatmul.bf16.gmra.mxu3 %v2006_v61  ;;  %2363 = vmatmul.bf16.gmra.mxu1 %v2006_v61  ;;  %v1846_v19 = vpop.f32.mrf.mxu0  ;;  %v5405_v47 = vpop.f32.mrf.mxu2 }
 0x29e   :  { %v1422_v41 = vsub.f32 1.5, %v1421_v13  ;;  %v1312_v3 = vpop.xlane.xlu2 %1311  ;;  %v1942_v54 = vmul.f32 0.2, %v1888_v37  ;;  %vm1916_vm6 = vcmp.gt.f32.partialorder %v1888_v37, 0.0  ;;  %2643 = vmatpush.bf16.msra.mxu3 %v3763_v24 }
 0x29f   :  { %v3793_v44 = vpop.eup %3792  ;;  %v1326_v56 = vmax.f32 %v1312_v3, 1e-24 }
 0x2a0   :  { %v1423_v8 = vmul.f32 %v3791_v17, %v1422_v41  ;;  %v1429_v28 = vmul.f32 %v3793_v44, %v5361_v0  ;;  %v1968_v5 = vsel %vm1916_vm6, %v1888_v37, %v1942_v54  ;;  %vm1435_vm9 = vweird.f32 %v3793_v44 }
 0x2a1   :  { %3794 = vrsqrt.f32 %v1326_v56  ;;  %vm1436_vm11 = vmor %vm1434_vm10, %vm1435_vm9  ;;  %vm1444_vm13 = vweird.f32 %v1326_v56  ;;  %v2211_v41 = vadd.f32 %v5388_v34, %v4562_v63 }
 0x2a2   :  { %v1427_v20 = vsel %vm1426_vm8, %v3791_v17, %v1423_v8  ;;  %v1430_v23 = vmul.f32 %v3793_v44, %v1429_v28  ;;  %v2213_v8 = vadd.f32 %v5405_v47, %v4562_v63 }
 0x2a3   :  { %v1467_v14 = vmul.f32 %v1427_v20, %v5169_v62  ;;  %v1889_v50 = vpop.f32.mrf.mxu1  ;;  %v3832_v62 = vld [vmem:[%s5619_s0 + $0x198] sm:$0xff] }
 0x2a4   :  { %v1431_v57 = vmul.f32 0.5, %v1430_v23  ;;  %v1994_v11 = vadd.f32 %v3832_v62, %v1968_v5 }
 0x2a5   :  { %1480 = vst [vmem:[%s5625_s7 + $0x48] sm:$0xff] %v1467_v14  ;;  %v2296_v45 = vpop.f32.mrf.mxu0  ;;  %v5412_v48 = vpop.f32.mrf.mxu2 }
 0x2a6   :  { %v1432_v52 = vsub.f32 1.5, %v1431_v57  ;;  %v1314_v60 = vpop.xlane.xlu0 %1313  ;;  %v2008_v33 = vpack.c.bf16 %v1994_v11, %v1994_v11  ;;  %v2297_v13 = vadd.f32 %v2296_v45, %v4577_v26 }
 0x2a7   :  { %v3795_v35 = vpop.eup %3794  ;;  %v1327_v53 = vmax.f32 %v1314_v60, 1e-24 }
 0x2a8   :  { %v1433_v30 = vmul.f32 %v3793_v44, %v1432_v52  ;;  %v1439_v4 = vmul.f32 %v3795_v35, %v1326_v56  ;;  %vm1445_vm12 = vweird.f32 %v3795_v35 }
 0x2a9   :  { %3796 = vrsqrt.f32 %v1327_v53  ;;  %vm1446_vm14 = vmor %vm1444_vm13, %vm1445_vm12  ;;  %vm1454_vm0 = vweird.f32 %v1327_v53 }
 0x2aa   :  { %v1437_v32 = vsel %vm1436_vm11, %v3793_v44, %v1433_v30  ;;  %v1440_v6 = vmul.f32 %v3795_v35, %v1439_v4  ;;  %v2216_v30 = vadd.f32 %v5412_v48, %v4562_v63 }
 0x2ab   :  { %v1468_v58 = vmul.f32 %v1437_v32, %v5177_v10 }
 0x2ac   :  { %v1441_v18 = vmul.f32 0.5, %v1440_v6 }
 0x2ad   :  { %1481 = vst [vmem:[%s5625_s7 + $0x50] sm:$0xff] %v1468_v58  ;;  %2282 = vmatmul.bf16.gmra.mxu3 %v2008_v33  ;;  %2368 = vmatmul.bf16.gmra.mxu1 %v2008_v33  ;;  %v2298_v7 = vpop.f32.mrf.mxu0  ;;  %v2217_v31 = vpop.f32.mrf.mxu2 }
 0x2ae   :  { %v1442_v12 = vsub.f32 1.5, %v1441_v18  ;;  %v2299_v2 = vadd.f32 %v2298_v7, %v4577_v26  ;;  %v2218_v18 = vadd.f32 %v2217_v31, %v4562_v63 }
 0x2af   :  { %v3797_v15 = vpop.eup %3796 }
 0x2b0   :  { %v1443_v22 = vmul.f32 %v3795_v35, %v1442_v12  ;;  %v1449_v55 = vmul.f32 %v3797_v15, %v1327_v53  ;;  %vm1455_vm15 = vweird.f32 %v3797_v15 }
 0x2b1   :  { %vm1456_vm1 = vmor %vm1454_vm0, %vm1455_vm15 }
 0x2b2   :  { %v1447_v17 = vsel %vm1446_vm14, %v3795_v35, %v1443_v22  ;;  %v1450_v0 = vmul.f32 %v3797_v15, %v1449_v55 }
 0x2b3   :  { %v1469_v10 = vmul.f32 %v1447_v17, %v5191_v51 }
 0x2b4   :  { %v1451_v46 = vmul.f32 0.5, %v1450_v0 }
 0x2b5   :  { %1482 = vst [vmem:[%s5625_s7 + $0x58] sm:$0xff] %v1469_v10  ;;  %v2301_v1 = vpop.f32.mrf.mxu0  ;;  %v5428_v43 = vpop.f32.mrf.mxu2 }
 0x2b6   :  { %v1452_v9 = vsub.f32 1.5, %v1451_v46  ;;  %v2302_v38 = vadd.f32 %v2301_v1, %v4577_v26 }
 0x2b8   :  { %v1453_v40 = vmul.f32 %v3797_v15, %v1452_v9 }
 0x2ba   :  { %v1457_v51 = vsel %vm1456_vm1, %v3797_v15, %v1453_v40 }
 0x2bb   :  { %v1470_v42 = vmul.f32 %v1457_v51, %v5203_v27 }
 0x2bd   :  { %1483 = vst [vmem:[%s5625_s7 + $0x60] sm:$0xff] %v1470_v42  ;;  %v2303_v39 = vpop.f32.mrf.mxu0  ;;  %v5430_v49 = vpop.f32.mrf.mxu2 }
 0x2be   :  { %v2304_v53 = vadd.f32 %v2303_v39, %v4577_v26 }
 0x2c5   :  { %v2306_v29 = vpop.f32.mrf.mxu0  ;;  %v5438_v44 = vpop.f32.mrf.mxu2 }
 0x2c6   :  { %v2307_v46 = vadd.f32 %v2306_v29, %v4577_v26 }
 0x2ca   :  { %v2339_v61 = vpop.f32.mrf.mxu1 }
 0x2cb   :  { %v2340_v25 = vadd.f32 %v2339_v61, %v2297_v13  ;;  %v2221_v61 = vadd.f32 %v5428_v43, %v4562_v63 }
 0x2cd   :  { %v5433_v37 = vpop.f32.mrf.mxu0  ;;  %v2400_v3 = vmul.f32 0.2, %v2340_v25  ;;  %vm2374_vm2 = vcmp.gt.f32.partialorder %v2340_v25, 0.0  ;;  %v5447_v52 = vpop.f32.mrf.mxu2 }
 0x2ce   :  { %v2309_v51 = vadd.f32 %v5433_v37, %v4577_v26 }
 0x2cf   :  { %v2426_v28 = vsel %vm2374_vm2, %v2340_v25, %v2400_v3 }
 0x2d0   :  { %v2253_v19 = vpop.f32.mrf.mxu3 }
 0x2d1   :  { %v2254_v56 = vadd.f32 %v2253_v19, %v2211_v41 }
 0x2d2   :  { %v2341_v27 = vpop.f32.mrf.mxu1 }
 0x2d3   :  { %v2342_v54 = vadd.f32 %v2341_v27, %v2299_v2  ;;  %v2399_v14 = vmul.f32 0.2, %v2254_v56  ;;  %vm2373_vm4 = vcmp.gt.f32.partialorder %v2254_v56, 0.0  ;;  %v2223_v27 = vadd.f32 %v5430_v49, %v4562_v63 }
 0x2d5   :  { %vm2376_vm3 = vcmp.gt.f32.partialorder %v2342_v54, 0.0  ;;  %v2402_v16 = vmul.f32 0.2, %v2342_v54  ;;  %v5440_v21 = vpop.f32.mrf.mxu0  ;;  %v2425_v57 = vsel %vm2373_vm4, %v2254_v56, %v2399_v14 }
 0x2d7   :  { %v2428_v20 = vsel %vm2376_vm3, %v2342_v54, %v2402_v16 }
 0x2d8   :  { %v2452_v23 = vpack.c.bf16 %v2428_v20, %v2426_v28  ;;  %v2255_v5 = vpop.f32.mrf.mxu3  ;;  %v2312_v20 = vadd.f32 %v5440_v21, %v4577_v26 }
 0x2d9   :  { %v2256_v50 = vadd.f32 %v2255_v5, %v2213_v8 }
 0x2da   :  { %v2344_v34 = vpop.f32.mrf.mxu1  ;;  %2644 = vmatmul.bf16.vlgmr.msra.gmra.mxu3 %v2452_v23 }
 0x2db   :  { %vm2375_vm5 = vcmp.gt.f32.partialorder %v2256_v50, 0.0  ;;  %v2401_v36 = vmul.f32 0.2, %v2256_v50  ;;  %v2345_v60 = vadd.f32 %v2344_v34, %v2302_v38 }
 0x2dc   :  { %v5455_v55 = vpop.f32.mrf.mxu2 }
 0x2dd   :  { %v2427_v62 = vsel %vm2375_vm5, %v2256_v50, %v2401_v36  ;;  %v5445_v11 = vpop.f32.mrf.mxu0  ;;  %v2404_v4 = vmul.f32 0.2, %v2345_v60  ;;  %vm2378_vm6 = vcmp.gt.f32.partialorder %v2345_v60, 0.0 }
 0x2de   :  { %v2451_v45 = vpack.c.bf16 %v2427_v62, %v2425_v57  ;;  %v2314_v36 = vadd.f32 %v5445_v11, %v4577_v26  ;;  %v2226_v57 = vadd.f32 %v5438_v44, %v4562_v63 }
 0x2df   :  { %v2430_v7 = vsel %vm2378_vm6, %v2345_v60, %v2404_v4 }
 0x2e0   :  { %v2258_v35 = vpop.f32.mrf.mxu3  ;;  %2601 = vmatmul.bf16.vlgmr.msra.gmra.mxu2 %v2451_v45 }
 0x2e1   :  { %v2259_v32 = vadd.f32 %v2258_v35, %v2216_v30 }
 0x2e2   :  { %v2346_v47 = vpop.f32.mrf.mxu1 }
 0x2e3   :  { %v2347_v33 = vadd.f32 %v2346_v47, %v2304_v53  ;;  %v2403_v17 = vmul.f32 0.2, %v2259_v32  ;;  %vm2377_vm8 = vcmp.gt.f32.partialorder %v2259_v32, 0.0  ;;  %v2228_v53 = vadd.f32 %v5447_v52, %v4562_v63 }
 0x2e4   :  { %v5462_v39 = vpop.f32.mrf.mxu2 }
 0x2e5   :  { %vm2380_vm7 = vcmp.gt.f32.partialorder %v2347_v33, 0.0  ;;  %v2406_v6 = vmul.f32 0.2, %v2347_v33  ;;  %v5452_v58 = vpop.f32.mrf.mxu0  ;;  %v2429_v1 = vsel %vm2377_vm8, %v2259_v32, %v2403_v17 }
 0x2e7   :  { %v2432_v12 = vsel %vm2380_vm7, %v2347_v33, %v2406_v6 }
 0x2e8   :  { %v2260_v15 = vpop.f32.mrf.mxu3  ;;  %v2454_v22 = vpack.c.bf16 %v2432_v12, %v2430_v7  ;;  %v2317_v7 = vadd.f32 %v5452_v58, %v4577_v26 }
 0x2e9   :  { %v2261_v0 = vadd.f32 %v2260_v15, %v2218_v18 }
 0x2ea   :  { %v2349_v48 = vpop.f32.mrf.mxu1  ;;  %2649 = vmatmul.bf16.gmra.mxu3 %v2454_v22 }
 0x2eb   :  { %vm2379_vm9 = vcmp.gt.f32.partialorder %v2261_v0, 0.0  ;;  %v2405_v10 = vmul.f32 0.2, %v2261_v0  ;;  %v2350_v40 = vadd.f32 %v2349_v48, %v2307_v46 }
 0x2ec   :  { %v5470_v28 = vpop.f32.mrf.mxu2 }
 0x2ed   :  { %v2431_v9 = vsel %vm2379_vm9, %v2261_v0, %v2405_v10  ;;  %v5458_v24 = vpop.f32.mrf.mxu0  ;;  %v2408_v13 = vmul.f32 0.2, %v2350_v40  ;;  %vm2382_vm10 = vcmp.gt.f32.partialorder %v2350_v40, 0.0 }
 0x2ee   :  { %v2453_v31 = vpack.c.bf16 %v2431_v9, %v2429_v1  ;;  %v2319_v10 = vadd.f32 %v5458_v24, %v4577_v26  ;;  %v2231_v1 = vadd.f32 %v5455_v55, %v4562_v63 }
 0x2ef   :  { %v2434_v41 = vsel %vm2382_vm10, %v2350_v40, %v2408_v13 }
 0x2f0   :  { %v2263_v59 = vpop.f32.mrf.mxu3  ;;  %2606 = vmatmul.bf16.gmra.mxu2 %v2453_v31 }
 0x2f1   :  { %v2264_v29 = vadd.f32 %v2263_v59, %v2221_v61 }
 0x2f2   :  { %v2351_v42 = vpop.f32.mrf.mxu1 }
 0x2f3   :  { %v2352_v25 = vadd.f32 %v2351_v42, %v2309_v51  ;;  %v2407_v56 = vmul.f32 0.2, %v2264_v29  ;;  %vm2381_vm12 = vcmp.gt.f32.partialorder %v2264_v29, 0.0  ;;  %v2233_v51 = vadd.f32 %v5462_v39, %v4562_v63 }
 0x2f4   :  { %v2237_v35 = vpop.f32.mrf.mxu2 }
 0x2f5   :  { %vm2384_vm11 = vcmp.gt.f32.partialorder %v2352_v25, 0.0  ;;  %v2410_v19 = vmul.f32 0.2, %v2352_v25  ;;  %v5466_v2 = vpop.f32.mrf.mxu0  ;;  %v2433_v23 = vsel %vm2381_vm12, %v2264_v29, %v2407_v56 }
 0x2f7   :  { %v2436_v3 = vsel %vm2384_vm11, %v2352_v25, %v2410_v19 }
 0x2f8   :  { %v2265_v37 = vpop.f32.mrf.mxu3  ;;  %v2456_v54 = vpack.c.bf16 %v2436_v3, %v2434_v41 }
 0x2f9   :  { %v2266_v16 = vadd.f32 %v2265_v37, %v2223_v27  ;;  %v2322_v27 = vadd.f32 %v5466_v2, %v4577_v26  ;;  %v2238_v2 = vadd.f32 %v2237_v35, %v4562_v63 }
 0x2fa   :  { %v2354_v8 = vpop.f32.mrf.mxu1  ;;  %2654 = vmatmul.bf16.gmra.mxu3 %v2456_v54 }
 0x2fb   :  { %vm2383_vm13 = vcmp.gt.f32.partialorder %v2266_v16, 0.0  ;;  %v2409_v43 = vmul.f32 0.2, %v2266_v16  ;;  %v2355_v49 = vadd.f32 %v2354_v8, %v2312_v20  ;;  %v2236_v8 = vadd.f32 %v5470_v28, %v4562_v63 }
 0x2fd   :  { %v2435_v5 = vsel %vm2383_vm13, %v2266_v16, %v2409_v43  ;;  %v2323_v34 = vpop.f32.mrf.mxu0  ;;  %v2412_v62 = vmul.f32 0.2, %v2355_v49  ;;  %vm2386_vm14 = vcmp.gt.f32.partialorder %v2355_v49, 0.0 }
 0x2fe   :  { %v2455_v14 = vpack.c.bf16 %v2435_v5, %v2433_v23  ;;  %v2324_v39 = vadd.f32 %v2323_v34, %v4577_v26 }
 0x2ff   :  { %v2438_v47 = vsel %vm2386_vm14, %v2355_v49, %v2412_v62 }
 0x300   :  { %v2268_v50 = vpop.f32.mrf.mxu3  ;;  %2611 = vmatmul.bf16.gmra.mxu2 %v2455_v14 }
 0x301   :  { %v2269_v60 = vadd.f32 %v2268_v50, %v2226_v57 }
 0x302   :  { %v2356_v38 = vpop.f32.mrf.mxu1 }
 0x303   :  { %v2357_v45 = vadd.f32 %v2356_v38, %v2314_v36  ;;  %v2411_v11 = vmul.f32 0.2, %v2269_v60  ;;  %vm2385_vm0 = vcmp.gt.f32.partialorder %v2269_v60, 0.0 }
 0x305   :  { %vm2388_vm15 = vcmp.gt.f32.partialorder %v2357_v45, 0.0  ;;  %v2414_v21 = vmul.f32 0.2, %v2357_v45  ;;  %v2326_v32 = vpop.f32.mrf.mxu0  ;;  %v2437_v12 = vsel %vm2385_vm0, %v2269_v60, %v2411_v11 }
 0x306   :  { %v2327_v57 = vadd.f32 %v2326_v32, %v4577_v26 }
 0x307   :  { %v2440_v30 = vsel %vm2388_vm15, %v2357_v45, %v2414_v21 }
 0x308   :  { %v2270_v4 = vpop.f32.mrf.mxu3  ;;  %v2458_v33 = vpack.c.bf16 %v2440_v30, %v2438_v47 }
 0x309   :  { %v2271_v6 = vadd.f32 %v2270_v4, %v2228_v53 }
 0x30a   :  { %v2359_v18 = vpop.f32.mrf.mxu1  ;;  %2659 = vmatmul.bf16.gmra.mxu3 %v2458_v33  ;;  %v2240_v17 = vpop.f32.mrf.mxu2 }
 0x30b   :  { %vm2387_vm1 = vcmp.gt.f32.partialorder %v2271_v6, 0.0  ;;  %v2413_v44 = vmul.f32 0.2, %v2271_v6  ;;  %v2360_v52 = vadd.f32 %v2359_v18, %v2317_v7  ;;  %v2241_v47 = vadd.f32 %v2240_v17, %v4562_v63  ;;  %v5499_v63 = vld [vmem:[%s5624_s6] ss:$0 sm:$0xff] }
 0x30d   :  { %v2439_v15 = vsel %vm2387_vm1, %v2271_v6, %v2413_v44  ;;  %v2328_v48 = vpop.f32.mrf.mxu0  ;;  %v2416_v9 = vmul.f32 0.2, %v2360_v52  ;;  %vm2390_vm2 = vcmp.gt.f32.partialorder %v2360_v52, 0.0 }
 0x30e   :  { %v2457_v22 = vpack.c.bf16 %v2439_v15, %v2437_v12 }
 0x30f   :  { %v2442_v42 = vsel %vm2390_vm2, %v2360_v52, %v2416_v9 }
 0x310   :  { %v2273_v0 = vpop.f32.mrf.mxu3  ;;  %2616 = vmatmul.bf16.gmra.mxu2 %v2457_v22 }
 0x311   :  { %v2274_v40 = vadd.f32 %v2273_v0, %v2231_v1 }
 0x312   :  { %v2361_v46 = vpop.f32.mrf.mxu1  ;;  %v2242_v59 = vpop.f32.mrf.mxu2 }
 0x313   :  { %v2362_v31 = vadd.f32 %v2361_v46, %v2319_v10  ;;  %v2415_v29 = vmul.f32 0.2, %v2274_v40  ;;  %vm2389_vm4 = vcmp.gt.f32.partialorder %v2274_v40, 0.0 }
 0x315   :  { %vm2392_vm3 = vcmp.gt.f32.partialorder %v2362_v31, 0.0  ;;  %v2418_v58 = vmul.f32 0.2, %v2362_v31  ;;  %v2441_v41 = vsel %vm2389_vm4, %v2274_v40, %v2415_v29 }
 0x317   :  { %v2444_v61 = vsel %vm2392_vm3, %v2362_v31, %v2418_v58 }
 0x318   :  { %v2275_v13 = vpop.f32.mrf.mxu3  ;;  %v2460_v25 = vpack.c.bf16 %v2444_v61, %v2442_v42 }
 0x319   :  { %v2276_v24 = vadd.f32 %v2275_v13, %v2233_v51 }
 0x31a   :  { %v2364_v19 = vpop.f32.mrf.mxu1  ;;  %2664 = vmatmul.bf16.gmra.mxu3 %v2460_v25 }
 0x31b   :  { %vm2391_vm5 = vcmp.gt.f32.partialorder %v2276_v24, 0.0  ;;  %v2417_v55 = vmul.f32 0.2, %v2276_v24  ;;  %v2365_v54 = vadd.f32 %v2364_v19, %v2322_v27 }
 0x31d   :  { %v2443_v3 = vsel %vm2391_vm5, %v2276_v24, %v2417_v55  ;;  %v2420_v43 = vmul.f32 0.2, %v2365_v54  ;;  %vm2394_vm6 = vcmp.gt.f32.partialorder %v2365_v54, 0.0 }
 0x31e   :  { %v2459_v37 = vpack.c.bf16 %v2443_v3, %v2441_v41 }
 0x31f   :  { %v2446_v14 = vsel %vm2394_vm6, %v2365_v54, %v2420_v43 }
 0x320   :  { %v2278_v56 = vpop.f32.mrf.mxu3  ;;  %2621 = vmatmul.bf16.gmra.mxu2 %v2459_v37 }
 0x321   :  { %v2279_v23 = vadd.f32 %v2278_v56, %v2236_v8 }
 0x322   :  { %v2366_v16 = vpop.f32.mrf.mxu1 }
 0x323   :  { %v2367_v20 = vadd.f32 %v2366_v16, %v2324_v39  ;;  %v2419_v38 = vmul.f32 0.2, %v2279_v23  ;;  %vm2393_vm8 = vcmp.gt.f32.partialorder %v2279_v23, 0.0 }
 0x325   :  { %vm2396_vm7 = vcmp.gt.f32.partialorder %v2367_v20, 0.0  ;;  %v2422_v5 = vmul.f32 0.2, %v2367_v20  ;;  %v2445_v60 = vsel %vm2393_vm8, %v2279_v23, %v2419_v38 }
 0x327   :  { %v2448_v49 = vsel %vm2396_vm7, %v2367_v20, %v2422_v5 }
 0x328   :  { %v2280_v50 = vpop.f32.mrf.mxu3  ;;  %v2462_v36 = vpack.c.bf16 %v2448_v49, %v2446_v14 }
 0x329   :  { %v2281_v34 = vadd.f32 %v2280_v50, %v2238_v2 }
 0x32a   :  { %v2369_v62 = vpop.f32.mrf.mxu1  ;;  %2669 = vmatmul.bf16.gmra.mxu3 %v2462_v36 }
 0x32b   :  { %vm2395_vm9 = vcmp.gt.f32.partialorder %v2281_v34, 0.0  ;;  %v2421_v28 = vmul.f32 0.2, %v2281_v34  ;;  %v2370_v45 = vadd.f32 %v2369_v62, %v2327_v57 }
 0x32d   :  { %v2447_v21 = vsel %vm2395_vm9, %v2281_v34, %v2421_v28  ;;  %v2424_v30 = vmul.f32 0.2, %v2370_v45  ;;  %vm2398_vm10 = vcmp.gt.f32.partialorder %v2370_v45, 0.0 }
 0x32e   :  { %v2461_v53 = vpack.c.bf16 %v2447_v21, %v2445_v60 }
 0x32f   :  { %v2450_v11 = vsel %vm2398_vm10, %v2370_v45, %v2424_v30 }
 0x330   :  { %v2283_v35 = vpop.f32.mrf.mxu3  ;;  %2626 = vmatmul.bf16.gmra.mxu2 %v2461_v53  ;;  %v2464_v6 = vpack.c.bf16 %v2450_v11, %v2450_v11 }
 0x331   :  { %v2284_v33 = vadd.f32 %v2283_v35, %v2241_v47 }
 0x332   :  { %v2371_v4 = vpop.f32.mrf.mxu1 }
 0x333   :  { %v2423_v26 = vmul.f32 0.2, %v2284_v33  ;;  %vm2397_vm11 = vcmp.gt.f32.partialorder %v2284_v33, 0.0 }
 0x335   :  { %v2449_v18 = vsel %vm2397_vm11, %v2284_v33, %v2423_v26 }
 0x336   :  { %v2463_v44 = vpack.c.bf16 %v2449_v18, %v2449_v18 }
 0x338   :  { %v2285_v32 = vpop.f32.mrf.mxu3 }
 0x33a   :  { %2674 = vmatmul.bf16.gmra.mxu3 %v2464_v6 }
 0x340   :  { %2631 = vmatmul.bf16.gmra.mxu2 %v2463_v44 }
 0x35d   :  { %v2645_v7 = vpop.f32.mrf.mxu3 }
 0x363   :  { %v2602_v12 = vpop.f32.mrf.mxu2 }
 0x364   :  { %v2603_v15 = vadd.f32 %v5499_v63, %v2602_v12 }
 0x365   :  { %v2647_v22 = vpop.f32.mrf.mxu3 }
 0x366   :  { %v2646_v17 = vadd.f32 %v2645_v7, %v2603_v15 }
 0x368   :  { %vm2679_vm12 = vcmp.gt.f32.partialorder %v2646_v17, 0.0  ;;  %v2692_v52 = vmul.f32 0.2, %v2646_v17 }
 0x36a   :  { %v5502_v0 = vsel %vm2679_vm12, %v2646_v17, %v2692_v52 }
 0x36b   :  { %v2604_v48 = vpop.f32.mrf.mxu2  ;;  %v2718_v10 = vmul.f32 %v5502_v0, %v5502_v0 }
 0x36c   :  { %v2605_v46 = vadd.f32 %v5499_v63, %v2604_v48 }
 0x36d   :  { %v2650_v1 = vpop.f32.mrf.mxu3  ;;  %2731 = vadd.xlane.f32.xlu1 %v2718_v10 }
 0x36e   :  { %v2648_v9 = vadd.f32 %v2647_v22, %v2605_v46 }
 0x370   :  { %vm2680_vm13 = vcmp.gt.f32.partialorder %v2648_v9, 0.0  ;;  %v2693_v31 = vmul.f32 0.2, %v2648_v9 }
 0x372   :  { %v5507_v40 = vsel %vm2680_vm13, %v2648_v9, %v2693_v31 }
 0x373   :  { %v2607_v58 = vpop.f32.mrf.mxu2  ;;  %v2719_v59 = vmul.f32 %v5507_v40, %v5507_v40 }
 0x374   :  { %v2608_v51 = vadd.f32 %v5499_v63, %v2607_v58 }
 0x375   :  { %v2652_v42 = vpop.f32.mrf.mxu3  ;;  %2733 = vadd.xlane.f32.xlu2 %v2719_v59 }
 0x376   :  { %v2651_v61 = vadd.f32 %v2650_v1, %v2608_v51 }
 0x378   :  { %vm2681_vm14 = vcmp.gt.f32.partialorder %v2651_v61, 0.0  ;;  %v2694_v13 = vmul.f32 0.2, %v2651_v61 }
 0x37a   :  { %v5512_v25 = vsel %vm2681_vm14, %v2651_v61, %v2694_v13 }
 0x37b   :  { %v2609_v29 = vpop.f32.mrf.mxu2  ;;  %v2720_v24 = vmul.f32 %v5512_v25, %v5512_v25 }
 0x37c   :  { %v2610_v19 = vadd.f32 %v5499_v63, %v2609_v29 }
 0x37d   :  { %v2655_v55 = vpop.f32.mrf.mxu3  ;;  %2735 = vadd.xlane.f32.xlu0 %v2720_v24 }
 0x37e   :  { %v2653_v27 = vadd.f32 %v2652_v42, %v2610_v19 }
 0x380   :  { %vm2682_vm15 = vcmp.gt.f32.partialorder %v2653_v27, 0.0  ;;  %v2695_v41 = vmul.f32 0.2, %v2653_v27 }
 0x382   :  { %v5517_v3 = vsel %vm2682_vm15, %v2653_v27, %v2695_v41 }
 0x383   :  { %v2612_v37 = vpop.f32.mrf.mxu2  ;;  %v2721_v54 = vmul.f32 %v5517_v3, %v5517_v3 }
 0x384   :  { %v2613_v56 = vadd.f32 %v5499_v63, %v2612_v37 }
 0x385   :  { %v2657_v39 = vpop.f32.mrf.mxu3  ;;  %2737 = vadd.xlane.f32.xlu1 %v2721_v54 }
 0x386   :  { %v2656_v16 = vadd.f32 %v2655_v55, %v2613_v56 }
 0x388   :  { %vm2683_vm0 = vcmp.gt.f32.partialorder %v2656_v16, 0.0  ;;  %v2696_v8 = vmul.f32 0.2, %v2656_v16 }
 0x38a   :  { %v5522_v43 = vsel %vm2683_vm0, %v2656_v16, %v2696_v8 }
 0x38b   :  { %v2614_v20 = vpop.f32.mrf.mxu2  ;;  %v2722_v23 = vmul.f32 %v5522_v43, %v5522_v43 }
 0x38c   :  { %v2615_v5 = vadd.f32 %v5499_v63, %v2614_v20 }
 0x38d   :  { %v2660_v2 = vpop.f32.mrf.mxu3  ;;  %2739 = vadd.xlane.f32.xlu2 %v2722_v23 }
 0x38e   :  { %v2658_v14 = vadd.f32 %v2657_v39, %v2615_v5 }
 0x390   :  { %vm2684_vm1 = vcmp.gt.f32.partialorder %v2658_v14, 0.0  ;;  %v2697_v49 = vmul.f32 0.2, %v2658_v14 }
 0x392   :  { %v5527_v50 = vsel %vm2684_vm1, %v2658_v14, %v2697_v49 }
 0x393   :  { %v2617_v36 = vpop.f32.mrf.mxu2  ;;  %v2723_v38 = vmul.f32 %v5527_v50, %v5527_v50 }
 0x394   :  { %v2618_v57 = vadd.f32 %v5499_v63, %v2617_v36 }
 0x395   :  { %v2662_v34 = vpop.f32.mrf.mxu3  ;;  %2741 = vadd.xlane.f32.xlu0 %v2723_v38 }
 0x396   :  { %v2661_v62 = vadd.f32 %v2660_v2, %v2618_v57 }
 0x398   :  { %vm2685_vm2 = vcmp.gt.f32.partialorder %v2661_v62, 0.0  ;;  %v2698_v28 = vmul.f32 0.2, %v2661_v62 }
 0x39a   :  { %v5532_v45 = vsel %vm2685_vm2, %v2661_v62, %v2698_v28 }
 0x39b   :  { %v2619_v60 = vpop.f32.mrf.mxu2  ;;  %v2724_v21 = vmul.f32 %v5532_v45, %v5532_v45 }
 0x39c   :  { %v2620_v53 = vadd.f32 %v5499_v63, %v2619_v60 }
 0x39d   :  { %v2665_v47 = vpop.f32.mrf.mxu3  ;;  %2743 = vadd.xlane.f32.xlu1 %v2724_v21 }
 0x39e   :  { %v2663_v35 = vadd.f32 %v2662_v34, %v2620_v53 }
 0x3a0   :  { %vm2686_vm3 = vcmp.gt.f32.partialorder %v2663_v35, 0.0  ;;  %v2699_v30 = vmul.f32 0.2, %v2663_v35 }
 0x3a2   :  { %v5537_v4 = vsel %vm2686_vm3, %v2663_v35, %v2699_v30 }
 0x3a3   :  { %v2622_v33 = vpop.f32.mrf.mxu2  ;;  %v2725_v11 = vmul.f32 %v5537_v4, %v5537_v4 }
 0x3a4   :  { %v2623_v26 = vadd.f32 %v5499_v63, %v2622_v33 }
 0x3a5   :  { %v2667_v32 = vpop.f32.mrf.mxu3  ;;  %2745 = vadd.xlane.f32.xlu2 %v2725_v11 }
 0x3a6   :  { %v2666_v6 = vadd.f32 %v2665_v47, %v2623_v26 }
 0x3a8   :  { %vm2687_vm4 = vcmp.gt.f32.partialorder %v2666_v6, 0.0  ;;  %v2700_v18 = vmul.f32 0.2, %v2666_v6 }
 0x3aa   :  { %v5542_v44 = vsel %vm2687_vm4, %v2666_v6, %v2700_v18 }
 0x3ab   :  { %v2624_v7 = vpop.f32.mrf.mxu2  ;;  %v2726_v12 = vmul.f32 %v5542_v44, %v5542_v44 }
 0x3ac   :  { %v2625_v15 = vadd.f32 %v5499_v63, %v2624_v7 }
 0x3ad   :  { %v2670_v22 = vpop.f32.mrf.mxu3  ;;  %2747 = vadd.xlane.f32.xlu0 %v2726_v12 }
 0x3ae   :  { %v2668_v17 = vadd.f32 %v2667_v32, %v2625_v15 }
 0x3b0   :  { %vm2688_vm5 = vcmp.gt.f32.partialorder %v2668_v17, 0.0  ;;  %v2701_v52 = vmul.f32 0.2, %v2668_v17 }
 0x3b2   :  { %v5547_v48 = vsel %vm2688_vm5, %v2668_v17, %v2701_v52 }
 0x3b3   :  { %v2627_v10 = vpop.f32.mrf.mxu2  ;;  %v2727_v46 = vmul.f32 %v5547_v48, %v5547_v48 }
 0x3b4   :  { %v2628_v1 = vadd.f32 %v5499_v63, %v2627_v10 }
 0x3b5   :  { %v2672_v9 = vpop.f32.mrf.mxu3  ;;  %2749 = vadd.xlane.f32.xlu1 %v2727_v46 }
 0x3b6   :  { %v2671_v31 = vadd.f32 %v2670_v22, %v2628_v1 }
 0x3b8   :  { %vm2689_vm6 = vcmp.gt.f32.partialorder %v2671_v31, 0.0  ;;  %v2702_v58 = vmul.f32 0.2, %v2671_v31 }
 0x3ba   :  { %v5552_v59 = vsel %vm2689_vm6, %v2671_v31, %v2702_v58 }
 0x3bb   :  { %v2629_v51 = vpop.f32.mrf.mxu2  ;;  %v2728_v42 = vmul.f32 %v5552_v59, %v5552_v59 }
 0x3bc   :  { %v2630_v61 = vadd.f32 %v5499_v63, %v2629_v51 }
 0x3bd   :  { %v2675_v13 = vpop.f32.mrf.mxu3  ;;  %2751 = vadd.xlane.f32.xlu2 %v2728_v42 }
 0x3be   :  { %v2673_v29 = vadd.f32 %v2672_v9, %v2630_v61 }
 0x3c0   :  { %vm2690_vm7 = vcmp.gt.f32.partialorder %v2673_v29, 0.0  ;;  %v2703_v24 = vmul.f32 0.2, %v2673_v29 }
 0x3c2   :  { %v5557_v19 = vsel %vm2690_vm7, %v2673_v29, %v2703_v24 }
 0x3c3   :  { %v2632_v55 = vpop.f32.mrf.mxu2  ;;  %v2729_v27 = vmul.f32 %v5557_v19, %v5557_v19 }
 0x3c4   :  { %v2633_v41 = vadd.f32 %v5499_v63, %v2632_v55 }
 0x3c5   :  { %v2677_v37 = vpop.f32.mrf.mxu3  ;;  %2753 = vadd.xlane.f32.xlu0 %v2729_v27 }
 0x3c6   :  { %v2676_v54 = vadd.f32 %v2675_v13, %v2633_v41 }
 0x3c8   :  { %vm2691_vm8 = vcmp.gt.f32.partialorder %v2676_v54, 0.0  ;;  %v2704_v56 = vmul.f32 0.2, %v2676_v54 }
 0x3ca   :  { %v5562_v39 = vsel %vm2691_vm8, %v2676_v54, %v2704_v56 }
 0x3cb   :  { %v2634_v16 = vpop.f32.mrf.mxu2  ;;  %v2730_v8 = vmul.f32 %v5562_v39, %v5562_v39 }
 0x3cd   :  { %2755 = vadd.xlane.f32.xlu1 %v2730_v8 }
 0x3e0   :  { %v2732_v20 = vpop.xlane.xlu1 %2731 }
 0x3e1   :  { %v2757_v23 = vmax.f32 %v2732_v20, 1e-24 }
 0x3e3   :  { %3798 = vrsqrt.f32 %v2757_v23  ;;  %vm2776_vm10 = vweird.f32 %v2757_v23 }
 0x3e8   :  { %v2734_v5 = vpop.xlane.xlu2 %2733 }
 0x3e9   :  { %v3799_v2 = vpop.eup %3798  ;;  %v2758_v14 = vmax.f32 %v2734_v5, 1e-24 }
 0x3ea   :  { %v2771_v49 = vmul.f32 %v3799_v2, %v2757_v23  ;;  %vm2777_vm9 = vweird.f32 %v3799_v2 }
 0x3eb   :  { %3800 = vrsqrt.f32 %v2758_v14  ;;  %vm2778_vm11 = vmor %vm2776_vm10, %vm2777_vm9  ;;  %vm2786_vm13 = vweird.f32 %v2758_v14 }
 0x3ec   :  { %v2772_v63 = vmul.f32 %v3799_v2, %v2771_v49 }
 0x3ee   :  { %v2773_v36 = vmul.f32 0.5, %v2772_v63 }
 0x3f0   :  { %v2774_v38 = vsub.f32 1.5, %v2773_v36  ;;  %v2736_v57 = vpop.xlane.xlu0 %2735 }
 0x3f1   :  { %v3801_v34 = vpop.eup %3800  ;;  %v2759_v62 = vmax.f32 %v2736_v57, 1e-24 }
 0x3f2   :  { %v2775_v28 = vmul.f32 %v3799_v2, %v2774_v38  ;;  %v2781_v60 = vmul.f32 %v3801_v34, %v2758_v14  ;;  %vm2787_vm12 = vweird.f32 %v3801_v34 }
 0x3f3   :  { %3802 = vrsqrt.f32 %v2759_v62  ;;  %vm2788_vm14 = vmor %vm2786_vm13, %vm2787_vm12  ;;  %vm2796_vm0 = vweird.f32 %v2759_v62 }
 0x3f4   :  { %v2779_v21 = vsel %vm2778_vm11, %v3799_v2, %v2775_v28  ;;  %v2782_v53 = vmul.f32 %v3801_v34, %v2781_v60 }
 0x3f5   :  { %v2900_v47 = vmul.f32 %v2779_v21, %v5502_v0 }
 0x3f6   :  { %v2783_v35 = vmul.f32 0.5, %v2782_v53 }
 0x3f7   :  { %3598 = vst [vmem:[%s5625_s7 + $0x68] sm:$0xff] %v2900_v47 }
 0x3f8   :  { %v2784_v30 = vsub.f32 1.5, %v2783_v35  ;;  %v2738_v33 = vpop.xlane.xlu1 %2737 }
 0x3f9   :  { %v3803_v11 = vpop.eup %3802  ;;  %v2760_v26 = vmax.f32 %v2738_v33, 1e-24 }
 0x3fa   :  { %v2785_v32 = vmul.f32 %v3801_v34, %v2784_v30  ;;  %v2791_v6 = vmul.f32 %v3803_v11, %v2759_v62  ;;  %vm2797_vm15 = vweird.f32 %v3803_v11 }
 0x3fb   :  { %3804 = vrsqrt.f32 %v2760_v26  ;;  %vm2798_vm1 = vmor %vm2796_vm0, %vm2797_vm15  ;;  %vm2806_vm3 = vweird.f32 %v2760_v26 }
 0x3fc   :  { %v2789_v18 = vsel %vm2788_vm14, %v3801_v34, %v2785_v32  ;;  %v2792_v7 = vmul.f32 %v3803_v11, %v2791_v6 }
 0x3fd   :  { %v2901_v12 = vmul.f32 %v2789_v18, %v5507_v40 }
 0x3fe   :  { %v2793_v0 = vmul.f32 0.5, %v2792_v7 }
 0x3ff   :  { %3599 = vst [vmem:[%s5625_s7 + $0x70] sm:$0xff] %v2901_v12 }
 0x400   :  { %v2794_v15 = vsub.f32 1.5, %v2793_v0  ;;  %v2740_v22 = vpop.xlane.xlu2 %2739 }
 0x401   :  { %v3805_v17 = vpop.eup %3804  ;;  %v2761_v52 = vmax.f32 %v2740_v22, 1e-24 }
 0x402   :  { %v2795_v10 = vmul.f32 %v3803_v11, %v2794_v15  ;;  %v2801_v46 = vmul.f32 %v3805_v17, %v2760_v26  ;;  %vm2807_vm2 = vweird.f32 %v3805_v17 }
 0x403   :  { %3806 = vrsqrt.f32 %v2761_v52  ;;  %vm2808_vm4 = vmor %vm2806_vm3, %vm2807_vm2  ;;  %vm2816_vm6 = vweird.f32 %v2761_v52 }
 0x404   :  { %v2799_v1 = vsel %vm2798_vm1, %v3803_v11, %v2795_v10  ;;  %v2802_v9 = vmul.f32 %v3805_v17, %v2801_v46 }
 0x405   :  { %v2902_v31 = vmul.f32 %v2799_v1, %v5512_v25 }
 0x406   :  { %v2803_v40 = vmul.f32 0.5, %v2802_v9 }
 0x407   :  { %3600 = vst [vmem:[%s5625_s7 + $0x78] sm:$0xff] %v2902_v31 }
 0x408   :  { %v2804_v58 = vsub.f32 1.5, %v2803_v40  ;;  %v2742_v51 = vpop.xlane.xlu0 %2741 }
 0x409   :  { %v3807_v42 = vpop.eup %3806  ;;  %v2762_v61 = vmax.f32 %v2742_v51, 1e-24 }
 0x40a   :  { %v2805_v13 = vmul.f32 %v3805_v17, %v2804_v58  ;;  %v2811_v29 = vmul.f32 %v3807_v42, %v2761_v52  ;;  %vm2817_vm5 = vweird.f32 %v3807_v42 }
 0x40b   :  { %3808 = vrsqrt.f32 %v2762_v61  ;;  %vm2818_vm7 = vmor %vm2816_vm6, %vm2817_vm5  ;;  %vm2826_vm9 = vweird.f32 %v2762_v61 }
 0x40c   :  { %v2809_v24 = vsel %vm2808_vm4, %v3805_v17, %v2805_v13  ;;  %v2812_v55 = vmul.f32 %v3807_v42, %v2811_v29 }
 0x40d   :  { %v2903_v27 = vmul.f32 %v2809_v24, %v5517_v3 }
 0x40e   :  { %v2813_v25 = vmul.f32 0.5, %v2812_v55 }
 0x40f   :  { %3601 = vst [vmem:[%s5625_s7 + $0x80] sm:$0xff] %v2903_v27 }
 0x410   :  { %v2814_v41 = vsub.f32 1.5, %v2813_v25  ;;  %v2744_v37 = vpop.xlane.xlu1 %2743 }
 0x411   :  { %v3809_v54 = vpop.eup %3808  ;;  %v2763_v56 = vmax.f32 %v2744_v37, 1e-24 }
 0x412   :  { %v2815_v16 = vmul.f32 %v3807_v42, %v2814_v41  ;;  %v2821_v8 = vmul.f32 %v3809_v54, %v2762_v61  ;;  %vm2827_vm8 = vweird.f32 %v3809_v54 }
 0x413   :  { %3810 = vrsqrt.f32 %v2763_v56  ;;  %vm2828_vm10 = vmor %vm2826_vm9, %vm2827_vm8  ;;  %vm2836_vm12 = vweird.f32 %v2763_v56 }
 0x414   :  { %v2819_v20 = vsel %vm2818_vm7, %v3807_v42, %v2815_v16  ;;  %v2822_v23 = vmul.f32 %v3809_v54, %v2821_v8 }
 0x415   :  { %v2904_v5 = vmul.f32 %v2819_v20, %v5522_v43 }
 0x416   :  { %v2823_v3 = vmul.f32 0.5, %v2822_v23 }
 0x417   :  { %3602 = vst [vmem:[%s5625_s7 + $0x88] sm:$0xff] %v2904_v5 }
 0x418   :  { %v2824_v2 = vsub.f32 1.5, %v2823_v3  ;;  %v2746_v14 = vpop.xlane.xlu2 %2745 }
 0x419   :  { %v3811_v49 = vpop.eup %3810  ;;  %v2764_v63 = vmax.f32 %v2746_v14, 1e-24 }
 0x41a   :  { %v2825_v36 = vmul.f32 %v3809_v54, %v2824_v2  ;;  %v2831_v38 = vmul.f32 %v3811_v49, %v2763_v56  ;;  %vm2837_vm11 = vweird.f32 %v3811_v49 }
 0x41b   :  { %3812 = vrsqrt.f32 %v2764_v63  ;;  %vm2838_vm13 = vmor %vm2836_vm12, %vm2837_vm11  ;;  %vm2846_vm15 = vweird.f32 %v2764_v63 }
 0x41c   :  { %v2829_v57 = vsel %vm2828_vm10, %v3809_v54, %v2825_v36  ;;  %v2832_v34 = vmul.f32 %v3811_v49, %v2831_v38 }
 0x41d   :  { %v2905_v62 = vmul.f32 %v2829_v57, %v5527_v50 }
 0x41e   :  { %v2833_v43 = vmul.f32 0.5, %v2832_v34 }
 0x41f   :  { %3603 = vst [vmem:[%s5625_s7 + $0x90] sm:$0xff] %v2905_v62 }
 0x420   :  { %v2834_v28 = vsub.f32 1.5, %v2833_v43  ;;  %v2748_v60 = vpop.xlane.xlu0 %2747 }
 0x421   :  { %v3813_v21 = vpop.eup %3812  ;;  %v2765_v53 = vmax.f32 %v2748_v60, 1e-24 }
 0x422   :  { %v2835_v47 = vmul.f32 %v3811_v49, %v2834_v28  ;;  %v2841_v35 = vmul.f32 %v3813_v21, %v2764_v63  ;;  %vm2847_vm14 = vweird.f32 %v3813_v21 }
 0x423   :  { %3814 = vrsqrt.f32 %v2765_v53  ;;  %vm2848_vm0 = vmor %vm2846_vm15, %vm2847_vm14  ;;  %vm2856_vm2 = vweird.f32 %v2765_v53 }
 0x424   :  { %v2839_v30 = vsel %vm2838_vm13, %v3811_v49, %v2835_v47  ;;  %v2842_v33 = vmul.f32 %v3813_v21, %v2841_v35 }
 0x425   :  { %v2906_v11 = vmul.f32 %v2839_v30, %v5532_v45 }
 0x426   :  { %v2843_v50 = vmul.f32 0.5, %v2842_v33 }
 0x427   :  { %3604 = vst [vmem:[%s5625_s7 + $0x98] sm:$0xff] %v2906_v11 }
 0x428   :  { %v2844_v26 = vsub.f32 1.5, %v2843_v50  ;;  %v2750_v32 = vpop.xlane.xlu1 %2749 }
 0x429   :  { %v3815_v6 = vpop.eup %3814  ;;  %v2766_v18 = vmax.f32 %v2750_v32, 1e-24 }
 0x42a   :  { %v2845_v7 = vmul.f32 %v3813_v21, %v2844_v26  ;;  %v2851_v12 = vmul.f32 %v3815_v6, %v2765_v53  ;;  %vm2857_vm1 = vweird.f32 %v3815_v6 }
 0x42b   :  { %3816 = vrsqrt.f32 %v2766_v18  ;;  %vm2858_vm3 = vmor %vm2856_vm2, %vm2857_vm1  ;;  %vm2866_vm5 = vweird.f32 %v2766_v18 }
 0x42c   :  { %v2849_v0 = vsel %vm2848_vm0, %v3813_v21, %v2845_v7  ;;  %v2852_v15 = vmul.f32 %v3815_v6, %v2851_v12 }
 0x42d   :  { %v2907_v22 = vmul.f32 %v2849_v0, %v5537_v4 }
 0x42e   :  { %v2853_v45 = vmul.f32 0.5, %v2852_v15 }
 0x42f   :  { %3605 = vst [vmem:[%s5625_s7 + $0xa0] sm:$0xff] %v2907_v22 }
 0x430   :  { %v2854_v17 = vsub.f32 1.5, %v2853_v45  ;;  %v2752_v52 = vpop.xlane.xlu2 %2751 }
 0x431   :  { %v3817_v10 = vpop.eup %3816  ;;  %v2767_v46 = vmax.f32 %v2752_v52, 1e-24 }
 0x432   :  { %v2855_v1 = vmul.f32 %v3815_v6, %v2854_v17  ;;  %v2861_v9 = vmul.f32 %v3817_v10, %v2766_v18  ;;  %vm2867_vm4 = vweird.f32 %v3817_v10 }
 0x433   :  { %3818 = vrsqrt.f32 %v2767_v46  ;;  %vm2868_vm6 = vmor %vm2866_vm5, %vm2867_vm4  ;;  %vm2876_vm8 = vweird.f32 %v2767_v46 }
 0x434   :  { %v2859_v31 = vsel %vm2858_vm3, %v3815_v6, %v2855_v1  ;;  %v2862_v40 = vmul.f32 %v3817_v10, %v2861_v9 }
 0x435   :  { %v2908_v58 = vmul.f32 %v2859_v31, %v5542_v44 }
 0x436   :  { %v2863_v4 = vmul.f32 0.5, %v2862_v40 }
 0x437   :  { %3606 = vst [vmem:[%s5625_s7 + $0xa8] sm:$0xff] %v2908_v58 }
 0x438   :  { %v2864_v51 = vsub.f32 1.5, %v2863_v4  ;;  %v2754_v42 = vpop.xlane.xlu0 %2753 }
 0x439   :  { %v3819_v61 = vpop.eup %3818  ;;  %v2768_v13 = vmax.f32 %v2754_v42, 1e-24 }
 0x43a   :  { %v2865_v29 = vmul.f32 %v3817_v10, %v2864_v51  ;;  %v2871_v24 = vmul.f32 %v3819_v61, %v2767_v46  ;;  %vm2877_vm7 = vweird.f32 %v3819_v61 }
 0x43b   :  { %3820 = vrsqrt.f32 %v2768_v13  ;;  %vm2878_vm9 = vmor %vm2876_vm8, %vm2877_vm7  ;;  %vm2886_vm11 = vweird.f32 %v2768_v13 }
 0x43c   :  { %v2869_v55 = vsel %vm2868_vm6, %v3817_v10, %v2865_v29  ;;  %v2872_v27 = vmul.f32 %v3819_v61, %v2871_v24 }
 0x43d   :  { %v2909_v25 = vmul.f32 %v2869_v55, %v5547_v48 }
 0x43e   :  { %v2873_v44 = vmul.f32 0.5, %v2872_v27 }
 0x43f   :  { %3607 = vst [vmem:[%s5625_s7 + $0xb0] sm:$0xff] %v2909_v25 }
 0x440   :  { %v2874_v41 = vsub.f32 1.5, %v2873_v44  ;;  %v2756_v37 = vpop.xlane.xlu1 %2755 }
 0x441   :  { %v3821_v54 = vpop.eup %3820  ;;  %v2769_v56 = vmax.f32 %v2756_v37, 1e-24 }
 0x442   :  { %v2875_v16 = vmul.f32 %v3819_v61, %v2874_v41  ;;  %v2881_v8 = vmul.f32 %v3821_v54, %v2768_v13  ;;  %vm2887_vm10 = vweird.f32 %v3821_v54 }
 0x443   :  { %3822 = vrsqrt.f32 %v2769_v56  ;;  %vm2888_vm12 = vmor %vm2886_vm11, %vm2887_vm10  ;;  %vm2896_vm14 = vweird.f32 %v2769_v56 }
 0x444   :  { %v2879_v20 = vsel %vm2878_vm9, %v3819_v61, %v2875_v16  ;;  %v2882_v23 = vmul.f32 %v3821_v54, %v2881_v8 }
 0x445   :  { %v2910_v5 = vmul.f32 %v2879_v20, %v5552_v59 }
 0x446   :  { %v2883_v48 = vmul.f32 0.5, %v2882_v23 }
 0x447   :  { %3608 = vst [vmem:[%s5625_s7 + $0xb8] sm:$0xff] %v2910_v5 }
 0x448   :  { %v2884_v3 = vsub.f32 1.5, %v2883_v48 }
 0x449   :  { %v3823_v2 = vpop.eup %3822 }
 0x44a   :  { %v2885_v14 = vmul.f32 %v3821_v54, %v2884_v3  ;;  %v2891_v49 = vmul.f32 %v3823_v2, %v2769_v56  ;;  %vm2897_vm13 = vweird.f32 %v3823_v2 }
 0x44b   :  { %vm2898_vm15 = vmor %vm2896_vm14, %vm2897_vm13 }
 0x44c   :  { %v2889_v63 = vsel %vm2888_vm12, %v3821_v54, %v2885_v14  ;;  %v2892_v36 = vmul.f32 %v3823_v2, %v2891_v49 }
 0x44d   :  { %v2911_v38 = vmul.f32 %v2889_v63, %v5557_v19 }
 0x44e   :  { %v2893_v57 = vmul.f32 0.5, %v2892_v36 }
 0x44f   :  { %3609 = vst [vmem:[%s5625_s7 + $0xc0] sm:$0xff] %v2911_v38 }
 0x450   :  { %v2894_v59 = vsub.f32 1.5, %v2893_v57 }
 0x452   :  { %v2895_v34 = vmul.f32 %v3823_v2, %v2894_v59 }
 0x454   :  { %v2899_v62 = vsel %vm2898_vm15, %v3823_v2, %v2895_v34 }
 0x455   :  { %v2912_v43 = vmul.f32 %v2899_v62, %v5562_v39 }
 0x457   :  { %3610 = vst [vmem:[%s5625_s7 + $0xc8] sm:$0xff] %v2912_v43 }

</bundles_post_ra>
